<compile_context>
chip_gen: v7x
topology: tpu7x:2x2x1
jax: 0.10.0
libtpu: 0.0.40
codegen_flags: <defaults>
</compile_context>

<pallas_src>
import functools

import jax
import jax.numpy as jnp
from jax.experimental import pallas as pl
from jax.experimental.pallas import tpu as pltpu

EPS = 1e-5
LANE = 128


def _instance_norm(t, inv_hw):
    # Single-pass statistics (sum / sum-of-squares) over spatial dims of
    # (H, W, C); biased variance, eps=1e-5 (PyTorch InstanceNorm2d defaults).
    s = jnp.sum(t, axis=(0, 1), keepdims=True)
    s2 = jnp.sum(t * t, axis=(0, 1), keepdims=True)
    mean = s * inv_hw
    var = jnp.maximum(s2 * inv_hw - mean * mean, 0.0)
    return (t - mean) * jax.lax.rsqrt(var + EPS)


# --------------------- wide-contraction kernel (C % 128 == 0) ---------------------
def _resblock_kernel_wide(xp_ref, w1_ref, w2_ref, o_ref, wide_ref,
                          *, H, W, C, mm_dtype):
    """kx taps folded into the MXU contraction dim.

    wide_ref: (H+2, W, 3C) scratch in mm_dtype; lane strip kx*C:(kx+1)*C holds
    the kx-shifted column of the (reflection-padded) conv input, so each conv
    is 3 matmuls of (H*W, 3C) x (3C, C) and the f32 accumulator is
    read-modify-written only twice per conv.
    """
    inv_hw = 1.0 / float(H * W)

    def cast(v):
        return v if v.dtype == mm_dtype else v.astype(mm_dtype)

    def conv(w_ref):
        acc = None
        for ky in range(3):
            # Major-dim (row) offset slice: free.  Reshape is a view when W is
            # a multiple of the sublane tile (8 f32 / 16 bf16).
            patch = wide_ref[ky:ky + H].reshape(H * W, 3 * C)
            d = jnp.dot(patch, w_ref[ky], preferred_element_type=jnp.float32)
            acc = d if acc is None else acc + d
        return acc.reshape(H, W, C)

    # ---- conv1: wide buffer = the 3 kx-shifted columns of padded x --------
    for kx in range(3):
        wide_ref[:, :, kx * C:(kx + 1) * C] = cast(xp_ref[0, :, kx:kx + W, :])
    h = jnp.maximum(_instance_norm(conv(w1_ref), inv_hw), 0.0)   # IN + ReLU

    # ---- conv2: ReflectionPad2d(1) of h assembled directly into the wide
    # buffer (reused scratch), already cast to mm_dtype; no concatenates. ----
    hc = cast(h)
    # interior rows (1..H); per-kx column shift with left/right reflection
    wide_ref[1:H + 1, :, C:2 * C] = hc                                  # kx=1
    wide_ref[1:H + 1, 0:1, 0:C] = hc[:, 1:2]                            # kx=0
    wide_ref[1:H + 1, 1:W, 0:C] = hc[:, 0:W - 1]
    wide_ref[1:H + 1, 0:W - 1, 2 * C:3 * C] = hc[:, 1:W]                # kx=2
    wide_ref[1:H + 1, W - 1:W, 2 * C:3 * C] = hc[:, W - 2:W - 1]
    # reflected top/bottom rows (valid because H/W reflections commute)
    wide_ref[0:1, :, :] = wide_ref[2:3, :, :]
    wide_ref[H + 1:H + 2, :, :] = wide_ref[H - 1:H, :, :]

    h2 = _instance_norm(conv(w2_ref), inv_hw)

    # residual: the ky=kx=1 patch of padded x is the unpadded input (only the
    # center is cast to f32; the rest of xp stays in its native dtype).
    x_in = xp_ref[0, 1:H + 1, 1:W + 1, :].astype(jnp.float32)
    o_ref[0] = (x_in + h2).astype(o_ref.dtype)


# --------------------- per-tap fallback kernel (small / unaligned C) --------------
def _resblock_kernel_taps(xp_ref, w1_ref, w2_ref, o_ref, hpad_ref,
                          *, H, W, C, mm_dtype):
    """Fallback for C not a multiple of the 128-lane tile: 9 per-tap matmuls
    per conv with the width (sublane-axis) shift hoisted out of the ky loop."""
    inv_hw = 1.0 / float(H * W)

    def cast(v):
        return v if v.dtype == mm_dtype else v.astype(mm_dtype)

    def conv(read_col, w_ref):
        acc = None
        for kx in range(3):
            col = read_col(kx)                           # (H+2, W, C) mm_dtype
            for ky in range(3):
                patch = col[ky:ky + H].reshape(H * W, C)
                d = jnp.dot(patch, w_ref[ky * 3 + kx],
                            preferred_element_type=jnp.float32)
                acc = d if acc is None else acc + d
        return acc.reshape(H, W, C)

    # conv1 (reads padded x per column in native dtype, casts per column)
    h = jnp.maximum(
        _instance_norm(
            conv(lambda kx: cast(xp_ref[0, :, kx:kx + W, :]), w1_ref), inv_hw),
        0.0)

    # ReflectionPad2d(1) of h assembled in the mm_dtype scratch.
    hc = cast(h)
    hpad_ref[1:H + 1, 1:W + 1, :] = hc
    hpad_ref[0:1, 1:W + 1, :] = hc[1:2]
    hpad_ref[H + 1:H + 2, 1:W + 1, :] = hc[H - 2:H - 1]
    hpad_ref[:, 0:1, :] = hpad_ref[:, 2:3, :]
    hpad_ref[:, W + 1:W + 2, :] = hpad_ref[:, W - 1:W, :]

    h2 = _instance_norm(
        conv(lambda kx: hpad_ref[:, kx:kx + W, :], w2_ref), inv_hw)

    x_in = xp_ref[0, 1:H + 1, 1:W + 1, :].astype(jnp.float32)
    o_ref[0] = (x_in + h2).astype(o_ref.dtype)


# --------------------------------- wrapper ---------------------------------
def _vmem_budget_bytes(H, W, C, in_itemsize, out_itemsize, mm_itemsize,
                       wide_path):
    f32 = 4
    xp_blk = (H + 2) * (W + 2) * C * in_itemsize
    out_blk = H * W * C * out_itemsize
    w_blk = 2 * 3 * 3 * C * C * mm_itemsize
    if wide_path:
        scratch = (H + 2) * W * 3 * C * mm_itemsize
    else:
        scratch = (H + 2) * (W + 2) * C * mm_itemsize
    # compiler temporaries: f32 conv accumulator, h, h2/x_in, norm temps, plus
    # the matmul operand view when a relayout copy is needed.
    temps = 6 * H * W * C * f32 + 2 * (H + 2) * W * 3 * C * mm_itemsize
    budget = 2 * (xp_blk + out_blk + w_blk) + scratch + temps + (2 << 20)

    try:
        cap = int(pltpu.get_tpu_info().vmem_capacity_bytes)
    except Exception:
        cap = 64 << 20            # conservative: v7x physical VMEM per core
    cap = int(cap * 0.85)         # leave headroom for the pipelined DMA blocks
    return int(min(max(budget, 32 << 20), cap))


def residual_block_nhwc(x_nhwc, w1_hwio, w2_hwio, *, use_bf16=None):
    """Core entry point: NHWC activations, HWIO (3,3,Cin,Cout) weights."""
    N, H, W, C = x_nhwc.shape
    assert H >= 2 and W >= 2, "ReflectionPad2d(1) requires H, W >= 2"
    if use_bf16 is None:
        use_bf16 = C >= 128                     # MXU-bound regime on v6e/v7x
    mm_dtype = jnp.bfloat16 if use_bf16 else jnp.float32
    wide_path = (C % LANE == 0)                 # kx strips lane-tile aligned

    # NOTE (v5e): keep W a multiple of the sublane tile (8 for f32, 16 for
    # bf16) so the (H, W, K)->(H*W, K) reshape stays a layout-preserving view
    # and the kx slices don't trigger retiling copies.

    # Reflection-pad the input once in HBM; DMA the padded block (native dtype).
    xp = jnp.pad(x_nhwc, ((0, 0), (1, 1), (1, 1), (0, 0)), mode="reflect")

    if wide_path:
        # Stack the kx taps along Cin for each ky: (3,3,Ci,Co) -> (3, 3Ci, Co)
        w1 = w1_hwio.reshape(3, 3 * C, C).astype(mm_dtype)
        w2 = w2_hwio.reshape(3, 3 * C, C).astype(mm_dtype)
        w_shape = (3, 3 * C, C)
        kernel = functools.partial(_resblock_kernel_wide, H=H, W=W, C=C,
                                   mm_dtype=mm_dtype)
        scratch = pltpu.VMEM((H + 2, W, 3 * C), mm_dtype)
    else:
        w1 = w1_hwio.reshape(9, C, C).astype(mm_dtype)
        w2 = w2_hwio.reshape(9, C, C).astype(mm_dtype)
        w_shape = (9, C, C)
        kernel = functools.partial(_resblock_kernel_taps, H=H, W=W, C=C,
                                   mm_dtype=mm_dtype)
        scratch = pltpu.VMEM((H + 2, W + 2, C), mm_dtype)

    w_spec = pl.BlockSpec(w_shape, lambda n: (0, 0, 0))

    return pl.pallas_call(
        kernel,
        out_shape=jax.ShapeDtypeStruct((N, H, W, C), x_nhwc.dtype),
        grid_spec=pltpu.PrefetchScalarGridSpec(
            num_scalar_prefetch=0,
            grid=(N,),
            in_specs=[
                pl.BlockSpec((1, H + 2, W + 2, C), lambda n: (n, 0, 0, 0)),
                w_spec,
                w_spec,
            ],
            out_specs=pl.BlockSpec((1, H, W, C), lambda n: (n, 0, 0, 0)),
            scratch_shapes=[scratch],
        ),
        compiler_params=pltpu.CompilerParams(
            dimension_semantics=("parallel",),
            vmem_limit_bytes=_vmem_budget_bytes(
                H, W, C,
                x_nhwc.dtype.itemsize, x_nhwc.dtype.itemsize,
                jnp.dtype(mm_dtype).itemsize, wide_path),
        ),
    )(xp, w1, w2)


def residual_block(x_nchw, w1, b1, w2, b2, *, use_bf16=None):
    """PyTorch-parity entry: NCHW input, HWIO weights, per-channel biases.

    (PyTorch OIHW conv weights map to HWIO via transpose(2, 3, 1, 0).)
    The conv biases are accepted for interface parity but never used: the
    following InstanceNorm2d(affine=False) subtracts the per-(n, c) spatial
    mean, which cancels any per-channel constant bias exactly.
    NOTE: keep activations NHWC end-to-end in the surrounding model to avoid
    these two HBM transpose passes.
    """
    del b1, b2
    x = jnp.transpose(x_nchw, (0, 2, 3, 1))            # NCHW -> NHWC
    out = residual_block_nhwc(x, w1, w2, use_bf16=use_bf16)
    return jnp.transpose(out, (0, 3, 1, 2))            # NHWC -> NCHW


# --------------------------- pure-JAX reference ---------------------------
def _ref_residual_block(x_nchw, w1, b1, w2, b2):
    x = jnp.transpose(x_nchw, (0, 2, 3, 1))

    def pad(t):
        return jnp.pad(t, ((0, 0), (1, 1), (1, 1), (0, 0)), mode="reflect")

    def conv(t, w, b):
        return jax.lax.conv_general_dilated(
            pad(t), w, (1, 1), "VALID",
            dimension_numbers=("NHWC", "HWIO", "NHWC")) + b

    def inorm(t):
        m = jnp.mean(t, axis=(1, 2), keepdims=True)
        v = jnp.mean((t - m) ** 2, axis=(1, 2), keepdims=True)
        return (t - m) / jnp.sqrt(v + EPS)

    h = jnp.maximum(inorm(conv(x, w1, b1)), 0.0)
    h = inorm(conv(h, w2, b2))
    return jnp.transpose(x + h, (0, 3, 1, 2))


if __name__ == "__main__":
    key = jax.random.PRNGKey(0)

    # ---- small f32 path (C=4): exercises the per-tap fallback kernel ------
    N, C, H, W = 2, 4, 16, 16
    kx_, kw1, kb1, kw2, kb2, kq = jax.random.split(key, 6)
    x = jax.random.normal(kx_, (N, C, H, W), jnp.float32)
    bound = 1.0 / ((C * 9) ** 0.5)
    w1 = jax.random.uniform(kw1, (3, 3, C, C), jnp.float32, -bound, bound)
    b1 = jax.random.uniform(kb1, (C,), jnp.float32, -bound, bound)
    w2 = jax.random.uniform(kw2, (3, 3, C, C), jnp.float32, -bound, bound)
    b2 = jax.random.uniform(kb2, (C,), jnp.float32, -bound, bound)

    out = jax.block_until_ready(residual_block(x, w1, b1, w2, b2))
    ref = jax.block_until_ready(_ref_residual_block(x, w1, b1, w2, b2))
    assert out.shape == (N, C, H, W)
    # f32 matmul path; biases cancel mathematically, so the tight tolerance
    # still holds even though the kernel never adds them.
    assert jnp.max(jnp.abs(out - ref)) < 1e-4, "f32 path mismatch vs reference"

    # ---- bf16 / wide-contraction path (C=128): lane-aligned kx merge ------
    N2, C2, H2, W2 = 1, 128, 16, 16
    kx2, kw3, kw4 = jax.random.split(kq, 3)
    x2 = jax.random.normal(kx2, (N2, C2, H2, W2), jnp.float32)
    bound2 = 1.0 / ((C2 * 9) ** 0.5)
    w3 = jax.random.uniform(kw3, (3, 3, C2, C2), jnp.float32, -bound2, bound2)
    w4 = jax.random.uniform(kw4, (3, 3, C2, C2), jnp.float32, -bound2, bound2)
    zb = jnp.zeros((C2,), jnp.float32)

    out2 = jax.block_until_ready(residual_block(x2, w3, zb, w4, zb))
    ref2 = jax.block_until_ready(_ref_residual_block(x2, w3, zb, w4, zb))
    assert out2.shape == (N2, C2, H2, W2)
    # bf16 MXU operands with f32 accumulation on the production-shape path.
    assert jnp.max(jnp.abs(out2 - ref2)) < 0.15, "bf16 path mismatch vs reference"

    print("KERNEL_OK")
</pallas_src>

<mosaic_0001>
module attributes {stable_mosaic.version = 11 : i64} {
  func.func @_resblock_kernel_taps(%arg0: i32, %arg1: memref<1x18x18x4xf32, #tpu.memory_space<vmem>>, %arg2: memref<9x4x4xf32, #tpu.memory_space<vmem>>, %arg3: memref<9x4x4xf32, #tpu.memory_space<vmem>>, %arg4: memref<1x16x16x4xf32, #tpu.memory_space<vmem>>, %arg5: memref<18x18x4xf32, #tpu.memory_space<vmem>>) attributes {dimension_semantics = [#tpu.dimension_semantics<parallel>], iteration_bounds = array<i64: 2>, scalar_prefetch = 0 : i64, scratch_operands = 1 : i64, tpu.core_type = #tpu.core_type<tc>, window_params = [{transform_indices = @transform_0, window_bounds = array<i64: 1, 18, 18, 4>}, {pipeline_mode = #tpu.pipeline_mode<synchronous>, transform_indices = @transform_1, window_bounds = array<i64: 9, 4, 4>}, {pipeline_mode = #tpu.pipeline_mode<synchronous>, transform_indices = @transform_2, window_bounds = array<i64: 9, 4, 4>}, {transform_indices = @transform_3, window_bounds = array<i64: 1, 16, 16, 4>}]} {
    %c0 = arith.constant 0 : index
    %c0_0 = arith.constant 0 : index
    %c0_1 = arith.constant 0 : index
    %c0_2 = arith.constant 0 : index
    %0 = vector.load %arg1[%c0, %c0_0, %c0_1, %c0_2] : memref<1x18x18x4xf32, #tpu.memory_space<vmem>>, vector<1x18x16x4xf32>
    %1 = vector.shape_cast %0 : vector<1x18x16x4xf32> to vector<18x16x4xf32>
    %2 = vector.extract_strided_slice %1 {offsets = [0, 0, 0], sizes = [16, 16, 4], strides = [1, 1, 1]} : vector<18x16x4xf32> to vector<16x16x4xf32>
    %3 = vector.shape_cast %2 : vector<16x16x4xf32> to vector<256x4xf32>
    %c0_3 = arith.constant 0 : index
    %c0_4 = arith.constant 0 : index
    %c0_5 = arith.constant 0 : index
    %4 = vector.load %arg2[%c0_3, %c0_4, %c0_5] : memref<9x4x4xf32, #tpu.memory_space<vmem>>, vector<1x4x4xf32>
    %5 = vector.shape_cast %4 : vector<1x4x4xf32> to vector<4x4xf32>
    %cst = arith.constant dense<0.000000e+00> : vector<256x4xf32>
    %6 = tpu.matmul %3, %5, %cst {dimension_numbers = #tpu.dot_dimension_numbers<[1], [0], [0], [1], [0, 0, 1, 1], [], []>} : vector<256x4xf32>, vector<4x4xf32>, vector<256x4xf32> -> vector<256x4xf32>
    %7 = vector.extract_strided_slice %1 {offsets = [1, 0, 0], sizes = [16, 16, 4], strides = [1, 1, 1]} : vector<18x16x4xf32> to vector<16x16x4xf32>
    %8 = vector.shape_cast %7 : vector<16x16x4xf32> to vector<256x4xf32>
    %c3 = arith.constant 3 : index
    %c0_6 = arith.constant 0 : index
    %c0_7 = arith.constant 0 : index
    %9 = vector.load %arg2[%c3, %c0_6, %c0_7] : memref<9x4x4xf32, #tpu.memory_space<vmem>>, vector<1x4x4xf32>
    %10 = vector.shape_cast %9 : vector<1x4x4xf32> to vector<4x4xf32>
    %cst_8 = arith.constant dense<0.000000e+00> : vector<256x4xf32>
    %11 = tpu.matmul %8, %10, %cst_8 {dimension_numbers = #tpu.dot_dimension_numbers<[1], [0], [0], [1], [0, 0, 1, 1], [], []>} : vector<256x4xf32>, vector<4x4xf32>, vector<256x4xf32> -> vector<256x4xf32>
    %12 = arith.addf %6, %11 : vector<256x4xf32>
    %13 = vector.extract_strided_slice %1 {offsets = [2, 0, 0], sizes = [16, 16, 4], strides = [1, 1, 1]} : vector<18x16x4xf32> to vector<16x16x4xf32>
    %14 = vector.shape_cast %13 : vector<16x16x4xf32> to vector<256x4xf32>
    %c6 = arith.constant 6 : index
    %c0_9 = arith.constant 0 : index
    %c0_10 = arith.constant 0 : index
    %15 = vector.load %arg2[%c6, %c0_9, %c0_10] : memref<9x4x4xf32, #tpu.memory_space<vmem>>, vector<1x4x4xf32>
    %16 = vector.shape_cast %15 : vector<1x4x4xf32> to vector<4x4xf32>
    %cst_11 = arith.constant dense<0.000000e+00> : vector<256x4xf32>
    %17 = tpu.matmul %14, %16, %cst_11 {dimension_numbers = #tpu.dot_dimension_numbers<[1], [0], [0], [1], [0, 0, 1, 1], [], []>} : vector<256x4xf32>, vector<4x4xf32>, vector<256x4xf32> -> vector<256x4xf32>
    %18 = arith.addf %12, %17 : vector<256x4xf32>
    %c0_12 = arith.constant 0 : index
    %c0_13 = arith.constant 0 : index
    %c1 = arith.constant 1 : index
    %c0_14 = arith.constant 0 : index
    %19 = vector.load %arg1[%c0_12, %c0_13, %c1, %c0_14] : memref<1x18x18x4xf32, #tpu.memory_space<vmem>>, vector<1x18x16x4xf32>
    %20 = vector.shape_cast %19 : vector<1x18x16x4xf32> to vector<18x16x4xf32>
    %21 = vector.extract_strided_slice %20 {offsets = [0, 0, 0], sizes = [16, 16, 4], strides = [1, 1, 1]} : vector<18x16x4xf32> to vector<16x16x4xf32>
    %22 = vector.shape_cast %21 : vector<16x16x4xf32> to vector<256x4xf32>
    %c1_15 = arith.constant 1 : index
    %c0_16 = arith.constant 0 : index
    %c0_17 = arith.constant 0 : index
    %23 = vector.load %arg2[%c1_15, %c0_16, %c0_17] : memref<9x4x4xf32, #tpu.memory_space<vmem>>, vector<1x4x4xf32>
    %24 = vector.shape_cast %23 : vector<1x4x4xf32> to vector<4x4xf32>
    %cst_18 = arith.constant dense<0.000000e+00> : vector<256x4xf32>
    %25 = tpu.matmul %22, %24, %cst_18 {dimension_numbers = #tpu.dot_dimension_numbers<[1], [0], [0], [1], [0, 0, 1, 1], [], []>} : vector<256x4xf32>, vector<4x4xf32>, vector<256x4xf32> -> vector<256x4xf32>
    %26 = arith.addf %18, %25 : vector<256x4xf32>
    %27 = vector.extract_strided_slice %20 {offsets = [1, 0, 0], sizes = [16, 16, 4], strides = [1, 1, 1]} : vector<18x16x4xf32> to vector<16x16x4xf32>
    %28 = vector.shape_cast %27 : vector<16x16x4xf32> to vector<256x4xf32>
    %c4 = arith.constant 4 : index
    %c0_19 = arith.constant 0 : index
    %c0_20 = arith.constant 0 : index
    %29 = vector.load %arg2[%c4, %c0_19, %c0_20] : memref<9x4x4xf32, #tpu.memory_space<vmem>>, vector<1x4x4xf32>
    %30 = vector.shape_cast %29 : vector<1x4x4xf32> to vector<4x4xf32>
    %cst_21 = arith.constant dense<0.000000e+00> : vector<256x4xf32>
    %31 = tpu.matmul %28, %30, %cst_21 {dimension_numbers = #tpu.dot_dimension_numbers<[1], [0], [0], [1], [0, 0, 1, 1], [], []>} : vector<256x4xf32>, vector<4x4xf32>, vector<256x4xf32> -> vector<256x4xf32>
    %32 = arith.addf %26, %31 : vector<256x4xf32>
    %33 = vector.extract_strided_slice %20 {offsets = [2, 0, 0], sizes = [16, 16, 4], strides = [1, 1, 1]} : vector<18x16x4xf32> to vector<16x16x4xf32>
    %34 = vector.shape_cast %33 : vector<16x16x4xf32> to vector<256x4xf32>
    %c7 = arith.constant 7 : index
    %c0_22 = arith.constant 0 : index
    %c0_23 = arith.constant 0 : index
    %35 = vector.load %arg2[%c7, %c0_22, %c0_23] : memref<9x4x4xf32, #tpu.memory_space<vmem>>, vector<1x4x4xf32>
    %36 = vector.shape_cast %35 : vector<1x4x4xf32> to vector<4x4xf32>
    %cst_24 = arith.constant dense<0.000000e+00> : vector<256x4xf32>
    %37 = tpu.matmul %34, %36, %cst_24 {dimension_numbers = #tpu.dot_dimension_numbers<[1], [0], [0], [1], [0, 0, 1, 1], [], []>} : vector<256x4xf32>, vector<4x4xf32>, vector<256x4xf32> -> vector<256x4xf32>
    %38 = arith.addf %32, %37 : vector<256x4xf32>
    %c0_25 = arith.constant 0 : index
    %c0_26 = arith.constant 0 : index
    %c2 = arith.constant 2 : index
    %c0_27 = arith.constant 0 : index
    %39 = vector.load %arg1[%c0_25, %c0_26, %c2, %c0_27] : memref<1x18x18x4xf32, #tpu.memory_space<vmem>>, vector<1x18x16x4xf32>
    %40 = vector.shape_cast %39 : vector<1x18x16x4xf32> to vector<18x16x4xf32>
    %41 = vector.extract_strided_slice %40 {offsets = [0, 0, 0], sizes = [16, 16, 4], strides = [1, 1, 1]} : vector<18x16x4xf32> to vector<16x16x4xf32>
    %42 = vector.shape_cast %41 : vector<16x16x4xf32> to vector<256x4xf32>
    %c2_28 = arith.constant 2 : index
    %c0_29 = arith.constant 0 : index
    %c0_30 = arith.constant 0 : index
    %43 = vector.load %arg2[%c2_28, %c0_29, %c0_30] : memref<9x4x4xf32, #tpu.memory_space<vmem>>, vector<1x4x4xf32>
    %44 = vector.shape_cast %43 : vector<1x4x4xf32> to vector<4x4xf32>
    %cst_31 = arith.constant dense<0.000000e+00> : vector<256x4xf32>
    %45 = tpu.matmul %42, %44, %cst_31 {dimension_numbers = #tpu.dot_dimension_numbers<[1], [0], [0], [1], [0, 0, 1, 1], [], []>} : vector<256x4xf32>, vector<4x4xf32>, vector<256x4xf32> -> vector<256x4xf32>
    %46 = arith.addf %38, %45 : vector<256x4xf32>
    %47 = vector.extract_strided_slice %40 {offsets = [1, 0, 0], sizes = [16, 16, 4], strides = [1, 1, 1]} : vector<18x16x4xf32> to vector<16x16x4xf32>
    %48 = vector.shape_cast %47 : vector<16x16x4xf32> to vector<256x4xf32>
    %c5 = arith.constant 5 : index
    %c0_32 = arith.constant 0 : index
    %c0_33 = arith.constant 0 : index
    %49 = vector.load %arg2[%c5, %c0_32, %c0_33] : memref<9x4x4xf32, #tpu.memory_space<vmem>>, vector<1x4x4xf32>
    %50 = vector.shape_cast %49 : vector<1x4x4xf32> to vector<4x4xf32>
    %cst_34 = arith.constant dense<0.000000e+00> : vector<256x4xf32>
    %51 = tpu.matmul %48, %50, %cst_34 {dimension_numbers = #tpu.dot_dimension_numbers<[1], [0], [0], [1], [0, 0, 1, 1], [], []>} : vector<256x4xf32>, vector<4x4xf32>, vector<256x4xf32> -> vector<256x4xf32>
    %52 = arith.addf %46, %51 : vector<256x4xf32>
    %53 = vector.extract_strided_slice %40 {offsets = [2, 0, 0], sizes = [16, 16, 4], strides = [1, 1, 1]} : vector<18x16x4xf32> to vector<16x16x4xf32>
    %54 = vector.shape_cast %53 : vector<16x16x4xf32> to vector<256x4xf32>
    %c8 = arith.constant 8 : index
    %c0_35 = arith.constant 0 : index
    %c0_36 = arith.constant 0 : index
    %55 = vector.load %arg2[%c8, %c0_35, %c0_36] : memref<9x4x4xf32, #tpu.memory_space<vmem>>, vector<1x4x4xf32>
    %56 = vector.shape_cast %55 : vector<1x4x4xf32> to vector<4x4xf32>
    %cst_37 = arith.constant dense<0.000000e+00> : vector<256x4xf32>
    %57 = tpu.matmul %54, %56, %cst_37 {dimension_numbers = #tpu.dot_dimension_numbers<[1], [0], [0], [1], [0, 0, 1, 1], [], []>} : vector<256x4xf32>, vector<4x4xf32>, vector<256x4xf32> -> vector<256x4xf32>
    %58 = arith.addf %52, %57 : vector<256x4xf32>
    %59 = vector.shape_cast %58 : vector<256x4xf32> to vector<16x16x4xf32>
    %cst_38 = arith.constant dense<0.000000e+00> : vector<4xf32>
    %60 = vector.multi_reduction <add>, %59, %cst_38 [0, 1] : vector<16x16x4xf32> to vector<4xf32>
    %61 = vector.shape_cast %60 : vector<4xf32> to vector<1x1x4xf32>
    %62 = arith.mulf %59, %59 : vector<16x16x4xf32>
    %cst_39 = arith.constant dense<0.000000e+00> : vector<4xf32>
    %63 = vector.multi_reduction <add>, %62, %cst_39 [0, 1] : vector<16x16x4xf32> to vector<4xf32>
    %64 = vector.shape_cast %63 : vector<4xf32> to vector<1x1x4xf32>
    %cst_40 = arith.constant 3.906250e-03 : f32
    %65 = vector.broadcast %cst_40 : f32 to vector<1x1x4xf32>
    %66 = arith.mulf %61, %65 : vector<1x1x4xf32>
    %cst_41 = arith.constant 3.906250e-03 : f32
    %67 = vector.broadcast %cst_41 : f32 to vector<1x1x4xf32>
    %68 = arith.mulf %64, %67 : vector<1x1x4xf32>
    %69 = arith.mulf %66, %66 : vector<1x1x4xf32>
    %70 = arith.subf %68, %69 : vector<1x1x4xf32>
    %cst_42 = arith.constant 0.000000e+00 : f32
    %71 = vector.broadcast %cst_42 : f32 to vector<1x1x4xf32>
    %72 = arith.maximumf %70, %71 : vector<1x1x4xf32>
    %73 = vector.broadcast %66 : vector<1x1x4xf32> to vector<16x16x4xf32>
    %74 = arith.subf %59, %73 : vector<16x16x4xf32>
    %cst_43 = arith.constant 9.99999974E-6 : f32
    %75 = vector.broadcast %cst_43 : f32 to vector<1x1x4xf32>
    %76 = arith.addf %72, %75 : vector<1x1x4xf32>
    %77 = math.rsqrt %76 : vector<1x1x4xf32>
    %78 = vector.broadcast %77 : vector<1x1x4xf32> to vector<16x16x4xf32>
    %79 = arith.mulf %74, %78 : vector<16x16x4xf32>
    %cst_44 = arith.constant 0.000000e+00 : f32
    %80 = vector.broadcast %cst_44 : f32 to vector<16x16x4xf32>
    %81 = arith.maximumf %79, %80 : vector<16x16x4xf32>
    %c1_45 = arith.constant 1 : index
    %c1_46 = arith.constant 1 : index
    %c0_47 = arith.constant 0 : index
    %82 = vector.load %arg5[%c1_45, %c1_46, %c0_47] : memref<18x18x4xf32, #tpu.memory_space<vmem>>, vector<16x16x4xf32>
    tpu.vector_store %arg5[%c1_45, %c1_46, %c0_47], %81 {strides = array<i32>} : memref<18x18x4xf32, #tpu.memory_space<vmem>>, vector<16x16x4xf32>,
    %83 = vector.extract_strided_slice %81 {offsets = [1, 0, 0], sizes = [1, 16, 4], strides = [1, 1, 1]} : vector<16x16x4xf32> to vector<1x16x4xf32>
    %c0_48 = arith.constant 0 : index
    %c1_49 = arith.constant 1 : index
    %c0_50 = arith.constant 0 : index
    %84 = vector.load %arg5[%c0_48, %c1_49, %c0_50] : memref<18x18x4xf32, #tpu.memory_space<vmem>>, vector<1x16x4xf32>
    tpu.vector_store %arg5[%c0_48, %c1_49, %c0_50], %83 {strides = array<i32>} : memref<18x18x4xf32, #tpu.memory_space<vmem>>, vector<1x16x4xf32>,
    %85 = vector.extract_strided_slice %81 {offsets = [14, 0, 0], sizes = [1, 16, 4], strides = [1, 1, 1]} : vector<16x16x4xf32> to vector<1x16x4xf32>
    %c17 = arith.constant 17 : index
    %c1_51 = arith.constant 1 : index
    %c0_52 = arith.constant 0 : index
    %86 = vector.load %arg5[%c17, %c1_51, %c0_52] : memref<18x18x4xf32, #tpu.memory_space<vmem>>, vector<1x16x4xf32>
    tpu.vector_store %arg5[%c17, %c1_51, %c0_52], %85 {strides = array<i32>} : memref<18x18x4xf32, #tpu.memory_space<vmem>>, vector<1x16x4xf32>,
    %c0_53 = arith.constant 0 : index
    %c2_54 = arith.constant 2 : index
    %c0_55 = arith.constant 0 : index
    %87 = vector.load %arg5[%c0_53, %c2_54, %c0_55] : memref<18x18x4xf32, #tpu.memory_space<vmem>>, vector<18x1x4xf32>
    %c0_56 = arith.constant 0 : index
    %c0_57 = arith.constant 0 : index
    %c0_58 = arith.constant 0 : index
    %88 = vector.load %arg5[%c0_56, %c0_57, %c0_58] : memref<18x18x4xf32, #tpu.memory_space<vmem>>, vector<18x1x4xf32>
    tpu.vector_store %arg5[%c0_56, %c0_57, %c0_58], %87 {strides = array<i32>} : memref<18x18x4xf32, #tpu.memory_space<vmem>>, vector<18x1x4xf32>,
    %c0_59 = arith.constant 0 : index
    %c15 = arith.constant 15 : index
    %c0_60 = arith.constant 0 : index
    %89 = vector.load %arg5[%c0_59, %c15, %c0_60] : memref<18x18x4xf32, #tpu.memory_space<vmem>>, vector<18x1x4xf32>
    %c0_61 = arith.constant 0 : index
    %c17_62 = arith.constant 17 : index
    %c0_63 = arith.constant 0 : index
    %90 = vector.load %arg5[%c0_61, %c17_62, %c0_63] : memref<18x18x4xf32, #tpu.memory_space<vmem>>, vector<18x1x4xf32>
    tpu.vector_store %arg5[%c0_61, %c17_62, %c0_63], %89 {strides = array<i32>} : memref<18x18x4xf32, #tpu.memory_space<vmem>>, vector<18x1x4xf32>,
    %c0_64 = arith.constant 0 : index
    %c0_65 = arith.constant 0 : index
    %c0_66 = arith.constant 0 : index
    %91 = vector.load %arg5[%c0_64, %c0_65, %c0_66] : memref<18x18x4xf32, #tpu.memory_space<vmem>>, vector<18x16x4xf32>
    %92 = vector.extract_strided_slice %91 {offsets = [0, 0, 0], sizes = [16, 16, 4], strides = [1, 1, 1]} : vector<18x16x4xf32> to vector<16x16x4xf32>
    %93 = vector.shape_cast %92 : vector<16x16x4xf32> to vector<256x4xf32>
    %c0_67 = arith.constant 0 : index
    %c0_68 = arith.constant 0 : index
    %c0_69 = arith.constant 0 : index
    %94 = vector.load %arg3[%c0_67, %c0_68, %c0_69] : memref<9x4x4xf32, #tpu.memory_space<vmem>>, vector<1x4x4xf32>
    %95 = vector.shape_cast %94 : vector<1x4x4xf32> to vector<4x4xf32>
    %cst_70 = arith.constant dense<0.000000e+00> : vector<256x4xf32>
    %96 = tpu.matmul %93, %95, %cst_70 {dimension_numbers = #tpu.dot_dimension_numbers<[1], [0], [0], [1], [0, 0, 1, 1], [], []>} : vector<256x4xf32>, vector<4x4xf32>, vector<256x4xf32> -> vector<256x4xf32>
    %97 = vector.extract_strided_slice %91 {offsets = [1, 0, 0], sizes = [16, 16, 4], strides = [1, 1, 1]} : vector<18x16x4xf32> to vector<16x16x4xf32>
    %98 = vector.shape_cast %97 : vector<16x16x4xf32> to vector<256x4xf32>
    %c3_71 = arith.constant 3 : index
    %c0_72 = arith.constant 0 : index
    %c0_73 = arith.constant 0 : index
    %99 = vector.load %arg3[%c3_71, %c0_72, %c0_73] : memref<9x4x4xf32, #tpu.memory_space<vmem>>, vector<1x4x4xf32>
    %100 = vector.shape_cast %99 : vector<1x4x4xf32> to vector<4x4xf32>
    %cst_74 = arith.constant dense<0.000000e+00> : vector<256x4xf32>
    %101 = tpu.matmul %98, %100, %cst_74 {dimension_numbers = #tpu.dot_dimension_numbers<[1], [0], [0], [1], [0, 0, 1, 1], [], []>} : vector<256x4xf32>, vector<4x4xf32>, vector<256x4xf32> -> vector<256x4xf32>
    %102 = arith.addf %96, %101 : vector<256x4xf32>
    %103 = vector.extract_strided_slice %91 {offsets = [2, 0, 0], sizes = [16, 16, 4], strides = [1, 1, 1]} : vector<18x16x4xf32> to vector<16x16x4xf32>
    %104 = vector.shape_cast %103 : vector<16x16x4xf32> to vector<256x4xf32>
    %c6_75 = arith.constant 6 : index
    %c0_76 = arith.constant 0 : index
    %c0_77 = arith.constant 0 : index
    %105 = vector.load %arg3[%c6_75, %c0_76, %c0_77] : memref<9x4x4xf32, #tpu.memory_space<vmem>>, vector<1x4x4xf32>
    %106 = vector.shape_cast %105 : vector<1x4x4xf32> to vector<4x4xf32>
    %cst_78 = arith.constant dense<0.000000e+00> : vector<256x4xf32>
    %107 = tpu.matmul %104, %106, %cst_78 {dimension_numbers = #tpu.dot_dimension_numbers<[1], [0], [0], [1], [0, 0, 1, 1], [], []>} : vector<256x4xf32>, vector<4x4xf32>, vector<256x4xf32> -> vector<256x4xf32>
    %108 = arith.addf %102, %107 : vector<256x4xf32>
    %c0_79 = arith.constant 0 : index
    %c1_80 = arith.constant 1 : index
    %c0_81 = arith.constant 0 : index
    %109 = vector.load %arg5[%c0_79, %c1_80, %c0_81] : memref<18x18x4xf32, #tpu.memory_space<vmem>>, vector<18x16x4xf32>
    %110 = vector.extract_strided_slice %109 {offsets = [0, 0, 0], sizes = [16, 16, 4], strides = [1, 1, 1]} : vector<18x16x4xf32> to vector<16x16x4xf32>
    %111 = vector.shape_cast %110 : vector<16x16x4xf32> to vector<256x4xf32>
    %c1_82 = arith.constant 1 : index
    %c0_83 = arith.constant 0 : index
    %c0_84 = arith.constant 0 : index
    %112 = vector.load %arg3[%c1_82, %c0_83, %c0_84] : memref<9x4x4xf32, #tpu.memory_space<vmem>>, vector<1x4x4xf32>
    %113 = vector.shape_cast %112 : vector<1x4x4xf32> to vector<4x4xf32>
    %cst_85 = arith.constant dense<0.000000e+00> : vector<256x4xf32>
    %114 = tpu.matmul %111, %113, %cst_85 {dimension_numbers = #tpu.dot_dimension_numbers<[1], [0], [0], [1], [0, 0, 1, 1], [], []>} : vector<256x4xf32>, vector<4x4xf32>, vector<256x4xf32> -> vector<256x4xf32>
    %115 = arith.addf %108, %114 : vector<256x4xf32>
    %116 = vector.extract_strided_slice %109 {offsets = [1, 0, 0], sizes = [16, 16, 4], strides = [1, 1, 1]} : vector<18x16x4xf32> to vector<16x16x4xf32>
    %117 = vector.shape_cast %116 : vector<16x16x4xf32> to vector<256x4xf32>
    %c4_86 = arith.constant 4 : index
    %c0_87 = arith.constant 0 : index
    %c0_88 = arith.constant 0 : index
    %118 = vector.load %arg3[%c4_86, %c0_87, %c0_88] : memref<9x4x4xf32, #tpu.memory_space<vmem>>, vector<1x4x4xf32>
    %119 = vector.shape_cast %118 : vector<1x4x4xf32> to vector<4x4xf32>
    %cst_89 = arith.constant dense<0.000000e+00> : vector<256x4xf32>
    %120 = tpu.matmul %117, %119, %cst_89 {dimension_numbers = #tpu.dot_dimension_numbers<[1], [0], [0], [1], [0, 0, 1, 1], [], []>} : vector<256x4xf32>, vector<4x4xf32>, vector<256x4xf32> -> vector<256x4xf32>
    %121 = arith.addf %115, %120 : vector<256x4xf32>
    %122 = vector.extract_strided_slice %109 {offsets = [2, 0, 0], sizes = [16, 16, 4], strides = [1, 1, 1]} : vector<18x16x4xf32> to vector<16x16x4xf32>
    %123 = vector.shape_cast %122 : vector<16x16x4xf32> to vector<256x4xf32>
    %c7_90 = arith.constant 7 : index
    %c0_91 = arith.constant 0 : index
    %c0_92 = arith.constant 0 : index
    %124 = vector.load %arg3[%c7_90, %c0_91, %c0_92] : memref<9x4x4xf32, #tpu.memory_space<vmem>>, vector<1x4x4xf32>
    %125 = vector.shape_cast %124 : vector<1x4x4xf32> to vector<4x4xf32>
    %cst_93 = arith.constant dense<0.000000e+00> : vector<256x4xf32>
    %126 = tpu.matmul %123, %125, %cst_93 {dimension_numbers = #tpu.dot_dimension_numbers<[1], [0], [0], [1], [0, 0, 1, 1], [], []>} : vector<256x4xf32>, vector<4x4xf32>, vector<256x4xf32> -> vector<256x4xf32>
    %127 = arith.addf %121, %126 : vector<256x4xf32>
    %c0_94 = arith.constant 0 : index
    %c2_95 = arith.constant 2 : index
    %c0_96 = arith.constant 0 : index
    %128 = vector.load %arg5[%c0_94, %c2_95, %c0_96] : memref<18x18x4xf32, #tpu.memory_space<vmem>>, vector<18x16x4xf32>
    %129 = vector.extract_strided_slice %128 {offsets = [0, 0, 0], sizes = [16, 16, 4], strides = [1, 1, 1]} : vector<18x16x4xf32> to vector<16x16x4xf32>
    %130 = vector.shape_cast %129 : vector<16x16x4xf32> to vector<256x4xf32>
    %c2_97 = arith.constant 2 : index
    %c0_98 = arith.constant 0 : index
    %c0_99 = arith.constant 0 : index
    %131 = vector.load %arg3[%c2_97, %c0_98, %c0_99] : memref<9x4x4xf32, #tpu.memory_space<vmem>>, vector<1x4x4xf32>
    %132 = vector.shape_cast %131 : vector<1x4x4xf32> to vector<4x4xf32>
    %cst_100 = arith.constant dense<0.000000e+00> : vector<256x4xf32>
    %133 = tpu.matmul %130, %132, %cst_100 {dimension_numbers = #tpu.dot_dimension_numbers<[1], [0], [0], [1], [0, 0, 1, 1], [], []>} : vector<256x4xf32>, vector<4x4xf32>, vector<256x4xf32> -> vector<256x4xf32>
    %134 = arith.addf %127, %133 : vector<256x4xf32>
    %135 = vector.extract_strided_slice %128 {offsets = [1, 0, 0], sizes = [16, 16, 4], strides = [1, 1, 1]} : vector<18x16x4xf32> to vector<16x16x4xf32>
    %136 = vector.shape_cast %135 : vector<16x16x4xf32> to vector<256x4xf32>
    %c5_101 = arith.constant 5 : index
    %c0_102 = arith.constant 0 : index
    %c0_103 = arith.constant 0 : index
    %137 = vector.load %arg3[%c5_101, %c0_102, %c0_103] : memref<9x4x4xf32, #tpu.memory_space<vmem>>, vector<1x4x4xf32>
    %138 = vector.shape_cast %137 : vector<1x4x4xf32> to vector<4x4xf32>
    %cst_104 = arith.constant dense<0.000000e+00> : vector<256x4xf32>
    %139 = tpu.matmul %136, %138, %cst_104 {dimension_numbers = #tpu.dot_dimension_numbers<[1], [0], [0], [1], [0, 0, 1, 1], [], []>} : vector<256x4xf32>, vector<4x4xf32>, vector<256x4xf32> -> vector<256x4xf32>
    %140 = arith.addf %134, %139 : vector<256x4xf32>
    %141 = vector.extract_strided_slice %128 {offsets = [2, 0, 0], sizes = [16, 16, 4], strides = [1, 1, 1]} : vector<18x16x4xf32> to vector<16x16x4xf32>
    %142 = vector.shape_cast %141 : vector<16x16x4xf32> to vector<256x4xf32>
    %c8_105 = arith.constant 8 : index
    %c0_106 = arith.constant 0 : index
    %c0_107 = arith.constant 0 : index
    %143 = vector.load %arg3[%c8_105, %c0_106, %c0_107] : memref<9x4x4xf32, #tpu.memory_space<vmem>>, vector<1x4x4xf32>
    %144 = vector.shape_cast %143 : vector<1x4x4xf32> to vector<4x4xf32>
    %cst_108 = arith.constant dense<0.000000e+00> : vector<256x4xf32>
    %145 = tpu.matmul %142, %144, %cst_108 {dimension_numbers = #tpu.dot_dimension_numbers<[1], [0], [0], [1], [0, 0, 1, 1], [], []>} : vector<256x4xf32>, vector<4x4xf32>, vector<256x4xf32> -> vector<256x4xf32>
    %146 = arith.addf %140, %145 : vector<256x4xf32>
    %147 = vector.shape_cast %146 : vector<256x4xf32> to vector<16x16x4xf32>
    %cst_109 = arith.constant dense<0.000000e+00> : vector<4xf32>
    %148 = vector.multi_reduction <add>, %147, %cst_109 [0, 1] : vector<16x16x4xf32> to vector<4xf32>
    %149 = vector.shape_cast %148 : vector<4xf32> to vector<1x1x4xf32>
    %150 = arith.mulf %147, %147 : vector<16x16x4xf32>
    %cst_110 = arith.constant dense<0.000000e+00> : vector<4xf32>
    %151 = vector.multi_reduction <add>, %150, %cst_110 [0, 1] : vector<16x16x4xf32> to vector<4xf32>
    %152 = vector.shape_cast %151 : vector<4xf32> to vector<1x1x4xf32>
    %cst_111 = arith.constant 3.906250e-03 : f32
    %153 = vector.broadcast %cst_111 : f32 to vector<1x1x4xf32>
    %154 = arith.mulf %149, %153 : vector<1x1x4xf32>
    %cst_112 = arith.constant 3.906250e-03 : f32
    %155 = vector.broadcast %cst_112 : f32 to vector<1x1x4xf32>
    %156 = arith.mulf %152, %155 : vector<1x1x4xf32>
    %157 = arith.mulf %154, %154 : vector<1x1x4xf32>
    %158 = arith.subf %156, %157 : vector<1x1x4xf32>
    %cst_113 = arith.constant 0.000000e+00 : f32
    %159 = vector.broadcast %cst_113 : f32 to vector<1x1x4xf32>
    %160 = arith.maximumf %158, %159 : vector<1x1x4xf32>
    %161 = vector.broadcast %154 : vector<1x1x4xf32> to vector<16x16x4xf32>
    %162 = arith.subf %147, %161 : vector<16x16x4xf32>
    %cst_114 = arith.constant 9.99999974E-6 : f32
    %163 = vector.broadcast %cst_114 : f32 to vector<1x1x4xf32>
    %164 = arith.addf %160, %163 : vector<1x1x4xf32>
    %165 = math.rsqrt %164 : vector<1x1x4xf32>
    %166 = vector.broadcast %165 : vector<1x1x4xf32> to vector<16x16x4xf32>
    %167 = arith.mulf %162, %166 : vector<16x16x4xf32>
    %c0_115 = arith.constant 0 : index
    %c1_116 = arith.constant 1 : index
    %c1_117 = arith.constant 1 : index
    %c0_118 = arith.constant 0 : index
    %168 = vector.load %arg1[%c0_115, %c1_116, %c1_117, %c0_118] : memref<1x18x18x4xf32, #tpu.memory_space<vmem>>, vector<1x16x16x4xf32>
    %169 = vector.shape_cast %168 : vector<1x16x16x4xf32> to vector<16x16x4xf32>
    %170 = arith.addf %169, %167 : vector<16x16x4xf32>
    %c0_119 = arith.constant 0 : index
    %c0_120 = arith.constant 0 : index
    %c0_121 = arith.constant 0 : index
    %c0_122 = arith.constant 0 : index
    %171 = vector.load %arg4[%c0_119, %c0_120, %c0_121, %c0_122] : memref<1x16x16x4xf32, #tpu.memory_space<vmem>>, vector<1x16x16x4xf32>
    %172 = vector.shape_cast %171 : vector<1x16x16x4xf32> to vector<16x16x4xf32>
    %173 = vector.shape_cast %170 : vector<16x16x4xf32> to vector<1x16x16x4xf32>
    tpu.vector_store %arg4[%c0_119, %c0_120, %c0_121, %c0_122], %173 {strides = array<i32>} : memref<1x16x16x4xf32, #tpu.memory_space<vmem>>, vector<1x16x16x4xf32>,
    return
  }
  func.func @transform_0(%arg0: i32) -> (i32, i32, i32, i32) {
    %c0_i32 = arith.constant 0 : i32
    %c0_i32_0 = arith.constant 0 : i32
    %c0_i32_1 = arith.constant 0 : i32
    %c0_i32_2 = arith.constant 0 : i32
    return %arg0, %c0_i32, %c0_i32_0, %c0_i32_1 : i32, i32, i32, i32
  }
  func.func @transform_1(%arg0: i32) -> (i32, i32, i32) {
    %c0_i32 = arith.constant 0 : i32
    %c0_i32_0 = arith.constant 0 : i32
    %c0_i32_1 = arith.constant 0 : i32
    %c0_i32_2 = arith.constant 0 : i32
    return %c0_i32, %c0_i32_0, %c0_i32_1 : i32, i32, i32
  }
  func.func @transform_2(%arg0: i32) -> (i32, i32, i32) {
    %c0_i32 = arith.constant 0 : i32
    %c0_i32_0 = arith.constant 0 : i32
    %c0_i32_1 = arith.constant 0 : i32
    %c0_i32_2 = arith.constant 0 : i32
    return %c0_i32, %c0_i32_0, %c0_i32_1 : i32, i32, i32
  }
  func.func @transform_3(%arg0: i32) -> (i32, i32, i32, i32) {
    %c0_i32 = arith.constant 0 : i32
    %c0_i32_0 = arith.constant 0 : i32
    %c0_i32_1 = arith.constant 0 : i32
    %c0_i32_2 = arith.constant 0 : i32
    return %arg0, %c0_i32, %c0_i32_0, %c0_i32_1 : i32, i32, i32, i32
  }
}

</mosaic_0001>

<bundles_post_ra>
// kernel: tpu_custom_call.1
= control target key start
LH: loop header
LB: loop body
LE: loop exit
PB: predicated region body
PF: predicated region fallthrough
CT: control target
= control target key end

     0   :  { %s9100_s12 = smov 0   ;;  %s11667_s0 = inlined_call_operand.vmem [shape: f32[2,18,18,4], index: 0, kind: input, shape index: {}]   ;;  %s11668_s1 = inlined_call_operand.vmem [shape: f32[9,4,4], index: 1, kind: input, shape index: {}]   ;;  %s11669_s2 = inlined_call_operand.vmem [shape: f32[9,4,4], index: 2, kind: input, shape index: {}]   ;;  %s11670_s3 = inlined_call_operand.vmem [shape: f32[2,16,16,4], index: 3, kind: output, shape index: {}]  }
   0x1 LB: > { %s6400_s13 = sadd.s32 4294967295, %s9078_s12   ;;  %p6404_p0 = scmp.ge.s32.totalorder %s9078_s12, 1  ;;  %s9078_s12 = sphi %s9100_s12, %s13_s12  }
   0x2   : > { %p137_p1 = scmp.lt.s32.totalorder %s9078_s12, 3 }
   0x4   : > { %p138_p2 = pnand %p6404_p0, %p137_p1 }
   0x6   : > { %141 = sbr.rel (%p138_p2) target bundleno = 1735 (0x6c7), region = 32 }
   0xd   : > { %v6408_v0 = vld [vmem:[%s11668_s1 + $0xc] sm:$0xf]  ;;  %vm307_vm0 = vcmask 1043456   ;;  %p161_p3 = scmp.lt.s32.totalorder %s6400_s13, 1  ;;  %v207_v1 = vld [vmem:[%s11668_s1] sm:$0xf] }
   0xe   : > { %7647 = vmatprep.subr.msk.mxu0 %vm307_vm0, %v6408_v0  ;;  %vm210_vm1 = vcmask 31744   ;;  %v9139_v5 = vld [vmem:[%s11668_s1 + $0x18] sm:$0xf]  ;;  %v6509_v37 = vld [vmem:[%s11668_s1 + $0x4] sm:$0xf]  ;;  %vm3227_vm2 = vcmask 24576  }
   0xf   : > { %7648 = vmatpush3.msk.msra.mxu0 %vm307_vm0, %v6408_v0  ;;  %s11674_s13 = smov (!%p161_p3, %s6400_s13), 1  ;;  %v6543_v38 = vld [vmem:[%s11668_s1 + $0x10] sm:$0xf]  ;;  %v9441_v44 = vld [vmem:[%s11668_s1 + $0x1c] sm:$0xf] }
  0x10   : > { %7697 = vmatprep.subr.msk.mxu0 %vm307_vm0, %v207_v1  ;;  %s9059_s18 = smul.u32 432, %s11674_s13  ;;  %s7052_s30 = sshll.u32 %s11674_s13, 8 }
  0x11   : > { %s11552_s5 = scalar_lea.vmem %s11670_s3, %s7052_s30 }
  0x12   : > { %s9123_s21 = scalar_lea.vmem %s11667_s0, %s9059_s18 }
  0x13   : > { %v9126_v2 = vld [vmem:[%s9123_s21 + $0x18] sm:$0xff]  ;;  %v9129_v3 = vld [vmem:[%s9123_s21 + $0x20] sm:$0xff]  ;;  %v9132_v4 = vld [vmem:[%s9123_s21 + $0x30] sm:$0xff] }
  0x14   : > { %7649 = vmatprep.mubr.msk.f32.mxu0 %vm210_vm1, %v9126_v2  ;;  %v9147_v6 = vld [vmem:[%s9123_s21 + $0x38] sm:$0xff]  ;;  %v9150_v7 = vld [vmem:[%s9123_s21 + $0x48] sm:$0xff]  ;;  %v9159_v8 = vld [vmem:[%s9123_s21 + $0x50] sm:$0xff] }
  0x15   : > { %7650 = vmatmul.mubr.msk.f32.vlgmr.msra.gmra.mrb[0].mxu0 %vm210_vm1, %v9129_v3  ;;  %v9162_v9 = vld [vmem:[%s9123_s21 + $0x60] sm:$0xff]  ;;  %v9169_v10 = vld [vmem:[%s9123_s21 + $0x68] sm:$0xff]  ;;  %v9172_v11 = vld [vmem:[%s9123_s21 + $0x78] sm:$0xff] }
  0x16   : > { %7698 = vmatpush3.msk.msra.mxu0 %vm307_vm0, %v207_v1  ;;  %7652 = vmatprep.mubr.msk.f32.mxu0 %vm210_vm1, %v9132_v4  ;;  %v9179_v12 = vld [vmem:[%s9123_s21 + $0x80] sm:$0xff]  ;;  %v9182_v13 = vld [vmem:[%s9123_s21 + $0x90] sm:$0xff]  ;;  %v9189_v14 = vld [vmem:[%s9123_s21 + $0x98] sm:$0xff] }
  0x17   : > { %7747 = vmatprep.subr.msk.mxu0 %vm307_vm0, %v9139_v5  ;;  %v9192_v15 = vld [vmem:[%s9123_s21 + $0xa8] sm:$0xff]  ;;  %v9199_v16 = vld [vmem:[%s9123_s21 + $0xb0] sm:$0xff]  ;;  %v9202_v17 = vld [vmem:[%s9123_s21 + $0xc0] sm:$0xff] }
  0x18   : > { %v9209_v18 = vld [vmem:[%s9123_s21 + $0xc8] sm:$0xff]  ;;  %v9212_v19 = vld [vmem:[%s9123_s21 + $0xd8] sm:$0xff]  ;;  %v9219_v20 = vld [vmem:[%s9123_s21 + $0xe0] sm:$0xff] }
  0x19   : > { %7653 = vmatmul.mubr.msk.f32.gmra.mrb[2].mxu0 %vm210_vm1, %v9147_v6  ;;  %v9222_v21 = vld [vmem:[%s9123_s21 + $0xf0] sm:$0xff]  ;;  %v9229_v22 = vld [vmem:[%s9123_s21 + $0xf8] sm:$0xff]  ;;  %v9232_v23 = vld [vmem:[%s9123_s21 + $0x108] sm:$0xff] }
  0x1a   : > { %7655 = vmatprep.mubr.msk.f32.mxu0 %vm210_vm1, %v9150_v7  ;;  %v9239_v24 = vld [vmem:[%s9123_s21 + $0x110] sm:$0xff]  ;;  %v9242_v25 = vld [vmem:[%s9123_s21 + $0x120] sm:$0xff]  ;;  %v9249_v26 = vld [vmem:[%s9123_s21 + $0x128] sm:$0xff] }
  0x1b   : > { %v9252_v27 = vld [vmem:[%s9123_s21 + $0x138] sm:$0xff]  ;;  %v9259_v28 = vld [vmem:[%s9123_s21 + $0x140] sm:$0xff]  ;;  %v9262_v29 = vld [vmem:[%s9123_s21 + $0x150] sm:$0xff] }
  0x1c   : > { %v9269_v30 = vld [vmem:[%s9123_s21 + $0x158] sm:$0xff]  ;;  %v9272_v31 = vld [vmem:[%s9123_s21 + $0x168] sm:$0xff]  ;;  %v9279_v32 = vld [vmem:[%s9123_s21 + $0x170] sm:$0xff] }
  0x1d   : > { %7656 = vmatmul.mubr.msk.f32.gmra.mrb[4].mxu0 %vm210_vm1, %v9159_v8  ;;  %v9282_v33 = vld [vmem:[%s9123_s21 + $0x180] sm:$0xff]  ;;  %v9289_v34 = vld [vmem:[%s9123_s21 + $0x188] sm:$0xff]  ;;  %v205_v39 = vld [vmem:[%s9123_s21 + $0x198] sm:$0xff] }
  0x1e   : > { %7658 = vmatprep.mubr.msk.f32.mxu0 %vm210_vm1, %v9162_v9  ;;  %v171_v35 = vld [vmem:[%s9123_s21] sm:$0xff]  ;;  %v172_v36 = vld [vmem:[%s9123_s21 + $0x8] sm:$0xff]  ;;  %v9449_v46 = vld [vmem:[%s9123_s21 + $0x31] sm:$0xff] }
  0x1f   : > { %v206_v40 = vld [vmem:[%s9123_s21 + $0x1a0] sm:$0xff]  ;;  %v1039_v42 = vld [vmem:[%s9123_s21 + $0x9] sm:$0xff]  ;;  %v9467_v49 = vld [vmem:[%s9123_s21 + $0x51] sm:$0xff] }
  0x20   : > { %v1038_v41 = vld [vmem:[%s9123_s21 + $0x1] sm:$0xff]  ;;  %v9436_v43 = vld [vmem:[%s9123_s21 + $0x19] sm:$0xff]  ;;  %v9460_v48 = vld [vmem:[%s9123_s21 + $0x49] sm:$0xff] }
  0x21   : > { %7659 = vmatmul.mubr.msk.f32.gmra.mrb[6].mxu0 %vm210_vm1, %v9169_v10  ;;  %v1041_v45 = vld [vmem:[%s9123_s21 + $0x21] sm:$0xff]  ;;  %v9457_v47 = vld [vmem:[%s9123_s21 + $0x39] sm:$0xff]  ;;  %v9477_v51 = vld [vmem:[%s9123_s21 + $0x69] sm:$0xff] }
  0x22   : > { %7661 = vmatprep.mubr.msk.f32.mxu0 %vm210_vm1, %v9172_v11  ;;  %v9470_v50 = vld [vmem:[%s9123_s21 + $0x61] sm:$0xff]  ;;  %v9480_v52 = vld [vmem:[%s9123_s21 + $0x79] sm:$0xff]  ;;  %v9490_v54 = vld [vmem:[%s9123_s21 + $0x91] sm:$0xff] }
  0x23   : > { %v9487_v53 = vld [vmem:[%s9123_s21 + $0x81] sm:$0xff]  ;;  %v9497_v55 = vld [vmem:[%s9123_s21 + $0x99] sm:$0xff]  ;;  %v9500_v56 = vld [vmem:[%s9123_s21 + $0xa9] sm:$0xff] }
  0x24   : > { %v9507_v57 = vld [vmem:[%s9123_s21 + $0xb1] sm:$0xff]  ;;  %v9510_v58 = vld [vmem:[%s9123_s21 + $0xc1] sm:$0xff]  ;;  %v9517_v59 = vld [vmem:[%s9123_s21 + $0xc9] sm:$0xff] }
  0x25   : > { %7662 = vmatmul.mubr.msk.f32.gmra.mrb[8].mxu0 %vm210_vm1, %v9179_v12  ;;  %v9520_v60 = vld [vmem:[%s9123_s21 + $0xd9] sm:$0xff]  ;;  %v9527_v61 = vld [vmem:[%s9123_s21 + $0xe1] sm:$0xff]  ;;  %v9530_v62 = vld [vmem:[%s9123_s21 + $0xf1] sm:$0xff] }
  0x26   : > { %7664 = vmatprep.mubr.msk.f32.mxu0 %vm210_vm1, %v9182_v13  ;;  %v9537_v63 = vld [vmem:[%s9123_s21 + $0xf9] sm:$0xff]  ;;  %v9540_v0 = vld [vmem:[%s9123_s21 + $0x109] sm:$0xff]  ;;  %v9547_v1 = vld [vmem:[%s9123_s21 + $0x111] sm:$0xff] }
  0x29   : > { %7665 = vmatmul.mubr.msk.f32.gmra.mrb[10].mxu0 %vm210_vm1, %v9189_v14 }
  0x2a   : > { %7667 = vmatprep.mubr.msk.f32.mxu0 %vm210_vm1, %v9192_v15 }
  0x2d   : > { %7668 = vmatmul.mubr.msk.f32.gmra.mrb[12].mxu0 %vm210_vm1, %v9199_v16 }
  0x2e   : > { %7670 = vmatprep.mubr.msk.f32.mxu0 %vm210_vm1, %v9202_v17 }
  0x31   : > { %7671 = vmatmul.mubr.msk.f32.gmra.mrb[14].mxu0 %vm210_vm1, %v9209_v18 }
  0x32   : > { %7673 = vmatprep.mubr.msk.f32.mxu0 %vm210_vm1, %v9212_v19 }
  0x35   : > { %7674 = vmatmul.mubr.msk.f32.gmra.mrb[16].mxu0 %vm210_vm1, %v9219_v20 }
  0x36   : > { %7676 = vmatprep.mubr.msk.f32.mxu0 %vm210_vm1, %v9222_v21 }
  0x39   : > { %7677 = vmatmul.mubr.msk.f32.gmra.mrb[18].mxu0 %vm210_vm1, %v9229_v22 }
  0x3a   : > { %7679 = vmatprep.mubr.msk.f32.mxu0 %vm210_vm1, %v9232_v23 }
  0x3d   : > { %7680 = vmatmul.mubr.msk.f32.gmra.mrb[20].mxu0 %vm210_vm1, %v9239_v24 }
  0x3e   : > { %7682 = vmatprep.mubr.msk.f32.mxu0 %vm210_vm1, %v9242_v25 }
  0x41   : > { %7683 = vmatmul.mubr.msk.f32.gmra.mrb[22].mxu0 %vm210_vm1, %v9249_v26 }
  0x42   : > { %7685 = vmatprep.mubr.msk.f32.mxu0 %vm210_vm1, %v9252_v27 }
  0x45   : > { %7686 = vmatmul.mubr.msk.f32.gmra.mrb[24].mxu0 %vm210_vm1, %v9259_v28 }
  0x46   : > { %7688 = vmatprep.mubr.msk.f32.mxu0 %vm210_vm1, %v9262_v29 }
  0x49   : > { %7689 = vmatmul.mubr.msk.f32.gmra.mrb[26].mxu0 %vm210_vm1, %v9269_v30 }
  0x4a   : > { %7691 = vmatprep.mubr.msk.f32.mxu0 %vm210_vm1, %v9272_v31 }
  0x4d   : > { %7692 = vmatmul.mubr.msk.f32.gmra.mrb[28].mxu0 %vm210_vm1, %v9279_v32 }
  0x4e   : > { %7694 = vmatprep.mubr.msk.f32.mxu0 %vm210_vm1, %v9282_v33 }
  0x51   : > { %7695 = vmatmul.mubr.msk.f32.gmra.mrb[30].mxu0 %vm210_vm1, %v9289_v34 }
  0x52   : > { %7699 = vmatprep.mubr.msk.f32.mxu0 %vm210_vm1, %v171_v35  ;;  %v9815_v35 = vld [vmem:[%s9123_s21 + $0xda] sm:$0xff] }
  0x55   : > { %7700 = vmatmul.mubr.msk.f32.vlgmr.msra.gmra.mrb[0].mxu0 %vm210_vm1, %v172_v36  ;;  %v9822_v36 = vld [vmem:[%s9123_s21 + $0xe2] sm:$0xff] }
  0x56   : > { %7748 = vmatpush3.msk.msra.mxu0 %vm307_vm0, %v9139_v5  ;;  %7702 = vmatprep.mubr.msk.f32.mxu0 %vm210_vm1, %v9126_v2  ;;  %v9550_v2 = vld [vmem:[%s9123_s21 + $0x121] sm:$0xff] }
  0x57   : > { %7797 = vmatprep.subr.msk.mxu0 %vm307_vm0, %v6509_v37  ;;  %v9567_v5 = vld [vmem:[%s9123_s21 + $0x141] sm:$0xff] }
  0x59   : > { %7703 = vmatmul.mubr.msk.f32.gmra.mrb[2].mxu0 %vm210_vm1, %v9129_v3  ;;  %v9557_v3 = vld [vmem:[%s9123_s21 + $0x129] sm:$0xff] }
  0x5a   : > { %7705 = vmatprep.mubr.msk.f32.mxu0 %vm210_vm1, %v9132_v4 }
  0x5d   : > { %7706 = vmatmul.mubr.msk.f32.gmra.mrb[4].mxu0 %vm210_vm1, %v9147_v6 }
  0x5e   : > { %7708 = vmatprep.mubr.msk.f32.mxu0 %vm210_vm1, %v9150_v7 }
  0x61   : > { %7709 = vmatmul.mubr.msk.f32.gmra.mrb[6].mxu0 %vm210_vm1, %v9159_v8 }
  0x62   : > { %7711 = vmatprep.mubr.msk.f32.mxu0 %vm210_vm1, %v9162_v9 }
  0x65   : > { %7712 = vmatmul.mubr.msk.f32.gmra.mrb[8].mxu0 %vm210_vm1, %v9169_v10 }
  0x66   : > { %7714 = vmatprep.mubr.msk.f32.mxu0 %vm210_vm1, %v9172_v11 }
  0x69   : > { %7715 = vmatmul.mubr.msk.f32.gmra.mrb[10].mxu0 %vm210_vm1, %v9179_v12 }
  0x6a   : > { %7717 = vmatprep.mubr.msk.f32.mxu0 %vm210_vm1, %v9182_v13 }
  0x6d   : > { %7718 = vmatmul.mubr.msk.f32.gmra.mrb[12].mxu0 %vm210_vm1, %v9189_v14 }
  0x6e   : > { %7720 = vmatprep.mubr.msk.f32.mxu0 %vm210_vm1, %v9192_v15 }
  0x71   : > { %7721 = vmatmul.mubr.msk.f32.gmra.mrb[14].mxu0 %vm210_vm1, %v9199_v16 }
  0x72   : > { %7723 = vmatprep.mubr.msk.f32.mxu0 %vm210_vm1, %v9202_v17 }
  0x75   : > { %7724 = vmatmul.mubr.msk.f32.gmra.mrb[16].mxu0 %vm210_vm1, %v9209_v18 }
  0x76   : > { %7726 = vmatprep.mubr.msk.f32.mxu0 %vm210_vm1, %v9212_v19 }
  0x79   : > { %7727 = vmatmul.mubr.msk.f32.gmra.mrb[18].mxu0 %vm210_vm1, %v9219_v20 }
  0x7a   : > { %7729 = vmatprep.mubr.msk.f32.mxu0 %vm210_vm1, %v9222_v21 }
  0x7d   : > { %7730 = vmatmul.mubr.msk.f32.gmra.mrb[20].mxu0 %vm210_vm1, %v9229_v22 }
  0x7e   : > { %7732 = vmatprep.mubr.msk.f32.mxu0 %vm210_vm1, %v9232_v23 }
  0x81   : > { %7733 = vmatmul.mubr.msk.f32.gmra.mrb[22].mxu0 %vm210_vm1, %v9239_v24 }
  0x82   : > { %7735 = vmatprep.mubr.msk.f32.mxu0 %vm210_vm1, %v9242_v25 }
  0x85   : > { %7736 = vmatmul.mubr.msk.f32.gmra.mrb[24].mxu0 %vm210_vm1, %v9249_v26 }
  0x86   : > { %7738 = vmatprep.mubr.msk.f32.mxu0 %vm210_vm1, %v9252_v27 }
  0x89   : > { %7739 = vmatmul.mubr.msk.f32.gmra.mrb[26].mxu0 %vm210_vm1, %v9259_v28 }
  0x8a   : > { %7741 = vmatprep.mubr.msk.f32.mxu0 %vm210_vm1, %v9262_v29 }
  0x8d   : > { %7742 = vmatmul.mubr.msk.f32.gmra.mrb[28].mxu0 %vm210_vm1, %v9269_v30 }
  0x8e   : > { %7744 = vmatprep.mubr.msk.f32.mxu0 %vm210_vm1, %v9272_v31 }
  0x91   : > { %7745 = vmatmul.mubr.msk.f32.gmra.mrb[30].mxu0 %vm210_vm1, %v9279_v32 }
  0x92   : > { %7749 = vmatprep.mubr.msk.f32.mxu0 %vm210_vm1, %v9132_v4  ;;  %v9560_v4 = vld [vmem:[%s9123_s21 + $0x139] sm:$0xff] }
  0x95   : > { %7750 = vmatmul.mubr.msk.f32.vlgmr.msra.gmra.mrb[0].mxu0 %vm210_vm1, %v9147_v6  ;;  %v9570_v6 = vld [vmem:[%s9123_s21 + $0x151] sm:$0xff] }
  0x96   : > { %7798 = vmatpush3.msk.msra.mxu0 %vm307_vm0, %v6509_v37  ;;  %7752 = vmatprep.mubr.msk.f32.mxu0 %vm210_vm1, %v9150_v7  ;;  %v9577_v7 = vld [vmem:[%s9123_s21 + $0x159] sm:$0xff] }
  0x97   : > { %7847 = vmatprep.subr.msk.mxu0 %vm307_vm0, %v6543_v38  ;;  %v9825_v37 = vld [vmem:[%s9123_s21 + $0xf2] sm:$0xff] }
  0x99   : > { %7753 = vmatmul.mubr.msk.f32.gmra.mrb[2].mxu0 %vm210_vm1, %v9159_v8  ;;  %v9580_v8 = vld [vmem:[%s9123_s21 + $0x169] sm:$0xff] }
  0x9a   : > { %7755 = vmatprep.mubr.msk.f32.mxu0 %vm210_vm1, %v9162_v9  ;;  %v9587_v9 = vld [vmem:[%s9123_s21 + $0x171] sm:$0xff] }
  0x9d   : > { %7756 = vmatmul.mubr.msk.f32.gmra.mrb[4].mxu0 %vm210_vm1, %v9169_v10  ;;  %v6611_v10 = vld [vmem:[%s11668_s1 + $0x8] sm:$0xf] }
  0x9e   : > { %7758 = vmatprep.mubr.msk.f32.mxu0 %vm210_vm1, %v9172_v11  ;;  %v1070_v11 = vld [vmem:[%s9123_s21 + $0x181] sm:$0xff] }
  0xa1   : > { %7759 = vmatmul.mubr.msk.f32.gmra.mrb[6].mxu0 %vm210_vm1, %v9179_v12  ;;  %v1071_v12 = vld [vmem:[%s9123_s21 + $0x189] sm:$0xff] }
  0xa2   : > { %7761 = vmatprep.mubr.msk.f32.mxu0 %vm210_vm1, %v9182_v13  ;;  %v6645_v13 = vld [vmem:[%s11668_s1 + $0x14] sm:$0xf] }
  0xa5   : > { %7762 = vmatmul.mubr.msk.f32.gmra.mrb[8].mxu0 %vm210_vm1, %v9189_v14  ;;  %v1072_v14 = vld [vmem:[%s9123_s21 + $0x199] sm:$0xff] }
  0xa6   : > { %7764 = vmatprep.mubr.msk.f32.mxu0 %vm210_vm1, %v9192_v15  ;;  %v1073_v15 = vld [vmem:[%s9123_s21 + $0x1a1] sm:$0xff] }
  0xa9   : > { %7765 = vmatmul.mubr.msk.f32.gmra.mrb[10].mxu0 %vm210_vm1, %v9199_v16  ;;  %v1968_v16 = vld [vmem:[%s9123_s21 + $0x2] sm:$0xff] }
  0xaa   : > { %7767 = vmatprep.mubr.msk.f32.mxu0 %vm210_vm1, %v9202_v17  ;;  %v1969_v17 = vld [vmem:[%s9123_s21 + $0xa] sm:$0xff] }
  0xad   : > { %7768 = vmatmul.mubr.msk.f32.gmra.mrb[12].mxu0 %vm210_vm1, %v9209_v18  ;;  %v9731_v18 = vld [vmem:[%s9123_s21 + $0x1a] sm:$0xff] }
  0xae   : > { %7770 = vmatprep.mubr.msk.f32.mxu0 %vm210_vm1, %v9212_v19  ;;  %v9736_v19 = vld [vmem:[%s11668_s1 + $0x20] sm:$0xf] }
  0xb1   : > { %7771 = vmatmul.mubr.msk.f32.gmra.mrb[14].mxu0 %vm210_vm1, %v9219_v20  ;;  %v1971_v20 = vld [vmem:[%s9123_s21 + $0x22] sm:$0xff] }
  0xb2   : > { %7773 = vmatprep.mubr.msk.f32.mxu0 %vm210_vm1, %v9222_v21  ;;  %v9744_v21 = vld [vmem:[%s9123_s21 + $0x32] sm:$0xff] }
  0xb5   : > { %7774 = vmatmul.mubr.msk.f32.gmra.mrb[16].mxu0 %vm210_vm1, %v9229_v22  ;;  %v9752_v22 = vld [vmem:[%s9123_s21 + $0x3a] sm:$0xff] }
  0xb6   : > { %7776 = vmatprep.mubr.msk.f32.mxu0 %vm210_vm1, %v9232_v23  ;;  %v9755_v23 = vld [vmem:[%s9123_s21 + $0x4a] sm:$0xff] }
  0xb9   : > { %7777 = vmatmul.mubr.msk.f32.gmra.mrb[18].mxu0 %vm210_vm1, %v9239_v24  ;;  %v9762_v24 = vld [vmem:[%s9123_s21 + $0x52] sm:$0xff] }
  0xba   : > { %7779 = vmatprep.mubr.msk.f32.mxu0 %vm210_vm1, %v9242_v25  ;;  %v9765_v25 = vld [vmem:[%s9123_s21 + $0x62] sm:$0xff] }
  0xbd   : > { %7780 = vmatmul.mubr.msk.f32.gmra.mrb[20].mxu0 %vm210_vm1, %v9249_v26  ;;  %v9772_v26 = vld [vmem:[%s9123_s21 + $0x6a] sm:$0xff] }
  0xbe   : > { %7782 = vmatprep.mubr.msk.f32.mxu0 %vm210_vm1, %v9252_v27  ;;  %v9775_v27 = vld [vmem:[%s9123_s21 + $0x7a] sm:$0xff] }
  0xc1   : > { %7783 = vmatmul.mubr.msk.f32.gmra.mrb[22].mxu0 %vm210_vm1, %v9259_v28  ;;  %v9782_v28 = vld [vmem:[%s9123_s21 + $0x82] sm:$0xff] }
  0xc2   : > { %7785 = vmatprep.mubr.msk.f32.mxu0 %vm210_vm1, %v9262_v29  ;;  %v9785_v29 = vld [vmem:[%s9123_s21 + $0x92] sm:$0xff] }
  0xc5   : > { %7786 = vmatmul.mubr.msk.f32.gmra.mrb[24].mxu0 %vm210_vm1, %v9269_v30  ;;  %v9792_v30 = vld [vmem:[%s9123_s21 + $0x9a] sm:$0xff] }
  0xc6   : > { %7788 = vmatprep.mubr.msk.f32.mxu0 %vm210_vm1, %v9272_v31  ;;  %v9795_v31 = vld [vmem:[%s9123_s21 + $0xaa] sm:$0xff] }
  0xc9   : > { %7789 = vmatmul.mubr.msk.f32.gmra.mrb[26].mxu0 %vm210_vm1, %v9279_v32  ;;  %v9802_v32 = vld [vmem:[%s9123_s21 + $0xb2] sm:$0xff] }
  0xca   : > { %7791 = vmatprep.mubr.msk.f32.mxu0 %vm210_vm1, %v9282_v33  ;;  %v9805_v33 = vld [vmem:[%s9123_s21 + $0xc2] sm:$0xff] }
  0xcd   : > { %7792 = vmatmul.mubr.msk.f32.gmra.mrb[28].mxu0 %vm210_vm1, %v9289_v34  ;;  %v9812_v34 = vld [vmem:[%s9123_s21 + $0xca] sm:$0xff] }
  0xce   : > { %7794 = vmatprep.mubr.msk.f32.mxu0 %vm210_vm1, %v205_v39  ;;  %v9835_v39 = vld [vmem:[%s9123_s21 + $0x10a] sm:$0xff] }
  0xd1   : > { %7795 = vmatmul.mubr.msk.f32.gmra.mrb[30].mxu0 %vm210_vm1, %v206_v40  ;;  %v9842_v40 = vld [vmem:[%s9123_s21 + $0x112] sm:$0xff] }
  0xd2   : > { %7799 = vmatprep.mubr.msk.f32.mxu0 %vm210_vm1, %v1038_v41  ;;  %v9845_v41 = vld [vmem:[%s9123_s21 + $0x122] sm:$0xff] }
  0xd5   : > { %7800 = vmatmul.mubr.msk.f32.vlgmr.msra.gmra.mrb[0].mxu0 %vm210_vm1, %v1039_v42  ;;  %v9852_v42 = vld [vmem:[%s9123_s21 + $0x12a] sm:$0xff] }
  0xd6   : > { %7848 = vmatpush3.msk.msra.mxu0 %vm307_vm0, %v6543_v38  ;;  %7802 = vmatprep.mubr.msk.f32.mxu0 %vm210_vm1, %v9436_v43  ;;  %v9832_v38 = vld [vmem:[%s9123_s21 + $0xfa] sm:$0xff] }
  0xd7   : > { %7897 = vmatprep.subr.msk.mxu0 %vm307_vm0, %v9441_v44 }
  0xd9   : > { %7803 = vmatmul.mubr.msk.f32.gmra.mrb[2].mxu0 %vm210_vm1, %v1041_v45 }
  0xda   : > { %7805 = vmatprep.mubr.msk.f32.mxu0 %vm210_vm1, %v9449_v46 }
  0xdd   : > { %7806 = vmatmul.mubr.msk.f32.gmra.mrb[4].mxu0 %vm210_vm1, %v9457_v47 }
  0xde   : > { %7808 = vmatprep.mubr.msk.f32.mxu0 %vm210_vm1, %v9460_v48 }
  0xe1   : > { %7809 = vmatmul.mubr.msk.f32.gmra.mrb[6].mxu0 %vm210_vm1, %v9467_v49 }
  0xe2   : > { %7811 = vmatprep.mubr.msk.f32.mxu0 %vm210_vm1, %v9470_v50 }
  0xe5   : > { %7812 = vmatmul.mubr.msk.f32.gmra.mrb[8].mxu0 %vm210_vm1, %v9477_v51 }
  0xe6   : > { %7814 = vmatprep.mubr.msk.f32.mxu0 %vm210_vm1, %v9480_v52 }
  0xe9   : > { %7815 = vmatmul.mubr.msk.f32.gmra.mrb[10].mxu0 %vm210_vm1, %v9487_v53 }
  0xea   : > { %7817 = vmatprep.mubr.msk.f32.mxu0 %vm210_vm1, %v9490_v54 }
  0xed   : > { %7818 = vmatmul.mubr.msk.f32.gmra.mrb[12].mxu0 %vm210_vm1, %v9497_v55 }
  0xee   : > { %7820 = vmatprep.mubr.msk.f32.mxu0 %vm210_vm1, %v9500_v56 }
  0xf1   : > { %7821 = vmatmul.mubr.msk.f32.gmra.mrb[14].mxu0 %vm210_vm1, %v9507_v57 }
  0xf2   : > { %7823 = vmatprep.mubr.msk.f32.mxu0 %vm210_vm1, %v9510_v58 }
  0xf5   : > { %7824 = vmatmul.mubr.msk.f32.gmra.mrb[16].mxu0 %vm210_vm1, %v9517_v59 }
  0xf6   : > { %7826 = vmatprep.mubr.msk.f32.mxu0 %vm210_vm1, %v9520_v60 }
  0xf9   : > { %7827 = vmatmul.mubr.msk.f32.gmra.mrb[18].mxu0 %vm210_vm1, %v9527_v61 }
  0xfa   : > { %7829 = vmatprep.mubr.msk.f32.mxu0 %vm210_vm1, %v9530_v62 }
  0xfd   : > { %7830 = vmatmul.mubr.msk.f32.gmra.mrb[20].mxu0 %vm210_vm1, %v9537_v63 }
  0xfe   : > { %7832 = vmatprep.mubr.msk.f32.mxu0 %vm210_vm1, %v9540_v0 }
 0x101   : > { %7833 = vmatmul.mubr.msk.f32.gmra.mrb[22].mxu0 %vm210_vm1, %v9547_v1 }
 0x102   : > { %7835 = vmatprep.mubr.msk.f32.mxu0 %vm210_vm1, %v9550_v2 }
 0x105   : > { %7836 = vmatmul.mubr.msk.f32.gmra.mrb[24].mxu0 %vm210_vm1, %v9557_v3 }
 0x106   : > { %7838 = vmatprep.mubr.msk.f32.mxu0 %vm210_vm1, %v9560_v4 }
 0x109   : > { %7839 = vmatmul.mubr.msk.f32.gmra.mrb[26].mxu0 %vm210_vm1, %v9567_v5 }
 0x10a   : > { %7841 = vmatprep.mubr.msk.f32.mxu0 %vm210_vm1, %v9570_v6 }
 0x10d   : > { %7842 = vmatmul.mubr.msk.f32.gmra.mrb[28].mxu0 %vm210_vm1, %v9577_v7 }
 0x10e   : > { %7844 = vmatprep.mubr.msk.f32.mxu0 %vm210_vm1, %v9580_v8 }
 0x111   : > { %7845 = vmatmul.mubr.msk.f32.gmra.mrb[30].mxu0 %vm210_vm1, %v9587_v9 }
 0x112   : > { %7849 = vmatprep.mubr.msk.f32.mxu0 %vm210_vm1, %v9436_v43  ;;  %v9855_v43 = vld [vmem:[%s9123_s21 + $0x13a] sm:$0xff] }
 0x115   : > { %7850 = vmatmul.mubr.msk.f32.vlgmr.msra.gmra.mrb[0].mxu0 %vm210_vm1, %v1041_v45  ;;  %v9865_v45 = vld [vmem:[%s9123_s21 + $0x152] sm:$0xff] }
 0x116   : > { %7898 = vmatpush3.msk.msra.mxu0 %vm307_vm0, %v9441_v44  ;;  %7852 = vmatprep.mubr.msk.f32.mxu0 %vm210_vm1, %v9449_v46  ;;  %v9862_v44 = vld [vmem:[%s9123_s21 + $0x142] sm:$0xff] }
 0x117   : > { %7947 = vmatprep.subr.msk.mxu0 %vm307_vm0, %v6611_v10 }
 0x119   : > { %7853 = vmatmul.mubr.msk.f32.gmra.mrb[2].mxu0 %vm210_vm1, %v9457_v47 }
 0x11a   : > { %7855 = vmatprep.mubr.msk.f32.mxu0 %vm210_vm1, %v9460_v48 }
 0x11d   : > { %7856 = vmatmul.mubr.msk.f32.gmra.mrb[4].mxu0 %vm210_vm1, %v9467_v49 }
 0x11e   : > { %7858 = vmatprep.mubr.msk.f32.mxu0 %vm210_vm1, %v9470_v50 }
 0x121   : > { %7859 = vmatmul.mubr.msk.f32.gmra.mrb[6].mxu0 %vm210_vm1, %v9477_v51 }
 0x122   : > { %7861 = vmatprep.mubr.msk.f32.mxu0 %vm210_vm1, %v9480_v52 }
 0x125   : > { %7862 = vmatmul.mubr.msk.f32.gmra.mrb[8].mxu0 %vm210_vm1, %v9487_v53 }
 0x126   : > { %7864 = vmatprep.mubr.msk.f32.mxu0 %vm210_vm1, %v9490_v54 }
 0x129   : > { %7865 = vmatmul.mubr.msk.f32.gmra.mrb[10].mxu0 %vm210_vm1, %v9497_v55 }
 0x12a   : > { %7867 = vmatprep.mubr.msk.f32.mxu0 %vm210_vm1, %v9500_v56 }
 0x12d   : > { %7868 = vmatmul.mubr.msk.f32.gmra.mrb[12].mxu0 %vm210_vm1, %v9507_v57 }
 0x12e   : > { %7870 = vmatprep.mubr.msk.f32.mxu0 %vm210_vm1, %v9510_v58 }
 0x131   : > { %7871 = vmatmul.mubr.msk.f32.gmra.mrb[14].mxu0 %vm210_vm1, %v9517_v59 }
 0x132   : > { %7873 = vmatprep.mubr.msk.f32.mxu0 %vm210_vm1, %v9520_v60 }
 0x135   : > { %7874 = vmatmul.mubr.msk.f32.gmra.mrb[16].mxu0 %vm210_vm1, %v9527_v61 }
 0x136   : > { %7876 = vmatprep.mubr.msk.f32.mxu0 %vm210_vm1, %v9530_v62 }
 0x139   : > { %7877 = vmatmul.mubr.msk.f32.gmra.mrb[18].mxu0 %vm210_vm1, %v9537_v63 }
 0x13a   : > { %7879 = vmatprep.mubr.msk.f32.mxu0 %vm210_vm1, %v9540_v0 }
 0x13d   : > { %7880 = vmatmul.mubr.msk.f32.gmra.mrb[20].mxu0 %vm210_vm1, %v9547_v1 }
 0x13e   : > { %7882 = vmatprep.mubr.msk.f32.mxu0 %vm210_vm1, %v9550_v2 }
 0x141   : > { %7883 = vmatmul.mubr.msk.f32.gmra.mrb[22].mxu0 %vm210_vm1, %v9557_v3 }
 0x142   : > { %7885 = vmatprep.mubr.msk.f32.mxu0 %vm210_vm1, %v9560_v4 }
 0x145   : > { %7886 = vmatmul.mubr.msk.f32.gmra.mrb[24].mxu0 %vm210_vm1, %v9567_v5 }
 0x146   : > { %7888 = vmatprep.mubr.msk.f32.mxu0 %vm210_vm1, %v9570_v6 }
 0x149   : > { %7889 = vmatmul.mubr.msk.f32.gmra.mrb[26].mxu0 %vm210_vm1, %v9577_v7 }
 0x14a   : > { %7891 = vmatprep.mubr.msk.f32.mxu0 %vm210_vm1, %v9580_v8 }
 0x14d   : > { %7892 = vmatmul.mubr.msk.f32.gmra.mrb[28].mxu0 %vm210_vm1, %v9587_v9 }
 0x14e   : > { %7894 = vmatprep.mubr.msk.f32.mxu0 %vm210_vm1, %v1070_v11 }
 0x151   : > { %7895 = vmatmul.mubr.msk.f32.gmra.mrb[30].mxu0 %vm210_vm1, %v1071_v12 }
 0x152   : > { %7899 = vmatprep.mubr.msk.f32.mxu0 %vm210_vm1, %v9449_v46  ;;  %v9872_v46 = vld [vmem:[%s9123_s21 + $0x15a] sm:$0xff] }
 0x155   : > { %7900 = vmatmul.mubr.msk.f32.vlgmr.msra.gmra.mrb[0].mxu0 %vm210_vm1, %v9457_v47  ;;  %v9875_v47 = vld [vmem:[%s9123_s21 + $0x16a] sm:$0xff] }
 0x156   : > { %7948 = vmatpush3.msk.msra.mxu0 %vm307_vm0, %v6611_v10  ;;  %7902 = vmatprep.mubr.msk.f32.mxu0 %vm210_vm1, %v9460_v48  ;;  %v9882_v48 = vld [vmem:[%s9123_s21 + $0x172] sm:$0xff] }
 0x157   : > { %7997 = vmatprep.subr.msk.mxu0 %vm307_vm0, %v6645_v13 }
 0x159   : > { %7903 = vmatmul.mubr.msk.f32.gmra.mrb[2].mxu0 %vm210_vm1, %v9467_v49  ;;  %v2000_v49 = vld [vmem:[%s9123_s21 + $0x182] sm:$0xff] }
 0x15a   : > { %7905 = vmatprep.mubr.msk.f32.mxu0 %vm210_vm1, %v9470_v50  ;;  %v2001_v50 = vld [vmem:[%s9123_s21 + $0x18a] sm:$0xff] }
 0x15d   : > { %7906 = vmatmul.mubr.msk.f32.gmra.mrb[4].mxu0 %vm210_vm1, %v9477_v51  ;;  %v2002_v51 = vld [vmem:[%s9123_s21 + $0x19a] sm:$0xff] }
 0x15e   : > { %7908 = vmatprep.mubr.msk.f32.mxu0 %vm210_vm1, %v9480_v52  ;;  %v2003_v52 = vld [vmem:[%s9123_s21 + $0x1a2] sm:$0xff] }
 0x161   : > { %7909 = vmatmul.mubr.msk.f32.gmra.mrb[6].mxu0 %vm210_vm1, %v9487_v53  ;;  %v6713_v53 = vld [vmem:[%s11669_s2 + $0xc] sm:$0xf] }
 0x162   : > { %7911 = vmatprep.mubr.msk.f32.mxu0 %vm210_vm1, %v9490_v54  ;;  %8097 = vmatprep.subr.msk.mxu1 %vm307_vm0, %v6713_v53  ;;  %v10021_v54 = vld [vmem:[%s11669_s2] sm:$0xf] }
 0x163   : > { %8098 = vmatpush3.msk.msra.mxu1 %vm307_vm0, %v6713_v53 }
 0x164   : > { %8147 = vmatprep.subr.msk.mxu1 %vm307_vm0, %v10021_v54 }
 0x165   : > { %7912 = vmatmul.mubr.msk.f32.gmra.mrb[8].mxu0 %vm210_vm1, %v9497_v55 }
 0x166   : > { %7914 = vmatprep.mubr.msk.f32.mxu0 %vm210_vm1, %v9500_v56 }
 0x169   : > { %7915 = vmatmul.mubr.msk.f32.gmra.mrb[10].mxu0 %vm210_vm1, %v9507_v57 }
 0x16a   : > { %7917 = vmatprep.mubr.msk.f32.mxu0 %vm210_vm1, %v9510_v58 }
 0x16d   : > { %7918 = vmatmul.mubr.msk.f32.gmra.mrb[12].mxu0 %vm210_vm1, %v9517_v59 }
 0x16e   : > { %7920 = vmatprep.mubr.msk.f32.mxu0 %vm210_vm1, %v9520_v60 }
 0x171   : > { %7921 = vmatmul.mubr.msk.f32.gmra.mrb[14].mxu0 %vm210_vm1, %v9527_v61 }
 0x172   : > { %7923 = vmatprep.mubr.msk.f32.mxu0 %vm210_vm1, %v9530_v62 }
 0x175   : > { %7924 = vmatmul.mubr.msk.f32.gmra.mrb[16].mxu0 %vm210_vm1, %v9537_v63 }
 0x176   : > { %7926 = vmatprep.mubr.msk.f32.mxu0 %vm210_vm1, %v9540_v0 }
 0x179   : > { %7927 = vmatmul.mubr.msk.f32.gmra.mrb[18].mxu0 %vm210_vm1, %v9547_v1 }
 0x17a   : > { %7929 = vmatprep.mubr.msk.f32.mxu0 %vm210_vm1, %v9550_v2 }
 0x17d   : > { %7930 = vmatmul.mubr.msk.f32.gmra.mrb[20].mxu0 %vm210_vm1, %v9557_v3 }
 0x17e   : > { %7932 = vmatprep.mubr.msk.f32.mxu0 %vm210_vm1, %v9560_v4 }
 0x181   : > { %7933 = vmatmul.mubr.msk.f32.gmra.mrb[22].mxu0 %vm210_vm1, %v9567_v5 }
 0x182   : > { %7935 = vmatprep.mubr.msk.f32.mxu0 %vm210_vm1, %v9570_v6 }
 0x185   : > { %7936 = vmatmul.mubr.msk.f32.gmra.mrb[24].mxu0 %vm210_vm1, %v9577_v7 }
 0x186   : > { %7938 = vmatprep.mubr.msk.f32.mxu0 %vm210_vm1, %v9580_v8 }
 0x189   : > { %7939 = vmatmul.mubr.msk.f32.gmra.mrb[26].mxu0 %vm210_vm1, %v9587_v9 }
 0x18a   : > { %7941 = vmatprep.mubr.msk.f32.mxu0 %vm210_vm1, %v1070_v11 }
 0x18d   : > { %7942 = vmatmul.mubr.msk.f32.gmra.mrb[28].mxu0 %vm210_vm1, %v1071_v12 }
 0x18e   : > { %7944 = vmatprep.mubr.msk.f32.mxu0 %vm210_vm1, %v1072_v14 }
 0x191   : > { %7945 = vmatmul.mubr.msk.f32.gmra.mrb[30].mxu0 %vm210_vm1, %v1073_v15 }
 0x192   : > { %7949 = vmatprep.mubr.msk.f32.mxu0 %vm210_vm1, %v1968_v16 }
 0x195   : > { %7950 = vmatmul.mubr.msk.f32.vlgmr.msra.gmra.mrb[0].mxu0 %vm210_vm1, %v1969_v17 }
 0x196   : > { %7998 = vmatpush3.msk.msra.mxu0 %vm307_vm0, %v6645_v13  ;;  %7952 = vmatprep.mubr.msk.f32.mxu0 %vm210_vm1, %v9731_v18 }
 0x197   : > { %8047 = vmatprep.subr.msk.mxu0 %vm307_vm0, %v9736_v19 }
 0x199   : > { %7953 = vmatmul.mubr.msk.f32.gmra.mrb[2].mxu0 %vm210_vm1, %v1971_v20 }
 0x19a   : > { %7955 = vmatprep.mubr.msk.f32.mxu0 %vm210_vm1, %v9744_v21 }
 0x19d   : > { %7956 = vmatmul.mubr.msk.f32.gmra.mrb[4].mxu0 %vm210_vm1, %v9752_v22 }
 0x19e   : > { %7958 = vmatprep.mubr.msk.f32.mxu0 %vm210_vm1, %v9755_v23 }
 0x1a1   : > { %7959 = vmatmul.mubr.msk.f32.gmra.mrb[6].mxu0 %vm210_vm1, %v9762_v24 }
 0x1a2   : > { %7961 = vmatprep.mubr.msk.f32.mxu0 %vm210_vm1, %v9765_v25 }
 0x1a5   : > { %7962 = vmatmul.mubr.msk.f32.gmra.mrb[8].mxu0 %vm210_vm1, %v9772_v26 }
 0x1a6   : > { %7964 = vmatprep.mubr.msk.f32.mxu0 %vm210_vm1, %v9775_v27 }
 0x1a9   : > { %7965 = vmatmul.mubr.msk.f32.gmra.mrb[10].mxu0 %vm210_vm1, %v9782_v28 }
 0x1aa   : > { %7967 = vmatprep.mubr.msk.f32.mxu0 %vm210_vm1, %v9785_v29 }
 0x1ad   : > { %7968 = vmatmul.mubr.msk.f32.gmra.mrb[12].mxu0 %vm210_vm1, %v9792_v30 }
 0x1ae   : > { %7970 = vmatprep.mubr.msk.f32.mxu0 %vm210_vm1, %v9795_v31 }
 0x1b1   : > { %7971 = vmatmul.mubr.msk.f32.gmra.mrb[14].mxu0 %vm210_vm1, %v9802_v32 }
 0x1b2   : > { %7973 = vmatprep.mubr.msk.f32.mxu0 %vm210_vm1, %v9805_v33 }
 0x1b5   : > { %7974 = vmatmul.mubr.msk.f32.gmra.mrb[16].mxu0 %vm210_vm1, %v9812_v34 }
 0x1b6   : > { %7976 = vmatprep.mubr.msk.f32.mxu0 %vm210_vm1, %v9815_v35 }
 0x1b9   : > { %7977 = vmatmul.mubr.msk.f32.gmra.mrb[18].mxu0 %vm210_vm1, %v9822_v36 }
 0x1ba   : > { %7979 = vmatprep.mubr.msk.f32.mxu0 %vm210_vm1, %v9825_v37 }
 0x1bd   : > { %7980 = vmatmul.mubr.msk.f32.gmra.mrb[20].mxu0 %vm210_vm1, %v9832_v38 }
 0x1be   : > { %7982 = vmatprep.mubr.msk.f32.mxu0 %vm210_vm1, %v9835_v39 }
 0x1c1   : > { %7983 = vmatmul.mubr.msk.f32.gmra.mrb[22].mxu0 %vm210_vm1, %v9842_v40 }
 0x1c2   : > { %7985 = vmatprep.mubr.msk.f32.mxu0 %vm210_vm1, %v9845_v41 }
 0x1c5   : > { %7986 = vmatmul.mubr.msk.f32.gmra.mrb[24].mxu0 %vm210_vm1, %v9852_v42 }
 0x1c6   : > { %7988 = vmatprep.mubr.msk.f32.mxu0 %vm210_vm1, %v9855_v43 }
 0x1c9   : > { %7989 = vmatmul.mubr.msk.f32.gmra.mrb[26].mxu0 %vm210_vm1, %v9862_v44 }
 0x1ca   : > { %7991 = vmatprep.mubr.msk.f32.mxu0 %vm210_vm1, %v9865_v45 }
 0x1cd   : > { %7992 = vmatmul.mubr.msk.f32.gmra.mrb[28].mxu0 %vm210_vm1, %v9872_v46 }
 0x1ce   : > { %7994 = vmatprep.mubr.msk.f32.mxu0 %vm210_vm1, %v9875_v47 }
 0x1d1   : > { %7995 = vmatmul.mubr.msk.f32.gmra.mrb[30].mxu0 %vm210_vm1, %v9882_v48 }
 0x1d2   : > { %7999 = vmatprep.mubr.msk.f32.mxu0 %vm210_vm1, %v9731_v18 }
 0x1d5   : > { %8000 = vmatmul.mubr.msk.f32.vlgmr.msra.gmra.mrb[0].mxu0 %vm210_vm1, %v1971_v20 }
 0x1d6   : > { %8048 = vmatpush3.msk.msra.mxu0 %vm307_vm0, %v9736_v19  ;;  %8002 = vmatprep.mubr.msk.f32.mxu0 %vm210_vm1, %v9744_v21 }
 0x1d9   : > { %8003 = vmatmul.mubr.msk.f32.gmra.mrb[2].mxu0 %vm210_vm1, %v9752_v22 }
 0x1da   : > { %8005 = vmatprep.mubr.msk.f32.mxu0 %vm210_vm1, %v9755_v23 }
 0x1dd   : > { %8006 = vmatmul.mubr.msk.f32.gmra.mrb[4].mxu0 %vm210_vm1, %v9762_v24 }
 0x1de   : > { %8008 = vmatprep.mubr.msk.f32.mxu0 %vm210_vm1, %v9765_v25 }
 0x1e1   : > { %8009 = vmatmul.mubr.msk.f32.gmra.mrb[6].mxu0 %vm210_vm1, %v9772_v26 }
 0x1e2   : > { %8011 = vmatprep.mubr.msk.f32.mxu0 %vm210_vm1, %v9775_v27 }
 0x1e5   : > { %8012 = vmatmul.mubr.msk.f32.gmra.mrb[8].mxu0 %vm210_vm1, %v9782_v28 }
 0x1e6   : > { %8014 = vmatprep.mubr.msk.f32.mxu0 %vm210_vm1, %v9785_v29 }
 0x1e9   : > { %8015 = vmatmul.mubr.msk.f32.gmra.mrb[10].mxu0 %vm210_vm1, %v9792_v30 }
 0x1ea   : > { %8017 = vmatprep.mubr.msk.f32.mxu0 %vm210_vm1, %v9795_v31 }
 0x1ed   : > { %8018 = vmatmul.mubr.msk.f32.gmra.mrb[12].mxu0 %vm210_vm1, %v9802_v32 }
 0x1ee   : > { %8020 = vmatprep.mubr.msk.f32.mxu0 %vm210_vm1, %v9805_v33 }
 0x1f1   : > { %8021 = vmatmul.mubr.msk.f32.gmra.mrb[14].mxu0 %vm210_vm1, %v9812_v34 }
 0x1f2   : > { %8023 = vmatprep.mubr.msk.f32.mxu0 %vm210_vm1, %v9815_v35 }
 0x1f5   : > { %8024 = vmatmul.mubr.msk.f32.gmra.mrb[16].mxu0 %vm210_vm1, %v9822_v36 }
 0x1f6   : > { %8026 = vmatprep.mubr.msk.f32.mxu0 %vm210_vm1, %v9825_v37 }
 0x1f9   : > { %8027 = vmatmul.mubr.msk.f32.gmra.mrb[18].mxu0 %vm210_vm1, %v9832_v38 }
 0x1fa   : > { %8029 = vmatprep.mubr.msk.f32.mxu0 %vm210_vm1, %v9835_v39 }
 0x1fd   : > { %8030 = vmatmul.mubr.msk.f32.gmra.mrb[20].mxu0 %vm210_vm1, %v9842_v40 }
 0x1fe   : > { %8032 = vmatprep.mubr.msk.f32.mxu0 %vm210_vm1, %v9845_v41 }
 0x201   : > { %8033 = vmatmul.mubr.msk.f32.gmra.mrb[22].mxu0 %vm210_vm1, %v9852_v42 }
 0x202   : > { %8035 = vmatprep.mubr.msk.f32.mxu0 %vm210_vm1, %v9855_v43 }
 0x205   : > { %8036 = vmatmul.mubr.msk.f32.gmra.mrb[24].mxu0 %vm210_vm1, %v9862_v44 }
 0x206   : > { %8038 = vmatprep.mubr.msk.f32.mxu0 %vm210_vm1, %v9865_v45 }
 0x209   : > { %8039 = vmatmul.mubr.msk.f32.gmra.mrb[26].mxu0 %vm210_vm1, %v9872_v46 }
 0x20a   : > { %8041 = vmatprep.mubr.msk.f32.mxu0 %vm210_vm1, %v9875_v47 }
 0x20d   : > { %8042 = vmatmul.mubr.msk.f32.gmra.mrb[28].mxu0 %vm210_vm1, %v9882_v48 }
 0x20e   : > { %8044 = vmatprep.mubr.msk.f32.mxu0 %vm210_vm1, %v2000_v49 }
 0x211   : > { %8045 = vmatmul.mubr.msk.f32.gmra.mrb[30].mxu0 %vm210_vm1, %v2001_v50 }
 0x212   : > { %8049 = vmatprep.mubr.msk.f32.mxu0 %vm210_vm1, %v9744_v21 }
 0x215   : > { %8050 = vmatmul.mubr.msk.f32.vlgmr.msra.gmra.mrb[0].mxu0 %vm210_vm1, %v9752_v22 }
 0x216   : > { %8052 = vmatprep.mubr.msk.f32.mxu0 %vm210_vm1, %v9755_v23 }
 0x219   : > { %8053 = vmatmul.mubr.msk.f32.gmra.mrb[2].mxu0 %vm210_vm1, %v9762_v24 }
 0x21a   : > { %8055 = vmatprep.mubr.msk.f32.mxu0 %vm210_vm1, %v9765_v25 }
 0x21d   : > { %8056 = vmatmul.mubr.msk.f32.gmra.mrb[4].mxu0 %vm210_vm1, %v9772_v26 }
 0x21e   : > { %8058 = vmatprep.mubr.msk.f32.mxu0 %vm210_vm1, %v9775_v27 }
 0x221   : > { %8059 = vmatmul.mubr.msk.f32.gmra.mrb[6].mxu0 %vm210_vm1, %v9782_v28 }
 0x222   : > { %8061 = vmatprep.mubr.msk.f32.mxu0 %vm210_vm1, %v9785_v29 }
 0x225   : > { %8062 = vmatmul.mubr.msk.f32.gmra.mrb[8].mxu0 %vm210_vm1, %v9792_v30 }
 0x226   : > { %8064 = vmatprep.mubr.msk.f32.mxu0 %vm210_vm1, %v9795_v31 }
 0x229   : > { %8065 = vmatmul.mubr.msk.f32.gmra.mrb[10].mxu0 %vm210_vm1, %v9802_v32 }
 0x22a   : > { %8067 = vmatprep.mubr.msk.f32.mxu0 %vm210_vm1, %v9805_v33 }
 0x22d   : > { %8068 = vmatmul.mubr.msk.f32.gmra.mrb[12].mxu0 %vm210_vm1, %v9812_v34 }
 0x22e   : > { %8070 = vmatprep.mubr.msk.f32.mxu0 %vm210_vm1, %v9815_v35 }
 0x231   : > { %8071 = vmatmul.mubr.msk.f32.gmra.mrb[14].mxu0 %vm210_vm1, %v9822_v36 }
 0x232   : > { %8073 = vmatprep.mubr.msk.f32.mxu0 %vm210_vm1, %v9825_v37 }
 0x235   : > { %8074 = vmatmul.mubr.msk.f32.gmra.mrb[16].mxu0 %vm210_vm1, %v9832_v38 }
 0x236   : > { %8076 = vmatprep.mubr.msk.f32.mxu0 %vm210_vm1, %v9835_v39 }
 0x239   : > { %8077 = vmatmul.mubr.msk.f32.gmra.mrb[18].mxu0 %vm210_vm1, %v9842_v40 }
 0x23a   : > { %8079 = vmatprep.mubr.msk.f32.mxu0 %vm210_vm1, %v9845_v41 }
 0x23d   : > { %8080 = vmatmul.mubr.msk.f32.gmra.mrb[20].mxu0 %vm210_vm1, %v9852_v42 }
 0x23e   : > { %8082 = vmatprep.mubr.msk.f32.mxu0 %vm210_vm1, %v9855_v43 }
 0x241   : > { %8083 = vmatmul.mubr.msk.f32.gmra.mrb[22].mxu0 %vm210_vm1, %v9862_v44 }
 0x242   : > { %8085 = vmatprep.mubr.msk.f32.mxu0 %vm210_vm1, %v9865_v45 }
 0x245   : > { %8086 = vmatmul.mubr.msk.f32.gmra.mrb[24].mxu0 %vm210_vm1, %v9872_v46 }
 0x246   : > { %8088 = vmatprep.mubr.msk.f32.mxu0 %vm210_vm1, %v9875_v47 }
 0x249   : > { %8089 = vmatmul.mubr.msk.f32.gmra.mrb[26].mxu0 %vm210_vm1, %v9882_v48 }
 0x24a   : > { %8091 = vmatprep.mubr.msk.f32.mxu0 %vm210_vm1, %v2000_v49 }
 0x24d   : > { %8092 = vmatmul.mubr.msk.f32.gmra.mrb[28].mxu0 %vm210_vm1, %v2001_v50 }
 0x24e   : > { %8094 = vmatprep.mubr.msk.f32.mxu0 %vm210_vm1, %v2002_v51 }
 0x251   : > { %8095 = vmatmul.mubr.msk.f32.gmra.mrb[30].mxu0 %vm210_vm1, %v2003_v52 }
 0x2e8   : > { %v10025_v55 = vpop.f32.mrb[0].mxu0 }
 0x2e9   : > { %v2899_v56 = vsel %vm210_vm1, %v10025_v55, 0.0  ;;  %v2968_v57 = vmul.f32 %v10025_v55, %v10025_v55  ;;  %v10031_v58 = vpop.f32.mrb[1].mxu0 }
 0x2ea   : > { %v2898_v59 = vsel %vm210_vm1, %v10031_v58, 0.0  ;;  %v2967_v60 = vmul.f32 %v10031_v58, %v10031_v58 }
 0x2eb   : > { %v3000_v61 = vsel %vm210_vm1, %v2968_v57, 0.0  ;;  %v2900_v62 = vadd.f32 %v2899_v56, %v2898_v59 }
 0x2ec   : > { %v2999_v63 = vsel %vm210_vm1, %v2967_v60, 0.0  ;;  %v10039_v0 = vpop.f32.mrb[2].mxu0 }
 0x2ed   : > { %v3001_v1 = vadd.f32 %v3000_v61, %v2999_v63  ;;  %v10041_v2 = vpop.f32.mrb[3].mxu0  ;;  %v2970_v3 = vmul.f32 %v10039_v0, %v10039_v0  ;;  %v2903_v7 = vsel %vm210_vm1, %v10039_v0, 0.0 }
 0x2ee   : > { %v2901_v4 = vsel %vm210_vm1, %v10041_v2, 0.0  ;;  %v2969_v5 = vmul.f32 %v10041_v2, %v10041_v2 }
 0x2ef   : > { %v2902_v6 = vadd.f32 %v2901_v4, %v2900_v62  ;;  %v3004_v13 = vsel %vm210_vm1, %v2970_v3, 0.0 }
 0x2f0   : > { %v3002_v8 = vsel %vm210_vm1, %v2969_v5, 0.0  ;;  %v10052_v9 = vpop.f32.mrb[4].mxu0 }
 0x2f1   : > { %v3003_v10 = vadd.f32 %v3002_v8, %v3001_v1  ;;  %v10054_v11 = vpop.f32.mrb[5].mxu0  ;;  %v2904_v12 = vadd.f32 %v2903_v7, %v2902_v6  ;;  %v2972_v14 = vmul.f32 %v10052_v9, %v10052_v9  ;;  %v2907_v19 = vsel %vm210_vm1, %v10052_v9, 0.0 }
 0x2f2   : > { %v2905_v15 = vsel %vm210_vm1, %v10054_v11, 0.0  ;;  %v2971_v16 = vmul.f32 %v10054_v11, %v10054_v11 }
 0x2f3   : > { %v2906_v17 = vadd.f32 %v2905_v15, %v2904_v12  ;;  %v3005_v18 = vadd.f32 %v3004_v13, %v3003_v10  ;;  %v3008_v25 = vsel %vm210_vm1, %v2972_v14, 0.0 }
 0x2f4   : > { %v3006_v20 = vsel %vm210_vm1, %v2971_v16, 0.0  ;;  %v10066_v21 = vpop.f32.mrb[6].mxu0 }
 0x2f5   : > { %v3007_v22 = vadd.f32 %v3006_v20, %v3005_v18  ;;  %v10068_v23 = vpop.f32.mrb[7].mxu0  ;;  %v2908_v24 = vadd.f32 %v2907_v19, %v2906_v17  ;;  %v2974_v26 = vmul.f32 %v10066_v21, %v10066_v21  ;;  %v2911_v31 = vsel %vm210_vm1, %v10066_v21, 0.0 }
 0x2f6   : > { %v2909_v27 = vsel %vm210_vm1, %v10068_v23, 0.0  ;;  %v2973_v28 = vmul.f32 %v10068_v23, %v10068_v23 }
 0x2f7   : > { %v2910_v29 = vadd.f32 %v2909_v27, %v2908_v24  ;;  %v3009_v30 = vadd.f32 %v3008_v25, %v3007_v22  ;;  %v3012_v37 = vsel %vm210_vm1, %v2974_v26, 0.0 }
 0x2f8   : > { %v3010_v32 = vsel %vm210_vm1, %v2973_v28, 0.0  ;;  %v10080_v33 = vpop.f32.mrb[8].mxu0 }
 0x2f9   : > { %v3011_v34 = vadd.f32 %v3010_v32, %v3009_v30  ;;  %v10082_v35 = vpop.f32.mrb[9].mxu0  ;;  %v2912_v36 = vadd.f32 %v2911_v31, %v2910_v29  ;;  %v2976_v38 = vmul.f32 %v10080_v33, %v10080_v33  ;;  %v2915_v43 = vsel %vm210_vm1, %v10080_v33, 0.0 }
 0x2fa   : > { %v2913_v39 = vsel %vm210_vm1, %v10082_v35, 0.0  ;;  %v2975_v40 = vmul.f32 %v10082_v35, %v10082_v35 }
 0x2fb   : > { %v2914_v41 = vadd.f32 %v2913_v39, %v2912_v36  ;;  %v3013_v42 = vadd.f32 %v3012_v37, %v3011_v34  ;;  %v3016_v49 = vsel %vm210_vm1, %v2976_v38, 0.0 }
 0x2fc   : > { %v3014_v44 = vsel %vm210_vm1, %v2975_v40, 0.0  ;;  %v10094_v45 = vpop.f32.mrb[10].mxu0 }
 0x2fd   : > { %v3015_v46 = vadd.f32 %v3014_v44, %v3013_v42  ;;  %v10096_v47 = vpop.f32.mrb[11].mxu0  ;;  %v2916_v48 = vadd.f32 %v2915_v43, %v2914_v41  ;;  %v2978_v50 = vmul.f32 %v10094_v45, %v10094_v45  ;;  %v2919_v57 = vsel %vm210_vm1, %v10094_v45, 0.0 }
 0x2fe   : > { %v2917_v51 = vsel %vm210_vm1, %v10096_v47, 0.0  ;;  %v2977_v52 = vmul.f32 %v10096_v47, %v10096_v47 }
 0x2ff   : > { %v2918_v53 = vadd.f32 %v2917_v51, %v2916_v48  ;;  %v3017_v56 = vadd.f32 %v3016_v49, %v3015_v46  ;;  %v3020_v1 = vsel %vm210_vm1, %v2978_v50, 0.0 }
 0x300   : > { %v3018_v59 = vsel %vm210_vm1, %v2977_v52, 0.0  ;;  %v10108_v60 = vpop.f32.mrb[12].mxu0 }
 0x301   : > { %v3019_v61 = vadd.f32 %v3018_v59, %v3017_v56  ;;  %v10110_v62 = vpop.f32.mrb[13].mxu0  ;;  %v2920_v63 = vadd.f32 %v2919_v57, %v2918_v53  ;;  %v2980_v3 = vmul.f32 %v10108_v60, %v10108_v60  ;;  %v2923_v8 = vsel %vm210_vm1, %v10108_v60, 0.0 }
 0x302   : > { %v2921_v4 = vsel %vm210_vm1, %v10110_v62, 0.0  ;;  %v2979_v5 = vmul.f32 %v10110_v62, %v10110_v62 }
 0x303   : > { %v2922_v6 = vadd.f32 %v2921_v4, %v2920_v63  ;;  %v3021_v7 = vadd.f32 %v3020_v1, %v3019_v61  ;;  %v3024_v16 = vsel %vm210_vm1, %v2980_v3, 0.0 }
 0x304   : > { %v3022_v10 = vsel %vm210_vm1, %v2979_v5, 0.0  ;;  %v10122_v12 = vpop.f32.mrb[14].mxu0 }
 0x305   : > { %v3023_v13 = vadd.f32 %v3022_v10, %v3021_v7  ;;  %v10124_v14 = vpop.f32.mrb[15].mxu0  ;;  %v2924_v15 = vadd.f32 %v2923_v8, %v2922_v6  ;;  %v2982_v17 = vmul.f32 %v10122_v12, %v10122_v12  ;;  %v2927_v24 = vsel %vm210_vm1, %v10122_v12, 0.0 }
 0x306   : > { %v2925_v18 = vsel %vm210_vm1, %v10124_v14, 0.0  ;;  %v2981_v19 = vmul.f32 %v10124_v14, %v10124_v14 }
 0x307   : > { %v2926_v20 = vadd.f32 %v2925_v18, %v2924_v15  ;;  %v3025_v22 = vadd.f32 %v3024_v16, %v3023_v13  ;;  %v3028_v30 = vsel %vm210_vm1, %v2982_v17, 0.0 }
 0x308   : > { %v3026_v25 = vsel %vm210_vm1, %v2981_v19, 0.0  ;;  %v10136_v26 = vpop.f32.mrb[16].mxu0 }
 0x309   : > { %v3027_v27 = vadd.f32 %v3026_v25, %v3025_v22  ;;  %v10138_v28 = vpop.f32.mrb[17].mxu0  ;;  %v2928_v29 = vadd.f32 %v2927_v24, %v2926_v20  ;;  %v2984_v31 = vmul.f32 %v10136_v26, %v10136_v26  ;;  %v2931_v38 = vsel %vm210_vm1, %v10136_v26, 0.0 }
 0x30a   : > { %v2929_v32 = vsel %vm210_vm1, %v10138_v28, 0.0  ;;  %v2983_v34 = vmul.f32 %v10138_v28, %v10138_v28 }
 0x30b   : > { %v2930_v36 = vadd.f32 %v2929_v32, %v2928_v29  ;;  %v3029_v37 = vadd.f32 %v3028_v30, %v3027_v27  ;;  %v3032_v44 = vsel %vm210_vm1, %v2984_v31, 0.0 }
 0x30c   : > { %v3030_v39 = vsel %vm210_vm1, %v2983_v34, 0.0  ;;  %v10150_v40 = vpop.f32.mrb[18].mxu0 }
 0x30d   : > { %v3031_v41 = vadd.f32 %v3030_v39, %v3029_v37  ;;  %v10152_v42 = vpop.f32.mrb[19].mxu0  ;;  %v2932_v43 = vadd.f32 %v2931_v38, %v2930_v36  ;;  %v2986_v46 = vmul.f32 %v10150_v40, %v10150_v40  ;;  %v2935_v52 = vsel %vm210_vm1, %v10150_v40, 0.0 }
 0x30e   : > { %v2933_v48 = vsel %vm210_vm1, %v10152_v42, 0.0  ;;  %v2985_v49 = vmul.f32 %v10152_v42, %v10152_v42 }
 0x30f   : > { %v2934_v50 = vadd.f32 %v2933_v48, %v2932_v43  ;;  %v3033_v51 = vadd.f32 %v3032_v44, %v3031_v41  ;;  %v3036_v63 = vsel %vm210_vm1, %v2986_v46, 0.0 }
 0x310   : > { %v3034_v53 = vsel %vm210_vm1, %v2985_v49, 0.0  ;;  %v10164_v56 = vpop.f32.mrb[20].mxu0 }
 0x311   : > { %v3035_v57 = vadd.f32 %v3034_v53, %v3033_v51  ;;  %v10166_v59 = vpop.f32.mrb[21].mxu0  ;;  %v2936_v61 = vadd.f32 %v2935_v52, %v2934_v50  ;;  %v2988_v1 = vmul.f32 %v10164_v56, %v10164_v56  ;;  %v2939_v7 = vsel %vm210_vm1, %v10164_v56, 0.0 }
 0x312   : > { %v2937_v3 = vsel %vm210_vm1, %v10166_v59, 0.0  ;;  %v2987_v4 = vmul.f32 %v10166_v59, %v10166_v59 }
 0x313   : > { %v2938_v5 = vadd.f32 %v2937_v3, %v2936_v61  ;;  %v3037_v6 = vadd.f32 %v3036_v63, %v3035_v57  ;;  %v3040_v17 = vsel %vm210_vm1, %v2988_v1, 0.0 }
 0x314   : > { %v3038_v8 = vsel %vm210_vm1, %v2987_v4, 0.0  ;;  %v10178_v10 = vpop.f32.mrb[22].mxu0 }
 0x315   : > { %v3039_v13 = vadd.f32 %v3038_v8, %v3037_v6  ;;  %v10180_v15 = vpop.f32.mrb[23].mxu0  ;;  %v2940_v16 = vadd.f32 %v2939_v7, %v2938_v5  ;;  %v2990_v18 = vmul.f32 %v10178_v10, %v10178_v10  ;;  %v2943_v25 = vsel %vm210_vm1, %v10178_v10, 0.0 }
 0x316   : > { %v2941_v19 = vsel %vm210_vm1, %v10180_v15, 0.0  ;;  %v2989_v20 = vmul.f32 %v10180_v15, %v10180_v15 }
 0x317   : > { %v2942_v22 = vadd.f32 %v2941_v19, %v2940_v16  ;;  %v3041_v24 = vadd.f32 %v3040_v17, %v3039_v13  ;;  %v3044_v34 = vsel %vm210_vm1, %v2990_v18, 0.0 }
 0x318   : > { %v3042_v27 = vsel %vm210_vm1, %v2989_v20, 0.0  ;;  %v10192_v29 = vpop.f32.mrb[24].mxu0 }
 0x319   : > { %v3043_v30 = vadd.f32 %v3042_v27, %v3041_v24  ;;  %v10194_v31 = vpop.f32.mrb[25].mxu0  ;;  %v2944_v32 = vadd.f32 %v2943_v25, %v2942_v22  ;;  %v2992_v36 = vmul.f32 %v10192_v29, %v10192_v29  ;;  %v2947_v43 = vsel %vm210_vm1, %v10192_v29, 0.0 }
 0x31a   : > { %v2945_v37 = vsel %vm210_vm1, %v10194_v31, 0.0  ;;  %v2991_v38 = vmul.f32 %v10194_v31, %v10194_v31 }
 0x31b   : > { %v2946_v39 = vadd.f32 %v2945_v37, %v2944_v32  ;;  %v3045_v41 = vadd.f32 %v3044_v34, %v3043_v30  ;;  %v3048_v51 = vsel %vm210_vm1, %v2992_v36, 0.0 }
 0x31c   : > { %v3046_v44 = vsel %vm210_vm1, %v2991_v38, 0.0  ;;  %v10206_v46 = vpop.f32.mrb[26].mxu0 }
 0x31d   : > { %v3047_v48 = vadd.f32 %v3046_v44, %v3045_v41  ;;  %v10208_v49 = vpop.f32.mrb[27].mxu0  ;;  %v2948_v50 = vadd.f32 %v2947_v43, %v2946_v39  ;;  %v2994_v52 = vmul.f32 %v10206_v46, %v10206_v46  ;;  %v2951_v1 = vsel %vm210_vm1, %v10206_v46, 0.0 }
 0x31e   : > { %v2949_v53 = vsel %vm210_vm1, %v10208_v49, 0.0  ;;  %v2993_v57 = vmul.f32 %v10208_v49, %v10208_v49 }
 0x31f   : > { %v2950_v61 = vadd.f32 %v2949_v53, %v2948_v50  ;;  %v3049_v63 = vadd.f32 %v3048_v51, %v3047_v48  ;;  %v3052_v8 = vsel %vm210_vm1, %v2994_v52, 0.0 }
 0x320   : > { %v3050_v3 = vsel %vm210_vm1, %v2993_v57, 0.0  ;;  %v10220_v4 = vpop.f32.mrb[28].mxu0 }
 0x321   : > { %v3051_v5 = vadd.f32 %v3050_v3, %v3049_v63  ;;  %v10222_v6 = vpop.f32.mrb[29].mxu0  ;;  %v2952_v7 = vadd.f32 %v2951_v1, %v2950_v61  ;;  %v2996_v13 = vmul.f32 %v10220_v4, %v10220_v4  ;;  %v2955_v20 = vsel %vm210_vm1, %v10220_v4, 0.0 }
 0x322   : > { %v2953_v16 = vsel %vm210_vm1, %v10222_v6, 0.0  ;;  %v2995_v17 = vmul.f32 %v10222_v6, %v10222_v6 }
 0x323   : > { %v2954_v18 = vadd.f32 %v2953_v16, %v2952_v7  ;;  %v3053_v19 = vadd.f32 %v3052_v8, %v3051_v5  ;;  %v3056_v32 = vsel %vm210_vm1, %v2996_v13, 0.0 }
 0x324   : > { %v3054_v22 = vsel %vm210_vm1, %v2995_v17, 0.0  ;;  %v10234_v24 = vpop.f32.mrb[30].mxu0 }
 0x325   : > { %v3055_v25 = vadd.f32 %v3054_v22, %v3053_v19  ;;  %v10236_v27 = vpop.f32.mrb[31].mxu0  ;;  %v2956_v30 = vadd.f32 %v2955_v20, %v2954_v18  ;;  %v2998_v34 = vmul.f32 %v10234_v24, %v10234_v24  ;;  %v2959_v41 = vsel %vm210_vm1, %v10234_v24, 0.0 }
 0x326   : > { %v2957_v36 = vsel %vm210_vm1, %v10236_v27, 0.0  ;;  %v2997_v37 = vmul.f32 %v10236_v27, %v10236_v27 }
 0x327   : > { %v2958_v38 = vadd.f32 %v2957_v36, %v2956_v30  ;;  %v3057_v39 = vadd.f32 %v3056_v32, %v3055_v25  ;;  %v3060_v50 = vsel %vm210_vm1, %v2998_v34, 0.0 }
 0x328   : > { %v3058_v43 = vsel %vm210_vm1, %v2997_v37, 0.0 }
 0x329   : > { %v2960_v44 = vadd.f32 %v2959_v41, %v2958_v38  ;;  %v3059_v48 = vadd.f32 %v3058_v43, %v3057_v39 }
 0x32b   : > { %v2961_v51 = vrot.slane %v2960_v44, 4  ;;  %v3061_v52 = vadd.f32 %v3060_v50, %v3059_v48 }
 0x32d   : > { %v2962_v53 = vadd.f32 %v2961_v51, %v2960_v44  ;;  %v3062_v57 = vrot.slane %v3061_v52, 4 }
 0x32f   : > { %v2963_v61 = vrot.slane %v2962_v53, 2  ;;  %v3063_v63 = vadd.f32 %v3062_v57, %v3061_v52 }
 0x331   : > { %v2964_v1 = vadd.f32 %v2963_v61, %v2962_v53  ;;  %v3064_v3 = vrot.slane %v3063_v63, 2 }
 0x333   : > { %v2965_v5 = vrot.slane %v2964_v1, 1  ;;  %v3065_v7 = vadd.f32 %v3064_v3, %v3063_v63 }
 0x335   : > { %v2966_v8 = vadd.f32 %v2965_v5, %v2964_v1  ;;  %v3066_v13 = vrot.slane %v3065_v7, 1 }
 0x337   : > { %v3067_v16 = vadd.f32 %v3066_v13, %v3065_v7  ;;  %v10249_v17 = vmul.f32 0.00390625, %v2966_v8 }
 0x339   : > { %v3069_v18 = vmul.f32 0.00390625, %v3067_v16  ;;  %v3070_v19 = vmul.f32 %v10249_v17, %v10249_v17  ;;  %v3103_v20 = vsub.f32 %v10236_v27, %v10249_v17  ;;  %v3073_v22 = vsub.f32 %v10031_v58, %v10249_v17 }
 0x33a   : > { %v3074_v25 = vsub.f32 %v10025_v55, %v10249_v17  ;;  %v3075_v30 = vsub.f32 %v10041_v2, %v10249_v17  ;;  %v3076_v32 = vsub.f32 %v10039_v0, %v10249_v17  ;;  %v3077_v34 = vsub.f32 %v10054_v11, %v10249_v17 }
 0x33b   : > { %v3071_v36 = vsub.f32 %v3069_v18, %v3070_v19  ;;  %v3078_v37 = vsub.f32 %v10052_v9, %v10249_v17  ;;  %v3079_v27 = vsub.f32 %v10068_v23, %v10249_v17  ;;  %v3080_v58 = vsub.f32 %v10066_v21, %v10249_v17 }
 0x33c   : > { %v3081_v55 = vsub.f32 %v10082_v35, %v10249_v17  ;;  %v3082_v2 = vsub.f32 %v10080_v33, %v10249_v17  ;;  %v3083_v0 = vsub.f32 %v10096_v47, %v10249_v17  ;;  %v3084_v11 = vsub.f32 %v10094_v45, %v10249_v17 }
 0x33d   : > { %v3072_v38 = vmax.f32 %v3071_v36, 0.0  ;;  %v3085_v9 = vsub.f32 %v10110_v62, %v10249_v17  ;;  %v3086_v23 = vsub.f32 %v10108_v60, %v10249_v17  ;;  %v3087_v21 = vsub.f32 %v10124_v14, %v10249_v17 }
 0x33e   : > { %v3088_v35 = vsub.f32 %v10122_v12, %v10249_v17  ;;  %v3089_v33 = vsub.f32 %v10138_v28, %v10249_v17  ;;  %v3090_v47 = vsub.f32 %v10136_v26, %v10249_v17  ;;  %v3091_v45 = vsub.f32 %v10152_v42, %v10249_v17 }
 0x33f   : > { %v3105_v39 = vadd.f32 1e-05, %v3072_v38  ;;  %v3092_v62 = vsub.f32 %v10150_v40, %v10249_v17  ;;  %v3093_v60 = vsub.f32 %v10166_v59, %v10249_v17  ;;  %v3094_v14 = vsub.f32 %v10164_v56, %v10249_v17 }
 0x340   : > { %v3095_v12 = vsub.f32 %v10180_v15, %v10249_v17  ;;  %v3096_v28 = vsub.f32 %v10178_v10, %v10249_v17  ;;  %v3097_v26 = vsub.f32 %v10194_v31, %v10249_v17  ;;  %v3098_v42 = vsub.f32 %v10192_v29, %v10249_v17 }
 0x341   : > { %9068 = vrsqrt.f32 %v3105_v39  ;;  %v3099_v40 = vsub.f32 %v10208_v49, %v10249_v17  ;;  %v3100_v59 = vsub.f32 %v10206_v46, %v10249_v17  ;;  %v3101_v56 = vsub.f32 %v10222_v6, %v10249_v17 }
 0x342   : > { %v3102_v15 = vsub.f32 %v10220_v4, %v10249_v17  ;;  %v3104_v10 = vsub.f32 %v10234_v24, %v10249_v17 }
 0x34b   : > { %v9069_v31 = vpop.eup %9068 }
 0x34c   : > { %v3137_v41 = vmul.f32 %v9069_v31, %v3103_v20  ;;  %v3107_v43 = vmul.f32 %v9069_v31, %v3073_v22  ;;  %v3108_v29 = vmul.f32 %v9069_v31, %v3074_v25  ;;  %v3109_v44 = vmul.f32 %v9069_v31, %v3075_v30 }
 0x34d   : > { %v3110_v48 = vmul.f32 %v9069_v31, %v3076_v32  ;;  %v3111_v50 = vmul.f32 %v9069_v31, %v3077_v34  ;;  %v3112_v49 = vmul.f32 %v9069_v31, %v3078_v37  ;;  %v3113_v51 = vmul.f32 %v9069_v31, %v3079_v27 }
 0x34e   : > { %v3169_v46 = vmax.f32 %v3137_v41, 0.0  ;;  %v3114_v52 = vmul.f32 %v9069_v31, %v3080_v58  ;;  %v3115_v53 = vmul.f32 %v9069_v31, %v3081_v55  ;;  %v3116_v6 = vmul.f32 %v9069_v31, %v3082_v2 }
 0x34f   : > { %v3117_v57 = vmul.f32 %v9069_v31, %v3083_v0  ;;  %v3118_v61 = vmul.f32 %v9069_v31, %v3084_v11  ;;  %v3119_v4 = vmul.f32 %v9069_v31, %v3085_v9  ;;  %v3120_v63 = vmul.f32 %v9069_v31, %v3086_v23 }
 0x350   : > { %3202 = vst.msk [vmem:[#allocation2 + $0x181] sm:$0xff] %vm210_vm1, %v3169_v46  ;;  %v3121_v24 = vmul.f32 %v9069_v31, %v3087_v21  ;;  %v10318_v1 = vmul.f32 %v9069_v31, %v3088_v35  ;;  %v10320_v3 = vmul.f32 %v9069_v31, %v3089_v33  ;;  %v10322_v5 = vmul.f32 %v9069_v31, %v3090_v47 }
 0x351   : > { %v10324_v7 = vmul.f32 %v9069_v31, %v3091_v45  ;;  %v10326_v8 = vmul.f32 %v9069_v31, %v3092_v62  ;;  %v10328_v13 = vmul.f32 %v9069_v31, %v3093_v60  ;;  %v10330_v16 = vmul.f32 %v9069_v31, %v3094_v14 }
 0x352   : > { %v10332_v17 = vmul.f32 %v9069_v31, %v3095_v12  ;;  %v10334_v18 = vmul.f32 %v9069_v31, %v3096_v28  ;;  %v10336_v19 = vmul.f32 %v9069_v31, %v3097_v26  ;;  %v10338_v20 = vmul.f32 %v9069_v31, %v3098_v42 }
 0x353   : > { %v10340_v22 = vmul.f32 %v9069_v31, %v3099_v40  ;;  %v10342_v25 = vmul.f32 %v9069_v31, %v3100_v59  ;;  %v10344_v30 = vmul.f32 %v9069_v31, %v3101_v56  ;;  %v10346_v32 = vmul.f32 %v9069_v31, %v3102_v15 }
 0x354   : > { %v10348_v34 = vmul.f32 %v9069_v31, %v3104_v10  ;;  %v3139_v36 = vmax.f32 %v3107_v43, 0.0  ;;  %v3140_v37 = vmax.f32 %v3108_v29, 0.0  ;;  %v3141_v27 = vmax.f32 %v3109_v44, 0.0 }
 0x355   : > { %v3142_v58 = vmax.f32 %v3110_v48, 0.0  ;;  %v3143_v55 = vmax.f32 %v3111_v50, 0.0  ;;  %v3144_v2 = vmax.f32 %v3112_v49, 0.0  ;;  %v3145_v0 = vmax.f32 %v3113_v51, 0.0 }
 0x356   : > { %v3146_v11 = vmax.f32 %v3114_v52, 0.0  ;;  %v3147_v38 = vmax.f32 %v3115_v53, 0.0  ;;  %v3148_v9 = vmax.f32 %v3116_v6, 0.0  ;;  %v3149_v23 = vmax.f32 %v3117_v57, 0.0  ;;  %3172 = vst.msk [vmem:[#allocation2 + $0x19] sm:$0xff] %vm210_vm1, %v3139_v36  ;;  %3173 = vst.msk [vmem:[#allocation2 + $0x21] sm:$0xff] %vm210_vm1, %v3140_v37 }
 0x357   : > { %3174 = vst.msk [vmem:[#allocation2 + $0x31] sm:$0xff] %vm210_vm1, %v3141_v27  ;;  %3204 = vst.msk [vmem:[#allocation2 + $0x1] sm:$0xff] %vm210_vm1, %v3141_v27  ;;  %v3150_v21 = vmax.f32 %v3118_v61, 0.0  ;;  %v3151_v35 = vmax.f32 %v3119_v4, 0.0  ;;  %v3152_v33 = vmax.f32 %v3120_v63, 0.0  ;;  %v3153_v47 = vmax.f32 %v3121_v24, 0.0 }
 0x358   : > { %3175 = vst.msk [vmem:[#allocation2 + $0x39] sm:$0xff] %vm210_vm1, %v3142_v58  ;;  %3176 = vst.msk [vmem:[#allocation2 + $0x49] sm:$0xff] %vm210_vm1, %v3143_v55  ;;  %v3225_v45 = vld [vmem:[#allocation2 + $0x182] sm:$0x1]  ;;  %v3154_v39 = vmax.f32 %v10318_v1, 0.0  ;;  %v3155_v62 = vmax.f32 %v10320_v3, 0.0 }
 0x359   : > { %3177 = vst.msk [vmem:[#allocation2 + $0x51] sm:$0xff] %vm210_vm1, %v3144_v2  ;;  %3178 = vst.msk [vmem:[#allocation2 + $0x61] sm:$0xff] %vm210_vm1, %v3145_v0  ;;  %v3156_v60 = vmax.f32 %v10322_v5, 0.0  ;;  %v3157_v14 = vmax.f32 %v10324_v7, 0.0  ;;  %v3158_v12 = vmax.f32 %v10326_v8, 0.0  ;;  %v3159_v28 = vmax.f32 %v10328_v13, 0.0 }
 0x35a   : > { %3205 = vst.msk [vmem:[#allocation2 + $0x9] sm:$0xff] %vm210_vm1, %v3142_v58  ;;  %3179 = vst.msk [vmem:[#allocation2 + $0x69] sm:$0xff] %vm210_vm1, %v3146_v11  ;;  %v3160_v26 = vmax.f32 %v10330_v16, 0.0  ;;  %v3161_v42 = vmax.f32 %v10332_v17, 0.0  ;;  %v3162_v40 = vmax.f32 %v10334_v18, 0.0  ;;  %v3163_v59 = vmax.f32 %v10336_v19, 0.0 }
 0x35b   : > { %3180 = vst.msk [vmem:[#allocation2 + $0x79] sm:$0xff] %vm210_vm1, %v3147_v38  ;;  %3181 = vst.msk [vmem:[#allocation2 + $0x81] sm:$0xff] %vm210_vm1, %v3148_v9  ;;  %v3164_v56 = vmax.f32 %v10338_v20, 0.0  ;;  %v3165_v15 = vmax.f32 %v10340_v22, 0.0  ;;  %v3166_v10 = vmax.f32 %v10342_v25, 0.0  ;;  %v3167_v31 = vmax.f32 %v10344_v30, 0.0 }
 0x35c   : > { %3182 = vst.msk [vmem:[#allocation2 + $0x91] sm:$0xff] %vm210_vm1, %v3149_v23  ;;  %3183 = vst.msk [vmem:[#allocation2 + $0x99] sm:$0xff] %vm210_vm1, %v3150_v21  ;;  %v3168_v41 = vmax.f32 %v10346_v32, 0.0  ;;  %v3170_v43 = vmax.f32 %v10348_v34, 0.0  ;;  %v10424_v3 = vld [vmem:[%s11669_s2 + $0x18] sm:$0xf] }
 0x35d   : > { %3244 = vst.msk [vmem:[#allocation2 + $0x180] sm:$0x1] %vm3227_vm2, %v3225_v45  ;;  %v3210_v29 = vld [vmem:[#allocation2 + $0x1a] sm:$0x1]  ;;  %v10419_v24 = vld [vmem:[#allocation2 + $0x20] sm:$0xff] }
 0x35e   : > { %3184 = vst.msk [vmem:[#allocation2 + $0xa9] sm:$0xff] %vm210_vm1, %v3151_v35  ;;  %3185 = vst.msk [vmem:[#allocation2 + $0xb1] sm:$0xff] %vm210_vm1, %v3152_v33  ;;  %v3211_v44 = vld [vmem:[#allocation2 + $0x32] sm:$0x1]  ;;  %v3209_v17 = vld [vmem:[#allocation2 + $0x2] sm:$0x1] }
 0x35f   : > { %3186 = vst.msk [vmem:[#allocation2 + $0xc1] sm:$0xff] %vm210_vm1, %v3153_v47  ;;  %3187 = vst.msk [vmem:[#allocation2 + $0xc9] sm:$0xff] %vm210_vm1, %v3154_v39  ;;  %v3212_v50 = vld [vmem:[#allocation2 + $0x4a] sm:$0x1]  ;;  %v10439_v13 = vld [vmem:[#allocation2 + $0x38] sm:$0xff] }
 0x360   : > { %3188 = vst.msk [vmem:[#allocation2 + $0xd9] sm:$0xff] %vm210_vm1, %v3155_v62  ;;  %3189 = vst.msk [vmem:[#allocation2 + $0xe1] sm:$0xff] %vm210_vm1, %v3156_v60  ;;  %v3213_v49 = vld [vmem:[#allocation2 + $0x62] sm:$0x1]  ;;  %v10448_v18 = vld [vmem:[#allocation2 + $0x50] sm:$0xff] }
 0x361   : > { %3190 = vst.msk [vmem:[#allocation2 + $0xf1] sm:$0xff] %vm210_vm1, %v3157_v14  ;;  %3191 = vst.msk [vmem:[#allocation2 + $0xf9] sm:$0xff] %vm210_vm1, %v3158_v12  ;;  %v3246_v48 = vld [vmem:[#allocation2 + $0xf] sm:$0x1]  ;;  %v3247_v36 = vld [vmem:[#allocation2 + $0x27] sm:$0x1] }
 0x362   : > { %3192 = vst.msk [vmem:[#allocation2 + $0x109] sm:$0xff] %vm210_vm1, %v3159_v28  ;;  %3193 = vst.msk [vmem:[#allocation2 + $0x111] sm:$0xff] %vm210_vm1, %v3160_v26  ;;  %v3214_v51 = vld [vmem:[#allocation2 + $0x7a] sm:$0x1]  ;;  %v10457_v20 = vld [vmem:[#allocation2 + $0x68] sm:$0xff] }
 0x363   : > { %3194 = vst.msk [vmem:[#allocation2 + $0x121] sm:$0xff] %vm210_vm1, %v3161_v42  ;;  %3195 = vst.msk [vmem:[#allocation2 + $0x129] sm:$0xff] %vm210_vm1, %v3162_v40  ;;  %v3215_v46 = vld [vmem:[#allocation2 + $0x92] sm:$0x1]  ;;  %v10465_v25 = vld [vmem:[#allocation2 + $0x80] sm:$0xff] }
 0x364   : > { %3196 = vst.msk [vmem:[#allocation2 + $0x139] sm:$0xff] %vm210_vm1, %v3163_v59  ;;  %3197 = vst.msk [vmem:[#allocation2 + $0x141] sm:$0xff] %vm210_vm1, %v3164_v56  ;;  %v10473_v32 = vld [vmem:[#allocation2 + $0x98] sm:$0xff]  ;;  %v3249_v27 = vld [vmem:[#allocation2 + $0x57] sm:$0x1] }
 0x365   : > { %3198 = vst.msk [vmem:[#allocation2 + $0x151] sm:$0xff] %vm210_vm1, %v3165_v15  ;;  %3199 = vst.msk [vmem:[#allocation2 + $0x159] sm:$0xff] %vm210_vm1, %v3166_v10  ;;  %v3216_v52 = vld [vmem:[#allocation2 + $0xaa] sm:$0x1]  ;;  %v3248_v37 = vld [vmem:[#allocation2 + $0x3f] sm:$0x1] }
 0x366   : > { %3200 = vst.msk [vmem:[#allocation2 + $0x169] sm:$0xff] %vm210_vm1, %v3167_v31  ;;  %3201 = vst.msk [vmem:[#allocation2 + $0x171] sm:$0xff] %vm210_vm1, %v3168_v41  ;;  %v3217_v53 = vld [vmem:[#allocation2 + $0xc2] sm:$0x1]  ;;  %v10483_v58 = vld [vmem:[#allocation2 + $0xb0] sm:$0xff] }
 0x367   : > { %3203 = vst.msk [vmem:[#allocation2 + $0x189] sm:$0xff] %vm210_vm1, %v3170_v43  ;;  %3207 = vst.msk [vmem:[#allocation2 + $0x199] sm:$0xff] %vm210_vm1, %v3167_v31  ;;  %v3218_v6 = vld [vmem:[#allocation2 + $0xda] sm:$0x1]  ;;  %v3250_v55 = vld [vmem:[#allocation2 + $0x6f] sm:$0x1] }
 0x368   : > { %3208 = vst.msk [vmem:[#allocation2 + $0x1a1] sm:$0xff] %vm210_vm1, %v3168_v41  ;;  %v3219_v57 = vld [vmem:[#allocation2 + $0xf2] sm:$0x1]  ;;  %v3251_v2 = vld [vmem:[#allocation2 + $0x87] sm:$0x1]  ;;  %v10497_v21 = vld [vmem:[#allocation2 + $0xc8] sm:$0xff] }
 0x369   : > { %3229 = vst.msk [vmem:[#allocation2 + $0x18] sm:$0x1] %vm3227_vm2, %v3210_v29  ;;  %3230 = vst.msk [vmem:[#allocation2 + $0x30] sm:$0x1] %vm3227_vm2, %v3211_v44  ;;  %v3220_v61 = vld [vmem:[#allocation2 + $0x10a] sm:$0x1] }
 0x36a   : > { %3264 = vst.msk [vmem:[#allocation2 + $0x11] sm:$0x1] %vm3227_vm2, %v3246_v48  ;;  %3231 = vst.msk [vmem:[#allocation2 + $0x48] sm:$0x1] %vm3227_vm2, %v3212_v50  ;;  %v3221_v4 = vld [vmem:[#allocation2 + $0x122] sm:$0x1] }
 0x36b   : > { %3232 = vst.msk [vmem:[#allocation2 + $0x60] sm:$0x1] %vm3227_vm2, %v3213_v49  ;;  %3233 = vst.msk [vmem:[#allocation2 + $0x78] sm:$0x1] %vm3227_vm2, %v3214_v51  ;;  %v3222_v1 = vld [vmem:[#allocation2 + $0x13a] sm:$0x1] }
 0x36c   : > { %3234 = vst.msk [vmem:[#allocation2 + $0x90] sm:$0x1] %vm3227_vm2, %v3215_v46  ;;  %3235 = vst.msk [vmem:[#allocation2 + $0xa8] sm:$0x1] %vm3227_vm2, %v3216_v52  ;;  %v3223_v7 = vld [vmem:[#allocation2 + $0x152] sm:$0x1] }
 0x36d   : > { %3236 = vst.msk [vmem:[#allocation2 + $0xc0] sm:$0x1] %vm3227_vm2, %v3217_v53  ;;  %3237 = vst.msk [vmem:[#allocation2 + $0xd8] sm:$0x1] %vm3227_vm2, %v3218_v6  ;;  %v3224_v8 = vld [vmem:[#allocation2 + $0x16a] sm:$0x1] }
 0x36e   : > { %3238 = vst.msk [vmem:[#allocation2 + $0xf0] sm:$0x1] %vm3227_vm2, %v3219_v57  ;;  %3239 = vst.msk [vmem:[#allocation2 + $0x108] sm:$0x1] %vm3227_vm2, %v3220_v61  ;;  %v3252_v11 = vld [vmem:[#allocation2 + $0x9f] sm:$0x1] }
 0x36f   : > { %3240 = vst.msk [vmem:[#allocation2 + $0x120] sm:$0x1] %vm3227_vm2, %v3221_v4  ;;  %3241 = vst.msk [vmem:[#allocation2 + $0x138] sm:$0x1] %vm3227_vm2, %v3222_v1  ;;  %v3253_v38 = vld [vmem:[#allocation2 + $0xb7] sm:$0x1] }
 0x370   : > { %v10413_v63 = vld [vmem:[#allocation2 + $0x18] sm:$0xff]  ;;  %v10428_v5 = vld [vmem:[#allocation2 + $0x30] sm:$0xff]  ;;  %3242 = vst.msk [vmem:[#allocation2 + $0x150] sm:$0x1] %vm3227_vm2, %v3223_v7  ;;  %3243 = vst.msk [vmem:[#allocation2 + $0x168] sm:$0x1] %vm3227_vm2, %v3224_v8 }
 0x371   : > { %8099 = vmatprep.mubr.msk.f32.mxu1 %vm210_vm1, %v10413_v63  ;;  %v10443_v16 = vld [vmem:[#allocation2 + $0x48] sm:$0xff]  ;;  %3228 = vst.msk [vmem:[#allocation2] sm:$0x1] %vm3227_vm2, %v3209_v17  ;;  %3265 = vst.msk [vmem:[#allocation2 + $0x29] sm:$0x1] %vm3227_vm2, %v3247_v36  ;;  %v10510_v60 = vld [vmem:[#allocation2 + $0xe0] sm:$0xff] }
 0x372   : > { %8100 = vmatmul.mubr.msk.f32.vlgmr.msra.gmra.mrb[0].mxu1 %vm210_vm1, %v10419_v24  ;;  %v10453_v19 = vld [vmem:[#allocation2 + $0x60] sm:$0xff]  ;;  %v10461_v22 = vld [vmem:[#allocation2 + $0x78] sm:$0xff]  ;;  %3266 = vst.msk [vmem:[#allocation2 + $0x41] sm:$0x1] %vm3227_vm2, %v3248_v37  ;;  %3267 = vst.msk [vmem:[#allocation2 + $0x59] sm:$0x1] %vm3227_vm2, %v3249_v27 }
 0x373   : > { %8148 = vmatpush3.msk.msra.mxu1 %vm307_vm0, %v10021_v54  ;;  %8102 = vmatprep.mubr.msk.f32.mxu1 %vm210_vm1, %v10428_v5  ;;  %v3226_v54 = vld [vmem:[#allocation2 + $0x19a] sm:$0x1]  ;;  %v10469_v30 = vld [vmem:[#allocation2 + $0x90] sm:$0xff]  ;;  %v10477_v34 = vld [vmem:[#allocation2 + $0xa8] sm:$0xff]  ;;  %3268 = vst.msk [vmem:[#allocation2 + $0x71] sm:$0x1] %vm3227_vm2, %v3250_v55 }
 0x374   : > { %8197 = vmatprep.subr.msk.mxu1 %vm307_vm0, %v10424_v3  ;;  %3245 = vst.msk [vmem:[#allocation2 + $0x198] sm:$0x1] %vm3227_vm2, %v3226_v54  ;;  %v10488_v0 = vld [vmem:[#allocation2 + $0xc0] sm:$0xff]  ;;  %3269 = vst.msk [vmem:[#allocation2 + $0x89] sm:$0x1] %vm3227_vm2, %v3251_v2  ;;  %v10502_v47 = vld [vmem:[#allocation2 + $0xd8] sm:$0xff] }
 0x375   : > { %3270 = vst.msk [vmem:[#allocation2 + $0xa1] sm:$0x1] %vm3227_vm2, %v3252_v11  ;;  %v3254_v9 = vld [vmem:[#allocation2 + $0xcf] sm:$0x1]  ;;  %3271 = vst.msk [vmem:[#allocation2 + $0xb9] sm:$0x1] %vm3227_vm2, %v3253_v38 }
 0x376   : > { %8103 = vmatmul.mubr.msk.f32.gmra.mrb[2].mxu1 %vm210_vm1, %v10439_v13  ;;  %3272 = vst.msk [vmem:[#allocation2 + $0xd1] sm:$0x1] %vm3227_vm2, %v3254_v9  ;;  %v3255_v23 = vld [vmem:[#allocation2 + $0xe7] sm:$0x1]  ;;  %v3256_v35 = vld [vmem:[#allocation2 + $0xff] sm:$0x1] }
 0x377   : > { %8105 = vmatprep.mubr.msk.f32.mxu1 %vm210_vm1, %v10443_v16  ;;  %3273 = vst.msk [vmem:[#allocation2 + $0xe9] sm:$0x1] %vm3227_vm2, %v3255_v23  ;;  %v3257_v33 = vld [vmem:[#allocation2 + $0x117] sm:$0x1]  ;;  %3274 = vst.msk [vmem:[#allocation2 + $0x101] sm:$0x1] %vm3227_vm2, %v3256_v35 }
 0x378   : > { %3275 = vst.msk [vmem:[#allocation2 + $0x119] sm:$0x1] %vm3227_vm2, %v3257_v33  ;;  %v3258_v45 = vld [vmem:[#allocation2 + $0x12f] sm:$0x1]  ;;  %v3259_v39 = vld [vmem:[#allocation2 + $0x147] sm:$0x1] }
 0x379   : > { %3276 = vst.msk [vmem:[#allocation2 + $0x131] sm:$0x1] %vm3227_vm2, %v3258_v45  ;;  %3277 = vst.msk [vmem:[#allocation2 + $0x149] sm:$0x1] %vm3227_vm2, %v3259_v39  ;;  %v3260_v62 = vld [vmem:[#allocation2 + $0x15f] sm:$0x1] }
 0x37a   : > { %8106 = vmatmul.mubr.msk.f32.gmra.mrb[4].mxu1 %vm210_vm1, %v10448_v18  ;;  %3278 = vst.msk [vmem:[#allocation2 + $0x161] sm:$0x1] %vm3227_vm2, %v3260_v62  ;;  %v10515_v14 = vld [vmem:[#allocation2 + $0xf0] sm:$0xff]  ;;  %v3262_v28 = vld [vmem:[#allocation2 + $0x18f] sm:$0x1]  ;;  %v10521_v42 = vld [vmem:[#allocation2 + $0xf8] sm:$0xff] }
 0x37b   : > { %8108 = vmatprep.mubr.msk.f32.mxu1 %vm210_vm1, %v10453_v19  ;;  %v3261_v12 = vld [vmem:[#allocation2 + $0x177] sm:$0x1]  ;;  %3280 = vst.msk [vmem:[#allocation2 + $0x191] sm:$0x1] %vm3227_vm2, %v3262_v28  ;;  %v3263_v26 = vld [vmem:[#allocation2 + $0x1a7] sm:$0x1] }
 0x37c   : > { %3279 = vst.msk [vmem:[#allocation2 + $0x179] sm:$0x1] %vm3227_vm2, %v3261_v12  ;;  %3281 = vst.msk [vmem:[#allocation2 + $0x1a9] sm:$0x1] %vm3227_vm2, %v3263_v26  ;;  %v10526_v40 = vld [vmem:[#allocation2 + $0x108] sm:$0xff]  ;;  %v10530_v59 = vld [vmem:[#allocation2 + $0x110] sm:$0xff] }
 0x37d   : > { %v10534_v56 = vld [vmem:[#allocation2 + $0x120] sm:$0xff]  ;;  %v10538_v15 = vld [vmem:[#allocation2 + $0x128] sm:$0xff]  ;;  %v10542_v10 = vld [vmem:[#allocation2 + $0x138] sm:$0xff] }
 0x37e   : > { %8109 = vmatmul.mubr.msk.f32.gmra.mrb[6].mxu1 %vm210_vm1, %v10457_v20  ;;  %v10546_v31 = vld [vmem:[#allocation2 + $0x140] sm:$0xff]  ;;  %v10550_v41 = vld [vmem:[#allocation2 + $0x150] sm:$0xff]  ;;  %v10554_v43 = vld [vmem:[#allocation2 + $0x158] sm:$0xff] }
 0x37f   : > { %8111 = vmatprep.mubr.msk.f32.mxu1 %vm210_vm1, %v10461_v22  ;;  %v10558_v29 = vld [vmem:[#allocation2 + $0x168] sm:$0xff]  ;;  %v10562_v44 = vld [vmem:[#allocation2 + $0x170] sm:$0xff]  ;;  %v10566_v48 = vld [vmem:[#allocation2 + $0x180] sm:$0xff] }
 0x380   : > { %v10570_v50 = vld [vmem:[#allocation2 + $0x188] sm:$0xff]  ;;  %v3282_v49 = vld [vmem:[#allocation2] sm:$0xff]  ;;  %v6848_v52 = vld [vmem:[%s11669_s2 + $0x10] sm:$0xf] }
 0x381   : > { %v3283_v51 = vld [vmem:[#allocation2 + $0x8] sm:$0xff]  ;;  %v6814_v46 = vld [vmem:[%s11669_s2 + $0x4] sm:$0xf]  ;;  %v3316_v53 = vld [vmem:[#allocation2 + $0x198] sm:$0xff] }
 0x382   : > { %8112 = vmatmul.mubr.msk.f32.gmra.mrb[8].mxu1 %vm210_vm1, %v10465_v25  ;;  %v3317_v6 = vld [vmem:[#allocation2 + $0x1a0] sm:$0xff]  ;;  %v4148_v61 = vld [vmem:[#allocation2 + $0x9] sm:$0xff]  ;;  %v10713_v4 = vld [vmem:[%s11669_s2 + $0x1c] sm:$0xf] }
 0x383   : > { %8114 = vmatprep.mubr.msk.f32.mxu1 %vm210_vm1, %v10469_v30  ;;  %v4147_v57 = vld [vmem:[#allocation2 + $0x1] sm:$0xff]  ;;  %v10721_v1 = vld [vmem:[#allocation2 + $0x31] sm:$0xff]  ;;  %v10789_v36 = vld [vmem:[#allocation2 + $0xf9] sm:$0xff] }
 0x384   : > { %v10733_v7 = vld [vmem:[#allocation2 + $0x51] sm:$0xff]  ;;  %v10737_v8 = vld [vmem:[#allocation2 + $0x61] sm:$0xff]  ;;  %v10793_v37 = vld [vmem:[#allocation2 + $0x109] sm:$0xff] }
 0x385   : > { %v10749_v17 = vld [vmem:[#allocation2 + $0x81] sm:$0xff]  ;;  %v10753_v54 = vld [vmem:[#allocation2 + $0x91] sm:$0xff]  ;;  %v10805_v55 = vld [vmem:[#allocation2 + $0x129] sm:$0xff] }
 0x386   : > { %8115 = vmatmul.mubr.msk.f32.gmra.mrb[10].mxu1 %vm210_vm1, %v10473_v32  ;;  %v10797_v27 = vld [vmem:[#allocation2 + $0x111] sm:$0xff]  ;;  %v10809_v2 = vld [vmem:[#allocation2 + $0x139] sm:$0xff]  ;;  %v10825_v9 = vld [vmem:[#allocation2 + $0x169] sm:$0xff] }
 0x387   : > { %8117 = vmatprep.mubr.msk.f32.mxu1 %vm210_vm1, %v10477_v34  ;;  %v10817_v11 = vld [vmem:[#allocation2 + $0x151] sm:$0xff]  ;;  %v10821_v38 = vld [vmem:[#allocation2 + $0x159] sm:$0xff]  ;;  %v4179_v35 = vld [vmem:[#allocation2 + $0x181] sm:$0xff] }
 0x388   : > { %v10829_v23 = vld [vmem:[#allocation2 + $0x171] sm:$0xff]  ;;  %v4180_v33 = vld [vmem:[#allocation2 + $0x189] sm:$0xff]  ;;  %v4181_v45 = vld [vmem:[#allocation2 + $0x199] sm:$0xff] }
 0x389   : > { %v4182_v39 = vld [vmem:[#allocation2 + $0x1a1] sm:$0xff]  ;;  %v10976_v26 = vld [vmem:[#allocation2 + $0x32] sm:$0xff] }
 0x38a   : > { %8118 = vmatmul.mubr.msk.f32.gmra.mrb[12].mxu1 %vm210_vm1, %v10483_v58  ;;  %v5077_v62 = vld [vmem:[#allocation2 + $0x2] sm:$0xff]  ;;  %v5079_v12 = vld [vmem:[#allocation2 + $0x1a] sm:$0xff] }
 0x38b   : > { %8120 = vmatprep.mubr.msk.f32.mxu1 %vm210_vm1, %v10488_v0  ;;  %v5080_v28 = vld [vmem:[#allocation2 + $0x22] sm:$0xff] }
 0x38e   : > { %8121 = vmatmul.mubr.msk.f32.gmra.mrb[14].mxu1 %vm210_vm1, %v10497_v21 }
 0x38f   : > { %8123 = vmatprep.mubr.msk.f32.mxu1 %vm210_vm1, %v10502_v47 }
 0x392   : > { %8124 = vmatmul.mubr.msk.f32.gmra.mrb[16].mxu1 %vm210_vm1, %v10510_v60 }
 0x393   : > { %8126 = vmatprep.mubr.msk.f32.mxu1 %vm210_vm1, %v10515_v14 }
 0x396   : > { %8127 = vmatmul.mubr.msk.f32.gmra.mrb[18].mxu1 %vm210_vm1, %v10521_v42 }
 0x397   : > { %8129 = vmatprep.mubr.msk.f32.mxu1 %vm210_vm1, %v10526_v40 }
 0x39a   : > { %8130 = vmatmul.mubr.msk.f32.gmra.mrb[20].mxu1 %vm210_vm1, %v10530_v59 }
 0x39b   : > { %8132 = vmatprep.mubr.msk.f32.mxu1 %vm210_vm1, %v10534_v56 }
 0x39e   : > { %8133 = vmatmul.mubr.msk.f32.gmra.mrb[22].mxu1 %vm210_vm1, %v10538_v15 }
 0x39f   : > { %8135 = vmatprep.mubr.msk.f32.mxu1 %vm210_vm1, %v10542_v10 }
 0x3a2   : > { %8136 = vmatmul.mubr.msk.f32.gmra.mrb[24].mxu1 %vm210_vm1, %v10546_v31 }
 0x3a3   : > { %8138 = vmatprep.mubr.msk.f32.mxu1 %vm210_vm1, %v10550_v41 }
 0x3a6   : > { %8139 = vmatmul.mubr.msk.f32.gmra.mrb[26].mxu1 %vm210_vm1, %v10554_v43 }
 0x3a7   : > { %8141 = vmatprep.mubr.msk.f32.mxu1 %vm210_vm1, %v10558_v29 }
 0x3aa   : > { %8142 = vmatmul.mubr.msk.f32.gmra.mrb[28].mxu1 %vm210_vm1, %v10562_v44 }
 0x3ab   : > { %8144 = vmatprep.mubr.msk.f32.mxu1 %vm210_vm1, %v10566_v48 }
 0x3ae   : > { %8145 = vmatmul.mubr.msk.f32.gmra.mrb[30].mxu1 %vm210_vm1, %v10570_v50 }
 0x3af   : > { %8149 = vmatprep.mubr.msk.f32.mxu1 %vm210_vm1, %v3282_v49  ;;  %v11032_v49 = vld [vmem:[#allocation2 + $0xda] sm:$0xff] }
 0x3b2   : > { %8150 = vmatmul.mubr.msk.f32.vlgmr.msra.gmra.mrb[0].mxu1 %vm210_vm1, %v3283_v51  ;;  %v11036_v51 = vld [vmem:[#allocation2 + $0xe2] sm:$0xff] }
 0x3b3   : > { %8198 = vmatpush3.msk.msra.mxu1 %vm307_vm0, %v10424_v3  ;;  %8152 = vmatprep.mubr.msk.f32.mxu1 %vm210_vm1, %v10413_v63  ;;  %v4149_v63 = vld [vmem:[#allocation2 + $0x19] sm:$0xff] }
 0x3b4   : > { %8247 = vmatprep.subr.msk.mxu1 %vm307_vm0, %v6814_v46  ;;  %v10725_v3 = vld [vmem:[#allocation2 + $0x39] sm:$0xff] }
 0x3b6   : > { %8153 = vmatmul.mubr.msk.f32.gmra.mrb[2].mxu1 %vm210_vm1, %v10419_v24  ;;  %v4150_v24 = vld [vmem:[#allocation2 + $0x21] sm:$0xff] }
 0x3b7   : > { %8155 = vmatprep.mubr.msk.f32.mxu1 %vm210_vm1, %v10428_v5 }
 0x3ba   : > { %8156 = vmatmul.mubr.msk.f32.gmra.mrb[4].mxu1 %vm210_vm1, %v10439_v13 }
 0x3bb   : > { %8158 = vmatprep.mubr.msk.f32.mxu1 %vm210_vm1, %v10443_v16 }
 0x3be   : > { %8159 = vmatmul.mubr.msk.f32.gmra.mrb[6].mxu1 %vm210_vm1, %v10448_v18 }
 0x3bf   : > { %8161 = vmatprep.mubr.msk.f32.mxu1 %vm210_vm1, %v10453_v19 }
 0x3c2   : > { %8162 = vmatmul.mubr.msk.f32.gmra.mrb[8].mxu1 %vm210_vm1, %v10457_v20 }
 0x3c3   : > { %8164 = vmatprep.mubr.msk.f32.mxu1 %vm210_vm1, %v10461_v22 }
 0x3c6   : > { %8165 = vmatmul.mubr.msk.f32.gmra.mrb[10].mxu1 %vm210_vm1, %v10465_v25 }
 0x3c7   : > { %8167 = vmatprep.mubr.msk.f32.mxu1 %vm210_vm1, %v10469_v30 }
 0x3ca   : > { %8168 = vmatmul.mubr.msk.f32.gmra.mrb[12].mxu1 %vm210_vm1, %v10473_v32 }
 0x3cb   : > { %8170 = vmatprep.mubr.msk.f32.mxu1 %vm210_vm1, %v10477_v34 }
 0x3ce   : > { %8171 = vmatmul.mubr.msk.f32.gmra.mrb[14].mxu1 %vm210_vm1, %v10483_v58 }
 0x3cf   : > { %8173 = vmatprep.mubr.msk.f32.mxu1 %vm210_vm1, %v10488_v0 }
 0x3d2   : > { %8174 = vmatmul.mubr.msk.f32.gmra.mrb[16].mxu1 %vm210_vm1, %v10497_v21 }
 0x3d3   : > { %8176 = vmatprep.mubr.msk.f32.mxu1 %vm210_vm1, %v10502_v47 }
 0x3d6   : > { %8177 = vmatmul.mubr.msk.f32.gmra.mrb[18].mxu1 %vm210_vm1, %v10510_v60 }
 0x3d7   : > { %8179 = vmatprep.mubr.msk.f32.mxu1 %vm210_vm1, %v10515_v14 }
 0x3da   : > { %8180 = vmatmul.mubr.msk.f32.gmra.mrb[20].mxu1 %vm210_vm1, %v10521_v42 }
 0x3db   : > { %8182 = vmatprep.mubr.msk.f32.mxu1 %vm210_vm1, %v10526_v40 }
 0x3de   : > { %8183 = vmatmul.mubr.msk.f32.gmra.mrb[22].mxu1 %vm210_vm1, %v10530_v59 }
 0x3df   : > { %8185 = vmatprep.mubr.msk.f32.mxu1 %vm210_vm1, %v10534_v56 }
 0x3e2   : > { %8186 = vmatmul.mubr.msk.f32.gmra.mrb[24].mxu1 %vm210_vm1, %v10538_v15 }
 0x3e3   : > { %8188 = vmatprep.mubr.msk.f32.mxu1 %vm210_vm1, %v10542_v10 }
 0x3e6   : > { %8189 = vmatmul.mubr.msk.f32.gmra.mrb[26].mxu1 %vm210_vm1, %v10546_v31 }
 0x3e7   : > { %8191 = vmatprep.mubr.msk.f32.mxu1 %vm210_vm1, %v10550_v41 }
 0x3ea   : > { %8192 = vmatmul.mubr.msk.f32.gmra.mrb[28].mxu1 %vm210_vm1, %v10554_v43 }
 0x3eb   : > { %8194 = vmatprep.mubr.msk.f32.mxu1 %vm210_vm1, %v10558_v29 }
 0x3ee   : > { %8195 = vmatmul.mubr.msk.f32.gmra.mrb[30].mxu1 %vm210_vm1, %v10562_v44 }
 0x3ef   : > { %8199 = vmatprep.mubr.msk.f32.mxu1 %vm210_vm1, %v10428_v5  ;;  %v10729_v5 = vld [vmem:[#allocation2 + $0x49] sm:$0xff] }
 0x3f2   : > { %8200 = vmatmul.mubr.msk.f32.vlgmr.msra.gmra.mrb[0].mxu1 %vm210_vm1, %v10439_v13  ;;  %v10741_v13 = vld [vmem:[#allocation2 + $0x69] sm:$0xff] }
 0x3f3   : > { %8248 = vmatpush3.msk.msra.mxu1 %vm307_vm0, %v6814_v46  ;;  %8202 = vmatprep.mubr.msk.f32.mxu1 %vm210_vm1, %v10443_v16  ;;  %v10745_v16 = vld [vmem:[#allocation2 + $0x79] sm:$0xff] }
 0x3f4   : > { %8297 = vmatprep.subr.msk.mxu1 %vm307_vm0, %v6848_v52  ;;  %v11040_v46 = vld [vmem:[#allocation2 + $0xf2] sm:$0xff] }
 0x3f6   : > { %8203 = vmatmul.mubr.msk.f32.gmra.mrb[2].mxu1 %vm210_vm1, %v10448_v18  ;;  %v10757_v18 = vld [vmem:[#allocation2 + $0x99] sm:$0xff] }
 0x3f7   : > { %8205 = vmatprep.mubr.msk.f32.mxu1 %vm210_vm1, %v10453_v19  ;;  %v10761_v19 = vld [vmem:[#allocation2 + $0xa9] sm:$0xff] }
 0x3fa   : > { %8206 = vmatmul.mubr.msk.f32.gmra.mrb[4].mxu1 %vm210_vm1, %v10457_v20  ;;  %v10765_v20 = vld [vmem:[#allocation2 + $0xb1] sm:$0xff] }
 0x3fb   : > { %8208 = vmatprep.mubr.msk.f32.mxu1 %vm210_vm1, %v10461_v22  ;;  %v10769_v22 = vld [vmem:[#allocation2 + $0xc1] sm:$0xff] }
 0x3fe   : > { %8209 = vmatmul.mubr.msk.f32.gmra.mrb[6].mxu1 %vm210_vm1, %v10465_v25  ;;  %v10773_v25 = vld [vmem:[#allocation2 + $0xc9] sm:$0xff] }
 0x3ff   : > { %8211 = vmatprep.mubr.msk.f32.mxu1 %vm210_vm1, %v10469_v30  ;;  %v10777_v30 = vld [vmem:[#allocation2 + $0xd9] sm:$0xff] }
 0x402   : > { %8212 = vmatmul.mubr.msk.f32.gmra.mrb[8].mxu1 %vm210_vm1, %v10473_v32  ;;  %v10781_v32 = vld [vmem:[#allocation2 + $0xe1] sm:$0xff] }
 0x403   : > { %8214 = vmatprep.mubr.msk.f32.mxu1 %vm210_vm1, %v10477_v34  ;;  %v10785_v34 = vld [vmem:[#allocation2 + $0xf1] sm:$0xff] }
 0x406   : > { %8215 = vmatmul.mubr.msk.f32.gmra.mrb[10].mxu1 %vm210_vm1, %v10483_v58  ;;  %v10801_v58 = vld [vmem:[#allocation2 + $0x121] sm:$0xff] }
 0x407   : > { %8217 = vmatprep.mubr.msk.f32.mxu1 %vm210_vm1, %v10488_v0  ;;  %v10813_v0 = vld [vmem:[#allocation2 + $0x141] sm:$0xff] }
 0x40a   : > { %8218 = vmatmul.mubr.msk.f32.gmra.mrb[12].mxu1 %vm210_vm1, %v10497_v21  ;;  %v6916_v21 = vld [vmem:[%s11669_s2 + $0x8] sm:$0xf] }
 0x40b   : > { %8220 = vmatprep.mubr.msk.f32.mxu1 %vm210_vm1, %v10502_v47  ;;  %v6950_v47 = vld [vmem:[%s11669_s2 + $0x14] sm:$0xf] }
 0x40e   : > { %8221 = vmatmul.mubr.msk.f32.gmra.mrb[14].mxu1 %vm210_vm1, %v10510_v60  ;;  %v5078_v60 = vld [vmem:[#allocation2 + $0xa] sm:$0xff] }
 0x40f   : > { %8223 = vmatprep.mubr.msk.f32.mxu1 %vm210_vm1, %v10515_v14  ;;  %v10968_v14 = vld [vmem:[%s11669_s2 + $0x20] sm:$0xf] }
 0x412   : > { %8224 = vmatmul.mubr.msk.f32.gmra.mrb[16].mxu1 %vm210_vm1, %v10521_v42  ;;  %v10980_v42 = vld [vmem:[#allocation2 + $0x3a] sm:$0xff] }
 0x413   : > { %8226 = vmatprep.mubr.msk.f32.mxu1 %vm210_vm1, %v10526_v40  ;;  %v10984_v40 = vld [vmem:[#allocation2 + $0x4a] sm:$0xff] }
 0x416   : > { %8227 = vmatmul.mubr.msk.f32.gmra.mrb[18].mxu1 %vm210_vm1, %v10530_v59  ;;  %v10988_v59 = vld [vmem:[#allocation2 + $0x52] sm:$0xff] }
 0x417   : > { %8229 = vmatprep.mubr.msk.f32.mxu1 %vm210_vm1, %v10534_v56  ;;  %v10992_v56 = vld [vmem:[#allocation2 + $0x62] sm:$0xff] }
 0x41a   : > { %8230 = vmatmul.mubr.msk.f32.gmra.mrb[20].mxu1 %vm210_vm1, %v10538_v15  ;;  %v10996_v15 = vld [vmem:[#allocation2 + $0x6a] sm:$0xff] }
 0x41b   : > { %8232 = vmatprep.mubr.msk.f32.mxu1 %vm210_vm1, %v10542_v10  ;;  %v11000_v10 = vld [vmem:[#allocation2 + $0x7a] sm:$0xff] }
 0x41e   : > { %8233 = vmatmul.mubr.msk.f32.gmra.mrb[22].mxu1 %vm210_vm1, %v10546_v31  ;;  %v11004_v31 = vld [vmem:[#allocation2 + $0x82] sm:$0xff] }
 0x41f   : > { %8235 = vmatprep.mubr.msk.f32.mxu1 %vm210_vm1, %v10550_v41  ;;  %v11008_v41 = vld [vmem:[#allocation2 + $0x92] sm:$0xff] }
 0x422   : > { %8236 = vmatmul.mubr.msk.f32.gmra.mrb[24].mxu1 %vm210_vm1, %v10554_v43  ;;  %v11012_v43 = vld [vmem:[#allocation2 + $0x9a] sm:$0xff] }
 0x423   : > { %8238 = vmatprep.mubr.msk.f32.mxu1 %vm210_vm1, %v10558_v29  ;;  %v11016_v29 = vld [vmem:[#allocation2 + $0xaa] sm:$0xff] }
 0x426   : > { %8239 = vmatmul.mubr.msk.f32.gmra.mrb[26].mxu1 %vm210_vm1, %v10562_v44  ;;  %v11020_v44 = vld [vmem:[#allocation2 + $0xb2] sm:$0xff] }
 0x427   : > { %8241 = vmatprep.mubr.msk.f32.mxu1 %vm210_vm1, %v10566_v48  ;;  %v11024_v48 = vld [vmem:[#allocation2 + $0xc2] sm:$0xff] }
 0x42a   : > { %8242 = vmatmul.mubr.msk.f32.gmra.mrb[28].mxu1 %vm210_vm1, %v10570_v50  ;;  %v11028_v50 = vld [vmem:[#allocation2 + $0xca] sm:$0xff] }
 0x42b   : > { %8244 = vmatprep.mubr.msk.f32.mxu1 %vm210_vm1, %v3316_v53  ;;  %v11048_v53 = vld [vmem:[#allocation2 + $0x10a] sm:$0xff] }
 0x42e   : > { %8245 = vmatmul.mubr.msk.f32.gmra.mrb[30].mxu1 %vm210_vm1, %v3317_v6  ;;  %v11052_v6 = vld [vmem:[#allocation2 + $0x112] sm:$0xff] }
 0x42f   : > { %8249 = vmatprep.mubr.msk.f32.mxu1 %vm210_vm1, %v4147_v57  ;;  %v11056_v57 = vld [vmem:[#allocation2 + $0x122] sm:$0xff] }
 0x432   : > { %8250 = vmatmul.mubr.msk.f32.vlgmr.msra.gmra.mrb[0].mxu1 %vm210_vm1, %v4148_v61  ;;  %v11060_v61 = vld [vmem:[#allocation2 + $0x12a] sm:$0xff] }
 0x433   : > { %8298 = vmatpush3.msk.msra.mxu1 %vm307_vm0, %v6848_v52  ;;  %8252 = vmatprep.mubr.msk.f32.mxu1 %vm210_vm1, %v4149_v63  ;;  %v11044_v52 = vld [vmem:[#allocation2 + $0xfa] sm:$0xff] }
 0x434   : > { %8347 = vmatprep.subr.msk.mxu1 %vm307_vm0, %v10713_v4 }
 0x436   : > { %8253 = vmatmul.mubr.msk.f32.gmra.mrb[2].mxu1 %vm210_vm1, %v4150_v24 }
 0x437   : > { %8255 = vmatprep.mubr.msk.f32.mxu1 %vm210_vm1, %v10721_v1 }
 0x43a   : > { %8256 = vmatmul.mubr.msk.f32.gmra.mrb[4].mxu1 %vm210_vm1, %v10725_v3 }
 0x43b   : > { %8258 = vmatprep.mubr.msk.f32.mxu1 %vm210_vm1, %v10729_v5 }
 0x43e   : > { %8259 = vmatmul.mubr.msk.f32.gmra.mrb[6].mxu1 %vm210_vm1, %v10733_v7 }
 0x43f   : > { %8261 = vmatprep.mubr.msk.f32.mxu1 %vm210_vm1, %v10737_v8 }
 0x442   : > { %8262 = vmatmul.mubr.msk.f32.gmra.mrb[8].mxu1 %vm210_vm1, %v10741_v13 }
 0x443   : > { %8264 = vmatprep.mubr.msk.f32.mxu1 %vm210_vm1, %v10745_v16 }
 0x446   : > { %8265 = vmatmul.mubr.msk.f32.gmra.mrb[10].mxu1 %vm210_vm1, %v10749_v17 }
 0x447   : > { %8267 = vmatprep.mubr.msk.f32.mxu1 %vm210_vm1, %v10753_v54 }
 0x44a   : > { %8268 = vmatmul.mubr.msk.f32.gmra.mrb[12].mxu1 %vm210_vm1, %v10757_v18 }
 0x44b   : > { %8270 = vmatprep.mubr.msk.f32.mxu1 %vm210_vm1, %v10761_v19 }
 0x44e   : > { %8271 = vmatmul.mubr.msk.f32.gmra.mrb[14].mxu1 %vm210_vm1, %v10765_v20 }
 0x44f   : > { %8273 = vmatprep.mubr.msk.f32.mxu1 %vm210_vm1, %v10769_v22 }
 0x452   : > { %8274 = vmatmul.mubr.msk.f32.gmra.mrb[16].mxu1 %vm210_vm1, %v10773_v25 }
 0x453   : > { %8276 = vmatprep.mubr.msk.f32.mxu1 %vm210_vm1, %v10777_v30 }
 0x456   : > { %8277 = vmatmul.mubr.msk.f32.gmra.mrb[18].mxu1 %vm210_vm1, %v10781_v32 }
 0x457   : > { %8279 = vmatprep.mubr.msk.f32.mxu1 %vm210_vm1, %v10785_v34 }
 0x45a   : > { %8280 = vmatmul.mubr.msk.f32.gmra.mrb[20].mxu1 %vm210_vm1, %v10789_v36 }
 0x45b   : > { %8282 = vmatprep.mubr.msk.f32.mxu1 %vm210_vm1, %v10793_v37 }
 0x45e   : > { %8283 = vmatmul.mubr.msk.f32.gmra.mrb[22].mxu1 %vm210_vm1, %v10797_v27 }
 0x45f   : > { %8285 = vmatprep.mubr.msk.f32.mxu1 %vm210_vm1, %v10801_v58 }
 0x462   : > { %8286 = vmatmul.mubr.msk.f32.gmra.mrb[24].mxu1 %vm210_vm1, %v10805_v55 }
 0x463   : > { %8288 = vmatprep.mubr.msk.f32.mxu1 %vm210_vm1, %v10809_v2 }
 0x466   : > { %8289 = vmatmul.mubr.msk.f32.gmra.mrb[26].mxu1 %vm210_vm1, %v10813_v0 }
 0x467   : > { %8291 = vmatprep.mubr.msk.f32.mxu1 %vm210_vm1, %v10817_v11 }
 0x46a   : > { %8292 = vmatmul.mubr.msk.f32.gmra.mrb[28].mxu1 %vm210_vm1, %v10821_v38 }
 0x46b   : > { %8294 = vmatprep.mubr.msk.f32.mxu1 %vm210_vm1, %v10825_v9 }
 0x46e   : > { %8295 = vmatmul.mubr.msk.f32.gmra.mrb[30].mxu1 %vm210_vm1, %v10829_v23 }
 0x46f   : > { %8299 = vmatprep.mubr.msk.f32.mxu1 %vm210_vm1, %v4149_v63  ;;  %v11068_v63 = vld [vmem:[#allocation2 + $0x142] sm:$0xff] }
 0x472   : > { %8300 = vmatmul.mubr.msk.f32.vlgmr.msra.gmra.mrb[0].mxu1 %vm210_vm1, %v4150_v24  ;;  %v11072_v24 = vld [vmem:[#allocation2 + $0x152] sm:$0xff] }
 0x473   : > { %8348 = vmatpush3.msk.msra.mxu1 %vm307_vm0, %v10713_v4  ;;  %8302 = vmatprep.mubr.msk.f32.mxu1 %vm210_vm1, %v10721_v1  ;;  %v11064_v4 = vld [vmem:[#allocation2 + $0x13a] sm:$0xff] }
 0x474   : > { %8397 = vmatprep.subr.msk.mxu1 %vm307_vm0, %v6916_v21 }
 0x476   : > { %8303 = vmatmul.mubr.msk.f32.gmra.mrb[2].mxu1 %vm210_vm1, %v10725_v3 }
 0x477   : > { %8305 = vmatprep.mubr.msk.f32.mxu1 %vm210_vm1, %v10729_v5 }
 0x47a   : > { %8306 = vmatmul.mubr.msk.f32.gmra.mrb[4].mxu1 %vm210_vm1, %v10733_v7 }
 0x47b   : > { %8308 = vmatprep.mubr.msk.f32.mxu1 %vm210_vm1, %v10737_v8 }
 0x47e   : > { %8309 = vmatmul.mubr.msk.f32.gmra.mrb[6].mxu1 %vm210_vm1, %v10741_v13 }
 0x47f   : > { %8311 = vmatprep.mubr.msk.f32.mxu1 %vm210_vm1, %v10745_v16 }
 0x482   : > { %8312 = vmatmul.mubr.msk.f32.gmra.mrb[8].mxu1 %vm210_vm1, %v10749_v17 }
 0x483   : > { %8314 = vmatprep.mubr.msk.f32.mxu1 %vm210_vm1, %v10753_v54 }
 0x486   : > { %8315 = vmatmul.mubr.msk.f32.gmra.mrb[10].mxu1 %vm210_vm1, %v10757_v18 }
 0x487   : > { %8317 = vmatprep.mubr.msk.f32.mxu1 %vm210_vm1, %v10761_v19 }
 0x48a   : > { %8318 = vmatmul.mubr.msk.f32.gmra.mrb[12].mxu1 %vm210_vm1, %v10765_v20 }
 0x48b   : > { %8320 = vmatprep.mubr.msk.f32.mxu1 %vm210_vm1, %v10769_v22 }
 0x48e   : > { %8321 = vmatmul.mubr.msk.f32.gmra.mrb[14].mxu1 %vm210_vm1, %v10773_v25 }
 0x48f   : > { %8323 = vmatprep.mubr.msk.f32.mxu1 %vm210_vm1, %v10777_v30 }
 0x492   : > { %8324 = vmatmul.mubr.msk.f32.gmra.mrb[16].mxu1 %vm210_vm1, %v10781_v32 }
 0x493   : > { %8326 = vmatprep.mubr.msk.f32.mxu1 %vm210_vm1, %v10785_v34 }
 0x496   : > { %8327 = vmatmul.mubr.msk.f32.gmra.mrb[18].mxu1 %vm210_vm1, %v10789_v36 }
 0x497   : > { %8329 = vmatprep.mubr.msk.f32.mxu1 %vm210_vm1, %v10793_v37 }
 0x49a   : > { %8330 = vmatmul.mubr.msk.f32.gmra.mrb[20].mxu1 %vm210_vm1, %v10797_v27 }
 0x49b   : > { %8332 = vmatprep.mubr.msk.f32.mxu1 %vm210_vm1, %v10801_v58 }
 0x49e   : > { %8333 = vmatmul.mubr.msk.f32.gmra.mrb[22].mxu1 %vm210_vm1, %v10805_v55 }
 0x49f   : > { %8335 = vmatprep.mubr.msk.f32.mxu1 %vm210_vm1, %v10809_v2 }
 0x4a2   : > { %8336 = vmatmul.mubr.msk.f32.gmra.mrb[24].mxu1 %vm210_vm1, %v10813_v0 }
 0x4a3   : > { %8338 = vmatprep.mubr.msk.f32.mxu1 %vm210_vm1, %v10817_v11 }
 0x4a6   : > { %8339 = vmatmul.mubr.msk.f32.gmra.mrb[26].mxu1 %vm210_vm1, %v10821_v38 }
 0x4a7   : > { %8341 = vmatprep.mubr.msk.f32.mxu1 %vm210_vm1, %v10825_v9 }
 0x4aa   : > { %8342 = vmatmul.mubr.msk.f32.gmra.mrb[28].mxu1 %vm210_vm1, %v10829_v23 }
 0x4ab   : > { %8344 = vmatprep.mubr.msk.f32.mxu1 %vm210_vm1, %v4179_v35 }
 0x4ae   : > { %8345 = vmatmul.mubr.msk.f32.gmra.mrb[30].mxu1 %vm210_vm1, %v4180_v33 }
 0x4af   : > { %8349 = vmatprep.mubr.msk.f32.mxu1 %vm210_vm1, %v10721_v1  ;;  %v11076_v1 = vld [vmem:[#allocation2 + $0x15a] sm:$0xff] }
 0x4b2   : > { %8350 = vmatmul.mubr.msk.f32.vlgmr.msra.gmra.mrb[0].mxu1 %vm210_vm1, %v10725_v3  ;;  %v11080_v3 = vld [vmem:[#allocation2 + $0x16a] sm:$0xff] }
 0x4b3   : > { %8398 = vmatpush3.msk.msra.mxu1 %vm307_vm0, %v6916_v21  ;;  %8352 = vmatprep.mubr.msk.f32.mxu1 %vm210_vm1, %v10729_v5  ;;  %v11084_v5 = vld [vmem:[#allocation2 + $0x172] sm:$0xff] }
 0x4b4   : > { %8447 = vmatprep.subr.msk.mxu1 %vm307_vm0, %v6950_v47 }
 0x4b6   : > { %8353 = vmatmul.mubr.msk.f32.gmra.mrb[2].mxu1 %vm210_vm1, %v10733_v7  ;;  %v5109_v7 = vld [vmem:[#allocation2 + $0x182] sm:$0xff] }
 0x4b7   : > { %8355 = vmatprep.mubr.msk.f32.mxu1 %vm210_vm1, %v10737_v8  ;;  %v5110_v8 = vld [vmem:[#allocation2 + $0x18a] sm:$0xff] }
 0x4ba   : > { %8356 = vmatmul.mubr.msk.f32.gmra.mrb[4].mxu1 %vm210_vm1, %v10741_v13  ;;  %v5111_v13 = vld [vmem:[#allocation2 + $0x19a] sm:$0xff] }
 0x4bb   : > { %8358 = vmatprep.mubr.msk.f32.mxu1 %vm210_vm1, %v10745_v16  ;;  %v5112_v16 = vld [vmem:[#allocation2 + $0x1a2] sm:$0xff] }
 0x4be   : > { %8359 = vmatmul.mubr.msk.f32.gmra.mrb[6].mxu1 %vm210_vm1, %v10749_v17 }
 0x4bf   : > { %8361 = vmatprep.mubr.msk.f32.mxu1 %vm210_vm1, %v10753_v54 }
 0x4c2   : > { %8362 = vmatmul.mubr.msk.f32.gmra.mrb[8].mxu1 %vm210_vm1, %v10757_v18 }
 0x4c3   : > { %8364 = vmatprep.mubr.msk.f32.mxu1 %vm210_vm1, %v10761_v19 }
 0x4c6   : > { %8365 = vmatmul.mubr.msk.f32.gmra.mrb[10].mxu1 %vm210_vm1, %v10765_v20 }
 0x4c7   : > { %8367 = vmatprep.mubr.msk.f32.mxu1 %vm210_vm1, %v10769_v22 }
 0x4ca   : > { %8368 = vmatmul.mubr.msk.f32.gmra.mrb[12].mxu1 %vm210_vm1, %v10773_v25 }
 0x4cb   : > { %8370 = vmatprep.mubr.msk.f32.mxu1 %vm210_vm1, %v10777_v30 }
 0x4ce   : > { %8371 = vmatmul.mubr.msk.f32.gmra.mrb[14].mxu1 %vm210_vm1, %v10781_v32 }
 0x4cf   : > { %8373 = vmatprep.mubr.msk.f32.mxu1 %vm210_vm1, %v10785_v34 }
 0x4d2   : > { %8374 = vmatmul.mubr.msk.f32.gmra.mrb[16].mxu1 %vm210_vm1, %v10789_v36 }
 0x4d3   : > { %8376 = vmatprep.mubr.msk.f32.mxu1 %vm210_vm1, %v10793_v37 }
 0x4d6   : > { %8377 = vmatmul.mubr.msk.f32.gmra.mrb[18].mxu1 %vm210_vm1, %v10797_v27 }
 0x4d7   : > { %8379 = vmatprep.mubr.msk.f32.mxu1 %vm210_vm1, %v10801_v58 }
 0x4da   : > { %8380 = vmatmul.mubr.msk.f32.gmra.mrb[20].mxu1 %vm210_vm1, %v10805_v55 }
 0x4db   : > { %8382 = vmatprep.mubr.msk.f32.mxu1 %vm210_vm1, %v10809_v2 }
 0x4de   : > { %8383 = vmatmul.mubr.msk.f32.gmra.mrb[22].mxu1 %vm210_vm1, %v10813_v0 }
 0x4df   : > { %8385 = vmatprep.mubr.msk.f32.mxu1 %vm210_vm1, %v10817_v11 }
 0x4e2   : > { %8386 = vmatmul.mubr.msk.f32.gmra.mrb[24].mxu1 %vm210_vm1, %v10821_v38 }
 0x4e3   : > { %8388 = vmatprep.mubr.msk.f32.mxu1 %vm210_vm1, %v10825_v9 }
 0x4e6   : > { %8389 = vmatmul.mubr.msk.f32.gmra.mrb[26].mxu1 %vm210_vm1, %v10829_v23 }
 0x4e7   : > { %8391 = vmatprep.mubr.msk.f32.mxu1 %vm210_vm1, %v4179_v35 }
 0x4ea   : > { %8392 = vmatmul.mubr.msk.f32.gmra.mrb[28].mxu1 %vm210_vm1, %v4180_v33 }
 0x4eb   : > { %8394 = vmatprep.mubr.msk.f32.mxu1 %vm210_vm1, %v4181_v45 }
 0x4ee   : > { %8395 = vmatmul.mubr.msk.f32.gmra.mrb[30].mxu1 %vm210_vm1, %v4182_v39 }
 0x4ef   : > { %8399 = vmatprep.mubr.msk.f32.mxu1 %vm210_vm1, %v5077_v62 }
 0x4f2   : > { %8400 = vmatmul.mubr.msk.f32.vlgmr.msra.gmra.mrb[0].mxu1 %vm210_vm1, %v5078_v60 }
 0x4f3   : > { %8448 = vmatpush3.msk.msra.mxu1 %vm307_vm0, %v6950_v47  ;;  %8402 = vmatprep.mubr.msk.f32.mxu1 %vm210_vm1, %v5079_v12 }
 0x4f4   : > { %8497 = vmatprep.subr.msk.mxu1 %vm307_vm0, %v10968_v14 }
 0x4f6   : > { %8403 = vmatmul.mubr.msk.f32.gmra.mrb[2].mxu1 %vm210_vm1, %v5080_v28 }
 0x4f7   : > { %8405 = vmatprep.mubr.msk.f32.mxu1 %vm210_vm1, %v10976_v26 }
 0x4fa   : > { %8406 = vmatmul.mubr.msk.f32.gmra.mrb[4].mxu1 %vm210_vm1, %v10980_v42 }
 0x4fb   : > { %8408 = vmatprep.mubr.msk.f32.mxu1 %vm210_vm1, %v10984_v40 }
 0x4fe   : > { %8409 = vmatmul.mubr.msk.f32.gmra.mrb[6].mxu1 %vm210_vm1, %v10988_v59 }
 0x4ff   : > { %8411 = vmatprep.mubr.msk.f32.mxu1 %vm210_vm1, %v10992_v56 }
 0x502   : > { %8412 = vmatmul.mubr.msk.f32.gmra.mrb[8].mxu1 %vm210_vm1, %v10996_v15 }
 0x503   : > { %8414 = vmatprep.mubr.msk.f32.mxu1 %vm210_vm1, %v11000_v10 }
 0x506   : > { %8415 = vmatmul.mubr.msk.f32.gmra.mrb[10].mxu1 %vm210_vm1, %v11004_v31 }
 0x507   : > { %8417 = vmatprep.mubr.msk.f32.mxu1 %vm210_vm1, %v11008_v41 }
 0x50a   : > { %8418 = vmatmul.mubr.msk.f32.gmra.mrb[12].mxu1 %vm210_vm1, %v11012_v43 }
 0x50b   : > { %8420 = vmatprep.mubr.msk.f32.mxu1 %vm210_vm1, %v11016_v29 }
 0x50e   : > { %8421 = vmatmul.mubr.msk.f32.gmra.mrb[14].mxu1 %vm210_vm1, %v11020_v44 }
 0x50f   : > { %8423 = vmatprep.mubr.msk.f32.mxu1 %vm210_vm1, %v11024_v48 }
 0x512   : > { %8424 = vmatmul.mubr.msk.f32.gmra.mrb[16].mxu1 %vm210_vm1, %v11028_v50 }
 0x513   : > { %8426 = vmatprep.mubr.msk.f32.mxu1 %vm210_vm1, %v11032_v49 }
 0x516   : > { %8427 = vmatmul.mubr.msk.f32.gmra.mrb[18].mxu1 %vm210_vm1, %v11036_v51 }
 0x517   : > { %8429 = vmatprep.mubr.msk.f32.mxu1 %vm210_vm1, %v11040_v46 }
 0x51a   : > { %8430 = vmatmul.mubr.msk.f32.gmra.mrb[20].mxu1 %vm210_vm1, %v11044_v52 }
 0x51b   : > { %8432 = vmatprep.mubr.msk.f32.mxu1 %vm210_vm1, %v11048_v53 }
 0x51e   : > { %8433 = vmatmul.mubr.msk.f32.gmra.mrb[22].mxu1 %vm210_vm1, %v11052_v6 }
 0x51f   : > { %8435 = vmatprep.mubr.msk.f32.mxu1 %vm210_vm1, %v11056_v57 }
 0x522   : > { %8436 = vmatmul.mubr.msk.f32.gmra.mrb[24].mxu1 %vm210_vm1, %v11060_v61 }
 0x523   : > { %8438 = vmatprep.mubr.msk.f32.mxu1 %vm210_vm1, %v11064_v4 }
 0x526   : > { %8439 = vmatmul.mubr.msk.f32.gmra.mrb[26].mxu1 %vm210_vm1, %v11068_v63 }
 0x527   : > { %8441 = vmatprep.mubr.msk.f32.mxu1 %vm210_vm1, %v11072_v24 }
 0x52a   : > { %8442 = vmatmul.mubr.msk.f32.gmra.mrb[28].mxu1 %vm210_vm1, %v11076_v1 }
 0x52b   : > { %8444 = vmatprep.mubr.msk.f32.mxu1 %vm210_vm1, %v11080_v3 }
 0x52e   : > { %8445 = vmatmul.mubr.msk.f32.gmra.mrb[30].mxu1 %vm210_vm1, %v11084_v5 }
 0x52f   : > { %8449 = vmatprep.mubr.msk.f32.mxu1 %vm210_vm1, %v5079_v12 }
 0x532   : > { %8450 = vmatmul.mubr.msk.f32.vlgmr.msra.gmra.mrb[0].mxu1 %vm210_vm1, %v5080_v28 }
 0x533   : > { %8498 = vmatpush3.msk.msra.mxu1 %vm307_vm0, %v10968_v14  ;;  %8452 = vmatprep.mubr.msk.f32.mxu1 %vm210_vm1, %v10976_v26 }
 0x536   : > { %8453 = vmatmul.mubr.msk.f32.gmra.mrb[2].mxu1 %vm210_vm1, %v10980_v42 }
 0x537   : > { %8455 = vmatprep.mubr.msk.f32.mxu1 %vm210_vm1, %v10984_v40 }
 0x53a   : > { %8456 = vmatmul.mubr.msk.f32.gmra.mrb[4].mxu1 %vm210_vm1, %v10988_v59 }
 0x53b   : > { %8458 = vmatprep.mubr.msk.f32.mxu1 %vm210_vm1, %v10992_v56 }
 0x53e   : > { %8459 = vmatmul.mubr.msk.f32.gmra.mrb[6].mxu1 %vm210_vm1, %v10996_v15 }
 0x53f   : > { %8461 = vmatprep.mubr.msk.f32.mxu1 %vm210_vm1, %v11000_v10 }
 0x542   : > { %8462 = vmatmul.mubr.msk.f32.gmra.mrb[8].mxu1 %vm210_vm1, %v11004_v31 }
 0x543   : > { %8464 = vmatprep.mubr.msk.f32.mxu1 %vm210_vm1, %v11008_v41 }
 0x546   : > { %8465 = vmatmul.mubr.msk.f32.gmra.mrb[10].mxu1 %vm210_vm1, %v11012_v43 }
 0x547   : > { %8467 = vmatprep.mubr.msk.f32.mxu1 %vm210_vm1, %v11016_v29 }
 0x54a   : > { %8468 = vmatmul.mubr.msk.f32.gmra.mrb[12].mxu1 %vm210_vm1, %v11020_v44 }
 0x54b   : > { %8470 = vmatprep.mubr.msk.f32.mxu1 %vm210_vm1, %v11024_v48 }
 0x54e   : > { %8471 = vmatmul.mubr.msk.f32.gmra.mrb[14].mxu1 %vm210_vm1, %v11028_v50 }
 0x54f   : > { %8473 = vmatprep.mubr.msk.f32.mxu1 %vm210_vm1, %v11032_v49 }
 0x552   : > { %8474 = vmatmul.mubr.msk.f32.gmra.mrb[16].mxu1 %vm210_vm1, %v11036_v51 }
 0x553   : > { %8476 = vmatprep.mubr.msk.f32.mxu1 %vm210_vm1, %v11040_v46 }
 0x556   : > { %8477 = vmatmul.mubr.msk.f32.gmra.mrb[18].mxu1 %vm210_vm1, %v11044_v52 }
 0x557   : > { %8479 = vmatprep.mubr.msk.f32.mxu1 %vm210_vm1, %v11048_v53 }
 0x55a   : > { %8480 = vmatmul.mubr.msk.f32.gmra.mrb[20].mxu1 %vm210_vm1, %v11052_v6 }
 0x55b   : > { %8482 = vmatprep.mubr.msk.f32.mxu1 %vm210_vm1, %v11056_v57 }
 0x55e   : > { %8483 = vmatmul.mubr.msk.f32.gmra.mrb[22].mxu1 %vm210_vm1, %v11060_v61 }
 0x55f   : > { %8485 = vmatprep.mubr.msk.f32.mxu1 %vm210_vm1, %v11064_v4 }
 0x562   : > { %8486 = vmatmul.mubr.msk.f32.gmra.mrb[24].mxu1 %vm210_vm1, %v11068_v63 }
 0x563   : > { %8488 = vmatprep.mubr.msk.f32.mxu1 %vm210_vm1, %v11072_v24 }
 0x566   : > { %8489 = vmatmul.mubr.msk.f32.gmra.mrb[26].mxu1 %vm210_vm1, %v11076_v1 }
 0x567   : > { %8491 = vmatprep.mubr.msk.f32.mxu1 %vm210_vm1, %v11080_v3 }
 0x56a   : > { %8492 = vmatmul.mubr.msk.f32.gmra.mrb[28].mxu1 %vm210_vm1, %v11084_v5 }
 0x56b   : > { %8494 = vmatprep.mubr.msk.f32.mxu1 %vm210_vm1, %v5109_v7 }
 0x56e   : > { %8495 = vmatmul.mubr.msk.f32.gmra.mrb[30].mxu1 %vm210_vm1, %v5110_v8 }
 0x56f   : > { %8499 = vmatprep.mubr.msk.f32.mxu1 %vm210_vm1, %v10976_v26 }
 0x572   : > { %8500 = vmatmul.mubr.msk.f32.vlgmr.msra.gmra.mrb[0].mxu1 %vm210_vm1, %v10980_v42 }
 0x573   : > { %8502 = vmatprep.mubr.msk.f32.mxu1 %vm210_vm1, %v10984_v40 }
 0x576   : > { %8503 = vmatmul.mubr.msk.f32.gmra.mrb[2].mxu1 %vm210_vm1, %v10988_v59 }
 0x577   : > { %8505 = vmatprep.mubr.msk.f32.mxu1 %vm210_vm1, %v10992_v56 }
 0x57a   : > { %8506 = vmatmul.mubr.msk.f32.gmra.mrb[4].mxu1 %vm210_vm1, %v10996_v15 }
 0x57b   : > { %8508 = vmatprep.mubr.msk.f32.mxu1 %vm210_vm1, %v11000_v10 }
 0x57e   : > { %8509 = vmatmul.mubr.msk.f32.gmra.mrb[6].mxu1 %vm210_vm1, %v11004_v31 }
 0x57f   : > { %8511 = vmatprep.mubr.msk.f32.mxu1 %vm210_vm1, %v11008_v41 }
 0x582   : > { %8512 = vmatmul.mubr.msk.f32.gmra.mrb[8].mxu1 %vm210_vm1, %v11012_v43 }
 0x583   : > { %8514 = vmatprep.mubr.msk.f32.mxu1 %vm210_vm1, %v11016_v29 }
 0x586   : > { %8515 = vmatmul.mubr.msk.f32.gmra.mrb[10].mxu1 %vm210_vm1, %v11020_v44 }
 0x587   : > { %8517 = vmatprep.mubr.msk.f32.mxu1 %vm210_vm1, %v11024_v48 }
 0x58a   : > { %8518 = vmatmul.mubr.msk.f32.gmra.mrb[12].mxu1 %vm210_vm1, %v11028_v50 }
 0x58b   : > { %8520 = vmatprep.mubr.msk.f32.mxu1 %vm210_vm1, %v11032_v49 }
 0x58e   : > { %8521 = vmatmul.mubr.msk.f32.gmra.mrb[14].mxu1 %vm210_vm1, %v11036_v51 }
 0x58f   : > { %8523 = vmatprep.mubr.msk.f32.mxu1 %vm210_vm1, %v11040_v46 }
 0x592   : > { %8524 = vmatmul.mubr.msk.f32.gmra.mrb[16].mxu1 %vm210_vm1, %v11044_v52 }
 0x593   : > { %8526 = vmatprep.mubr.msk.f32.mxu1 %vm210_vm1, %v11048_v53 }
 0x596   : > { %8527 = vmatmul.mubr.msk.f32.gmra.mrb[18].mxu1 %vm210_vm1, %v11052_v6 }
 0x597   : > { %8529 = vmatprep.mubr.msk.f32.mxu1 %vm210_vm1, %v11056_v57 }
 0x59a   : > { %8530 = vmatmul.mubr.msk.f32.gmra.mrb[20].mxu1 %vm210_vm1, %v11060_v61 }
 0x59b   : > { %8532 = vmatprep.mubr.msk.f32.mxu1 %vm210_vm1, %v11064_v4 }
 0x59e   : > { %8533 = vmatmul.mubr.msk.f32.gmra.mrb[22].mxu1 %vm210_vm1, %v11068_v63 }
 0x59f   : > { %8535 = vmatprep.mubr.msk.f32.mxu1 %vm210_vm1, %v11072_v24 }
 0x5a2   : > { %8536 = vmatmul.mubr.msk.f32.gmra.mrb[24].mxu1 %vm210_vm1, %v11076_v1 }
 0x5a3   : > { %8538 = vmatprep.mubr.msk.f32.mxu1 %vm210_vm1, %v11080_v3 }
 0x5a6   : > { %8539 = vmatmul.mubr.msk.f32.gmra.mrb[26].mxu1 %vm210_vm1, %v11084_v5 }
 0x5a7   : > { %8541 = vmatprep.mubr.msk.f32.mxu1 %vm210_vm1, %v5109_v7 }
 0x5aa   : > { %8542 = vmatmul.mubr.msk.f32.gmra.mrb[28].mxu1 %vm210_vm1, %v5110_v8 }
 0x5ab   : > { %8544 = vmatprep.mubr.msk.f32.mxu1 %vm210_vm1, %v5111_v13 }
 0x5ae   : > { %8545 = vmatmul.mubr.msk.f32.gmra.mrb[30].mxu1 %vm210_vm1, %v5112_v16 }
 0x645   : > { %v11210_v17 = vpop.f32.mrb[0].mxu1 }
 0x646   : > { %v6008_v54 = vsel %vm210_vm1, %v11210_v17, 0.0  ;;  %v6077_v18 = vmul.f32 %v11210_v17, %v11210_v17  ;;  %v11216_v19 = vpop.f32.mrb[1].mxu1 }
 0x647   : > { %v6007_v20 = vsel %vm210_vm1, %v11216_v19, 0.0  ;;  %v6076_v22 = vmul.f32 %v11216_v19, %v11216_v19 }
 0x648   : > { %v6109_v25 = vsel %vm210_vm1, %v6077_v18, 0.0  ;;  %v6009_v30 = vadd.f32 %v6008_v54, %v6007_v20 }
 0x649   : > { %v6108_v32 = vsel %vm210_vm1, %v6076_v22, 0.0  ;;  %v11224_v34 = vpop.f32.mrb[2].mxu1 }
 0x64a   : > { %v6110_v36 = vadd.f32 %v6109_v25, %v6108_v32  ;;  %v11226_v37 = vpop.f32.mrb[3].mxu1  ;;  %v6079_v27 = vmul.f32 %v11224_v34, %v11224_v34  ;;  %v6012_v0 = vsel %vm210_vm1, %v11224_v34, 0.0 }
 0x64b   : > { %v6010_v58 = vsel %vm210_vm1, %v11226_v37, 0.0  ;;  %v6078_v55 = vmul.f32 %v11226_v37, %v11226_v37 }
 0x64c   : > { %v6011_v2 = vadd.f32 %v6010_v58, %v6009_v30  ;;  %v6113_v35 = vsel %vm210_vm1, %v6079_v27, 0.0 }
 0x64d   : > { %v6111_v11 = vsel %vm210_vm1, %v6078_v55, 0.0  ;;  %v11237_v38 = vpop.f32.mrb[4].mxu1 }
 0x64e   : > { %v6112_v9 = vadd.f32 %v6111_v11, %v6110_v36  ;;  %v11239_v23 = vpop.f32.mrb[5].mxu1  ;;  %v6013_v21 = vadd.f32 %v6012_v0, %v6011_v2  ;;  %v6081_v33 = vmul.f32 %v11237_v38, %v11237_v38  ;;  %v6016_v60 = vsel %vm210_vm1, %v11237_v38, 0.0 }
 0x64f   : > { %v6014_v47 = vsel %vm210_vm1, %v11239_v23, 0.0  ;;  %v6080_v45 = vmul.f32 %v11239_v23, %v11239_v23 }
 0x650   : > { %v6015_v39 = vadd.f32 %v6014_v47, %v6013_v21  ;;  %v6114_v62 = vadd.f32 %v6113_v35, %v6112_v9  ;;  %v6117_v40 = vsel %vm210_vm1, %v6081_v33, 0.0 }
 0x651   : > { %v6115_v14 = vsel %vm210_vm1, %v6080_v45, 0.0  ;;  %v11251_v12 = vpop.f32.mrb[6].mxu1 }
 0x652   : > { %v6116_v28 = vadd.f32 %v6115_v14, %v6114_v62  ;;  %v11253_v26 = vpop.f32.mrb[7].mxu1  ;;  %v6017_v42 = vadd.f32 %v6016_v60, %v6015_v39  ;;  %v6083_v59 = vmul.f32 %v11251_v12, %v11251_v12  ;;  %v6020_v41 = vsel %vm210_vm1, %v11251_v12, 0.0 }
 0x653   : > { %v6018_v56 = vsel %vm210_vm1, %v11253_v26, 0.0  ;;  %v6082_v15 = vmul.f32 %v11253_v26, %v11253_v26 }
 0x654   : > { %v6019_v10 = vadd.f32 %v6018_v56, %v6017_v42  ;;  %v6118_v31 = vadd.f32 %v6117_v40, %v6116_v28  ;;  %v6121_v49 = vsel %vm210_vm1, %v6083_v59, 0.0 }
 0x655   : > { %v6119_v43 = vsel %vm210_vm1, %v6082_v15, 0.0  ;;  %v11265_v29 = vpop.f32.mrb[8].mxu1 }
 0x656   : > { %v6120_v44 = vadd.f32 %v6119_v43, %v6118_v31  ;;  %v11267_v48 = vpop.f32.mrb[9].mxu1  ;;  %v6021_v50 = vadd.f32 %v6020_v41, %v6019_v10  ;;  %v6085_v51 = vmul.f32 %v11265_v29, %v11265_v29  ;;  %v6024_v57 = vsel %vm210_vm1, %v11265_v29, 0.0 }
 0x657   : > { %v6022_v46 = vsel %vm210_vm1, %v11267_v48, 0.0  ;;  %v6084_v52 = vmul.f32 %v11267_v48, %v11267_v48 }
 0x658   : > { %v6023_v53 = vadd.f32 %v6022_v46, %v6021_v50  ;;  %v6122_v6 = vadd.f32 %v6121_v49, %v6120_v44  ;;  %v6125_v3 = vsel %vm210_vm1, %v6085_v51, 0.0 }
 0x659   : > { %v6123_v61 = vsel %vm210_vm1, %v6084_v52, 0.0  ;;  %v11279_v4 = vpop.f32.mrb[10].mxu1 }
 0x65a   : > { %v6124_v63 = vadd.f32 %v6123_v61, %v6122_v6  ;;  %v11281_v24 = vpop.f32.mrb[11].mxu1  ;;  %v6025_v1 = vadd.f32 %v6024_v57, %v6023_v53  ;;  %v6087_v5 = vmul.f32 %v11279_v4, %v11279_v4  ;;  %v6028_v54 = vsel %vm210_vm1, %v11279_v4, 0.0 }
 0x65b   : > { %v6026_v7 = vsel %vm210_vm1, %v11281_v24, 0.0  ;;  %v6086_v8 = vmul.f32 %v11281_v24, %v11281_v24 }
 0x65c   : > { %v6027_v13 = vadd.f32 %v6026_v7, %v6025_v1  ;;  %v6126_v16 = vadd.f32 %v6125_v3, %v6124_v63  ;;  %v6129_v32 = vsel %vm210_vm1, %v6087_v5, 0.0 }
 0x65d   : > { %v6127_v18 = vsel %vm210_vm1, %v6086_v8, 0.0  ;;  %v11293_v20 = vpop.f32.mrb[12].mxu1 }
 0x65e   : > { %v6128_v22 = vadd.f32 %v6127_v18, %v6126_v16  ;;  %v11295_v25 = vpop.f32.mrb[13].mxu1  ;;  %v6029_v30 = vadd.f32 %v6028_v54, %v6027_v13  ;;  %v6089_v36 = vmul.f32 %v11293_v20, %v11293_v20  ;;  %v6032_v0 = vsel %vm210_vm1, %v11293_v20, 0.0 }
 0x65f   : > { %v6030_v27 = vsel %vm210_vm1, %v11295_v25, 0.0  ;;  %v6088_v58 = vmul.f32 %v11295_v25, %v11295_v25 }
 0x660   : > { %v6031_v55 = vadd.f32 %v6030_v27, %v6029_v30  ;;  %v6130_v2 = vadd.f32 %v6129_v32, %v6128_v22  ;;  %v6133_v47 = vsel %vm210_vm1, %v6089_v36, 0.0 }
 0x661   : > { %v6131_v11 = vsel %vm210_vm1, %v6088_v58, 0.0  ;;  %v11307_v9 = vpop.f32.mrb[14].mxu1 }
 0x662   : > { %v6132_v21 = vadd.f32 %v6131_v11, %v6130_v2  ;;  %v11309_v35 = vpop.f32.mrb[15].mxu1  ;;  %v6033_v33 = vadd.f32 %v6032_v0, %v6031_v55  ;;  %v6091_v45 = vmul.f32 %v11307_v9, %v11307_v9  ;;  %v6036_v28 = vsel %vm210_vm1, %v11307_v9, 0.0 }
 0x663   : > { %v6034_v39 = vsel %vm210_vm1, %v11309_v35, 0.0  ;;  %v6090_v62 = vmul.f32 %v11309_v35, %v11309_v35 }
 0x664   : > { %v6035_v60 = vadd.f32 %v6034_v39, %v6033_v33  ;;  %v6134_v14 = vadd.f32 %v6133_v47, %v6132_v21  ;;  %v6137_v10 = vsel %vm210_vm1, %v6091_v45, 0.0 }
 0x665   : > { %v6135_v42 = vsel %vm210_vm1, %v6090_v62, 0.0  ;;  %v11321_v40 = vpop.f32.mrb[16].mxu1 }
 0x666   : > { %v6136_v59 = vadd.f32 %v6135_v42, %v6134_v14  ;;  %v11323_v56 = vpop.f32.mrb[17].mxu1  ;;  %v6037_v15 = vadd.f32 %v6036_v28, %v6035_v60  ;;  %v6093_v31 = vmul.f32 %v11321_v40, %v11321_v40  ;;  %v6040_v49 = vsel %vm210_vm1, %v11321_v40, 0.0 }
 0x667   : > { %v6038_v41 = vsel %vm210_vm1, %v11323_v56, 0.0  ;;  %v6092_v43 = vmul.f32 %v11323_v56, %v11323_v56 }
 0x668   : > { %v6039_v44 = vadd.f32 %v6038_v41, %v6037_v15  ;;  %v6138_v50 = vadd.f32 %v6137_v10, %v6136_v59  ;;  %v6141_v57 = vsel %vm210_vm1, %v6093_v31, 0.0 }
 0x669   : > { %v6139_v51 = vsel %vm210_vm1, %v6092_v43, 0.0  ;;  %v11335_v46 = vpop.f32.mrb[18].mxu1 }
 0x66a   : > { %v6140_v52 = vadd.f32 %v6139_v51, %v6138_v50  ;;  %v11337_v53 = vpop.f32.mrb[19].mxu1  ;;  %v6041_v6 = vadd.f32 %v6040_v49, %v6039_v44  ;;  %v6095_v61 = vmul.f32 %v11335_v46, %v11335_v46  ;;  %v6044_v7 = vsel %vm210_vm1, %v11335_v46, 0.0 }
 0x66b   : > { %v6042_v63 = vsel %vm210_vm1, %v11337_v53, 0.0  ;;  %v6094_v1 = vmul.f32 %v11337_v53, %v11337_v53 }
 0x66c   : > { %v6043_v3 = vadd.f32 %v6042_v63, %v6041_v6  ;;  %v6142_v5 = vadd.f32 %v6141_v57, %v6140_v52  ;;  %v6145_v22 = vsel %vm210_vm1, %v6095_v61, 0.0 }
 0x66d   : > { %v6143_v8 = vsel %vm210_vm1, %v6094_v1, 0.0  ;;  %v11349_v13 = vpop.f32.mrb[20].mxu1 }
 0x66e   : > { %v6144_v16 = vadd.f32 %v6143_v8, %v6142_v5  ;;  %v11351_v54 = vpop.f32.mrb[21].mxu1  ;;  %v6045_v18 = vadd.f32 %v6044_v7, %v6043_v3  ;;  %v6097_v30 = vmul.f32 %v11349_v13, %v11349_v13  ;;  %v6048_v55 = vsel %vm210_vm1, %v11349_v13, 0.0 }
 0x66f   : > { %v6046_v32 = vsel %vm210_vm1, %v11351_v54, 0.0  ;;  %v6096_v36 = vmul.f32 %v11351_v54, %v11351_v54 }
 0x670   : > { %v6047_v27 = vadd.f32 %v6046_v32, %v6045_v18  ;;  %v6146_v58 = vadd.f32 %v6145_v22, %v6144_v16  ;;  %v6149_v47 = vsel %vm210_vm1, %v6097_v30, 0.0 }
 0x671   : > { %v6147_v2 = vsel %vm210_vm1, %v6096_v36, 0.0  ;;  %v11363_v0 = vpop.f32.mrb[22].mxu1 }
 0x672   : > { %v6148_v11 = vadd.f32 %v6147_v2, %v6146_v58  ;;  %v11365_v21 = vpop.f32.mrb[23].mxu1  ;;  %v6049_v33 = vadd.f32 %v6048_v55, %v6047_v27  ;;  %v6099_v45 = vmul.f32 %v11363_v0, %v11363_v0  ;;  %v6052_v28 = vsel %vm210_vm1, %v11363_v0, 0.0 }
 0x673   : > { %v6050_v39 = vsel %vm210_vm1, %v11365_v21, 0.0  ;;  %v6098_v62 = vmul.f32 %v11365_v21, %v11365_v21 }
 0x674   : > { %v6051_v60 = vadd.f32 %v6050_v39, %v6049_v33  ;;  %v6150_v14 = vadd.f32 %v6149_v47, %v6148_v11  ;;  %v6153_v41 = vsel %vm210_vm1, %v6099_v45, 0.0 }
 0x675   : > { %v6151_v42 = vsel %vm210_vm1, %v6098_v62, 0.0  ;;  %v11377_v59 = vpop.f32.mrb[24].mxu1 }
 0x676   : > { %v6152_v15 = vadd.f32 %v6151_v42, %v6150_v14  ;;  %v11379_v10 = vpop.f32.mrb[25].mxu1  ;;  %v6053_v31 = vadd.f32 %v6052_v28, %v6051_v60  ;;  %v6101_v43 = vmul.f32 %v11377_v59, %v11377_v59  ;;  %v6056_v52 = vsel %vm210_vm1, %v11377_v59, 0.0 }
 0x677   : > { %v6054_v44 = vsel %vm210_vm1, %v11379_v10, 0.0  ;;  %v6100_v50 = vmul.f32 %v11379_v10, %v11379_v10 }
 0x678   : > { %v6055_v49 = vadd.f32 %v6054_v44, %v6053_v31  ;;  %v6154_v51 = vadd.f32 %v6153_v41, %v6152_v15  ;;  %v6157_v3 = vsel %vm210_vm1, %v6101_v43, 0.0 }
 0x679   : > { %v6155_v6 = vsel %vm210_vm1, %v6100_v50, 0.0  ;;  %v11391_v57 = vpop.f32.mrb[26].mxu1 }
 0x67a   : > { %v6156_v61 = vadd.f32 %v6155_v6, %v6154_v51  ;;  %v11393_v63 = vpop.f32.mrb[27].mxu1  ;;  %v6057_v1 = vadd.f32 %v6056_v52, %v6055_v49  ;;  %v6103_v5 = vmul.f32 %v11391_v57, %v11391_v57  ;;  %v6060_v22 = vsel %vm210_vm1, %v11391_v57, 0.0 }
 0x67b   : > { %v6058_v7 = vsel %vm210_vm1, %v11393_v63, 0.0  ;;  %v6102_v8 = vmul.f32 %v11393_v63, %v11393_v63 }
 0x67c   : > { %v6059_v16 = vadd.f32 %v6058_v7, %v6057_v1  ;;  %v6158_v18 = vadd.f32 %v6157_v3, %v6156_v61  ;;  %v6161_v55 = vsel %vm210_vm1, %v6103_v5, 0.0 }
 0x67d   : > { %v6159_v30 = vsel %vm210_vm1, %v6102_v8, 0.0  ;;  %v11405_v32 = vpop.f32.mrb[28].mxu1 }
 0x67e   : > { %v6160_v36 = vadd.f32 %v6159_v30, %v6158_v18  ;;  %v11407_v27 = vpop.f32.mrb[29].mxu1  ;;  %v6061_v58 = vadd.f32 %v6060_v22, %v6059_v16  ;;  %v6105_v2 = vmul.f32 %v11405_v32, %v11405_v32  ;;  %v6064_v39 = vsel %vm210_vm1, %v11405_v32, 0.0 }
 0x67f   : > { %v6062_v11 = vsel %vm210_vm1, %v11407_v27, 0.0  ;;  %v6104_v33 = vmul.f32 %v11407_v27, %v11407_v27 }
 0x680   : > { %v6063_v47 = vadd.f32 %v6062_v11, %v6061_v58  ;;  %v6162_v45 = vadd.f32 %v6161_v55, %v6160_v36  ;;  %v6165_v15 = vsel %vm210_vm1, %v6105_v2, 0.0 }
 0x681   : > { %v6163_v62 = vsel %vm210_vm1, %v6104_v33, 0.0  ;;  %v11419_v60 = vpop.f32.mrb[30].mxu1 }
 0x682   : > { %v6164_v14 = vadd.f32 %v6163_v62, %v6162_v45  ;;  %v11421_v28 = vpop.f32.mrb[31].mxu1  ;;  %v6065_v42 = vadd.f32 %v6064_v39, %v6063_v47  ;;  %v6107_v31 = vmul.f32 %v11419_v60, %v11419_v60  ;;  %v6068_v49 = vsel %vm210_vm1, %v11419_v60, 0.0 }
 0x683   : > { %v6066_v41 = vsel %vm210_vm1, %v11421_v28, 0.0  ;;  %v6106_v43 = vmul.f32 %v11421_v28, %v11421_v28 }
 0x684   : > { %v6067_v44 = vadd.f32 %v6066_v41, %v6065_v42  ;;  %v6166_v50 = vadd.f32 %v6165_v15, %v6164_v14  ;;  %v6169_v61 = vsel %vm210_vm1, %v6107_v31, 0.0 }
 0x685   : > { %v6167_v51 = vsel %vm210_vm1, %v6106_v43, 0.0 }
 0x686   : > { %v6069_v52 = vadd.f32 %v6068_v49, %v6067_v44  ;;  %v6168_v6 = vadd.f32 %v6167_v51, %v6166_v50 }
 0x688   : > { %v6070_v1 = vrot.slane %v6069_v52, 4  ;;  %v6170_v3 = vadd.f32 %v6169_v61, %v6168_v6 }
 0x68a   : > { %v6071_v5 = vadd.f32 %v6070_v1, %v6069_v52  ;;  %v6171_v7 = vrot.slane %v6170_v3, 4 }
 0x68c   : > { %v6072_v8 = vrot.slane %v6071_v5, 2  ;;  %v6172_v16 = vadd.f32 %v6171_v7, %v6170_v3 }
 0x68e   : > { %v6073_v18 = vadd.f32 %v6072_v8, %v6071_v5  ;;  %v6173_v22 = vrot.slane %v6172_v16, 2  ;;  %v7018_v8 = vld [vmem:[%s9123_s21 + $0x19] sm:$0xff] }
 0x690   : > { %v6074_v30 = vrot.slane %v6073_v18, 1  ;;  %v6174_v36 = vadd.f32 %v6173_v22, %v6172_v16  ;;  %v7019_v16 = vld [vmem:[%s9123_s21 + $0x21] sm:$0xff]  ;;  %v7021_v22 = vld [vmem:[%s9123_s21 + $0x39] sm:$0xff] }
 0x692   : > { %v6075_v58 = vadd.f32 %v6074_v30, %v6073_v18  ;;  %v6175_v55 = vrot.slane %v6174_v36, 1  ;;  %v7020_v18 = vld [vmem:[%s9123_s21 + $0x31] sm:$0xff] }
 0x694   : > { %v6176_v2 = vadd.f32 %v6175_v55, %v6174_v36  ;;  %v11434_v11 = vmul.f32 0.00390625, %v6075_v58 }
 0x696   : > { %v6178_v33 = vmul.f32 0.00390625, %v6176_v2  ;;  %v6179_v47 = vmul.f32 %v11434_v11, %v11434_v11  ;;  %v6182_v45 = vsub.f32 %v11216_v19, %v11434_v11  ;;  %v6183_v39 = vsub.f32 %v11210_v17, %v11434_v11  ;;  %v7022_v2 = vld [vmem:[%s9123_s21 + $0x49] sm:$0xff] }
 0x697   : > { %v6184_v62 = vsub.f32 %v11226_v37, %v11434_v11  ;;  %v6185_v14 = vsub.f32 %v11224_v34, %v11434_v11  ;;  %v6186_v42 = vsub.f32 %v11239_v23, %v11434_v11  ;;  %v6187_v15 = vsub.f32 %v11237_v38, %v11434_v11 }
 0x698   : > { %v6180_v31 = vsub.f32 %v6178_v33, %v6179_v47  ;;  %v6188_v41 = vsub.f32 %v11253_v26, %v11434_v11  ;;  %v6189_v19 = vsub.f32 %v11251_v12, %v11434_v11  ;;  %v6190_v17 = vsub.f32 %v11267_v48, %v11434_v11  ;;  %v7024_v33 = vld [vmem:[%s9123_s21 + $0x61] sm:$0xff]  ;;  %v7025_v47 = vld [vmem:[%s9123_s21 + $0x69] sm:$0xff] }
 0x699   : > { %v6191_v37 = vsub.f32 %v11265_v29, %v11434_v11  ;;  %v6192_v34 = vsub.f32 %v11281_v24, %v11434_v11  ;;  %v6193_v23 = vsub.f32 %v11279_v4, %v11434_v11  ;;  %v6194_v38 = vsub.f32 %v11295_v25, %v11434_v11 }
 0x69a   : > { %v6181_v43 = vmax.f32 %v6180_v31, 0.0  ;;  %v6195_v26 = vsub.f32 %v11293_v20, %v11434_v11  ;;  %v6196_v12 = vsub.f32 %v11309_v35, %v11434_v11  ;;  %v6197_v48 = vsub.f32 %v11307_v9, %v11434_v11  ;;  %v7028_v31 = vld [vmem:[%s9123_s21 + $0x91] sm:$0xff] }
 0x69b   : > { %v6198_v29 = vsub.f32 %v11323_v56, %v11434_v11  ;;  %v6199_v24 = vsub.f32 %v11321_v40, %v11434_v11  ;;  %v6200_v4 = vsub.f32 %v11337_v53, %v11434_v11  ;;  %v6201_v25 = vsub.f32 %v11335_v46, %v11434_v11 }
 0x69c   : > { %v6202_v20 = vsub.f32 %v11351_v54, %v11434_v11  ;;  %v6203_v35 = vsub.f32 %v11349_v13, %v11434_v11  ;;  %v6204_v9 = vsub.f32 %v11365_v21, %v11434_v11  ;;  %v6205_v56 = vsub.f32 %v11363_v0, %v11434_v11 }
 0x69d   : > { %v6206_v40 = vsub.f32 %v11379_v10, %v11434_v11  ;;  %v6207_v53 = vsub.f32 %v11377_v59, %v11434_v11  ;;  %v6208_v46 = vsub.f32 %v11393_v63, %v11434_v11  ;;  %v6209_v54 = vsub.f32 %v11391_v57, %v11434_v11 }
 0x69e   : > { %v6210_v13 = vsub.f32 %v11407_v27, %v11434_v11  ;;  %v6211_v21 = vsub.f32 %v11405_v32, %v11434_v11  ;;  %v6212_v0 = vsub.f32 %v11421_v28, %v11434_v11  ;;  %v6213_v10 = vsub.f32 %v11419_v60, %v11434_v11  ;;  %v7023_v11 = vld [vmem:[%s9123_s21 + $0x51] sm:$0xff] }
 0x69f   : > { %v6214_v44 = vadd.f32 1e-05, %v6181_v43 }
 0x6a1   : > { %9070 = vrsqrt.f32 %v6214_v44 }
 0x6ab   : > { %v9071_v59 = vpop.eup %9070 }
 0x6ac   : > { %v6216_v50 = vmul.f32 %v9071_v59, %v6182_v45  ;;  %v6217_v63 = vmul.f32 %v9071_v59, %v6183_v39  ;;  %v6218_v57 = vmul.f32 %v9071_v59, %v6184_v62  ;;  %v6219_v49 = vmul.f32 %v9071_v59, %v6185_v14 }
 0x6ad   : > { %v6220_v27 = vmul.f32 %v9071_v59, %v6186_v42  ;;  %v6221_v32 = vmul.f32 %v9071_v59, %v6187_v15  ;;  %v6222_v51 = vmul.f32 %v9071_v59, %v6188_v41  ;;  %v6223_v52 = vmul.f32 %v9071_v59, %v6189_v19  ;;  %v7026_v42 = vld [vmem:[%s9123_s21 + $0x79] sm:$0xff]  ;;  %v7027_v15 = vld [vmem:[%s9123_s21 + $0x81] sm:$0xff] }
 0x6ae   : > { %v6224_v28 = vmul.f32 %v9071_v59, %v6190_v17  ;;  %v6225_v6 = vmul.f32 %v9071_v59, %v6191_v37  ;;  %v6226_v60 = vmul.f32 %v9071_v59, %v6192_v34  ;;  %v6227_v61 = vmul.f32 %v9071_v59, %v6193_v23  ;;  %v7029_v34 = vld [vmem:[%s9123_s21 + $0x99] sm:$0xff]  ;;  %v7030_v23 = vld [vmem:[%s9123_s21 + $0xa9] sm:$0xff] }
 0x6af   : > { %v11502_v1 = vmul.f32 %v9071_v59, %v6194_v38  ;;  %v11504_v3 = vmul.f32 %v9071_v59, %v6195_v26  ;;  %v11506_v5 = vmul.f32 %v9071_v59, %v6196_v12  ;;  %v11508_v7 = vmul.f32 %v9071_v59, %v6197_v48  ;;  %v7031_v38 = vld [vmem:[%s9123_s21 + $0xb1] sm:$0xff] }
 0x6b0   : > { %v11515_v30 = vmul.f32 %v9071_v59, %v6198_v29  ;;  %v11517_v36 = vmul.f32 %v9071_v59, %v6199_v24  ;;  %v11519_v58 = vmul.f32 %v9071_v59, %v6200_v4  ;;  %v11521_v55 = vmul.f32 %v9071_v59, %v6201_v25  ;;  %v7032_v29 = vld [vmem:[%s9123_s21 + $0xc1] sm:$0xff]  ;;  %v7033_v24 = vld [vmem:[%s9123_s21 + $0xc9] sm:$0xff]  ;;  %v7034_v4 = vld [vmem:[%s9123_s21 + $0xd9] sm:$0xff] }
 0x6b1   : > { %v11527_v45 = vmul.f32 %v9071_v59, %v6202_v20  ;;  %v11529_v39 = vmul.f32 %v9071_v59, %v6203_v35  ;;  %v11531_v62 = vmul.f32 %v9071_v59, %v6204_v9  ;;  %v11533_v14 = vmul.f32 %v9071_v59, %v6205_v56  ;;  %v7035_v25 = vld [vmem:[%s9123_s21 + $0xe1] sm:$0xff]  ;;  %v7036_v20 = vld [vmem:[%s9123_s21 + $0xf1] sm:$0xff]  ;;  %v7037_v35 = vld [vmem:[%s9123_s21 + $0xf9] sm:$0xff] }
 0x6b2   : > { %v11538_v41 = vmul.f32 %v9071_v59, %v6206_v40  ;;  %v11540_v19 = vmul.f32 %v9071_v59, %v6207_v53  ;;  %v11542_v17 = vmul.f32 %v9071_v59, %v6208_v46  ;;  %v11544_v37 = vmul.f32 %v9071_v59, %v6209_v54  ;;  %v7038_v46 = vld [vmem:[%s9123_s21 + $0x109] sm:$0xff]  ;;  %v7039_v54 = vld [vmem:[%s9123_s21 + $0x111] sm:$0xff] }
 0x6b3   : > { %v11554_v43 = vmul.f32 %v9071_v59, %v6210_v13  ;;  %v11556_v26 = vmul.f32 %v9071_v59, %v6211_v21  ;;  %v11558_v12 = vmul.f32 %v9071_v59, %v6212_v0  ;;  %v11560_v48 = vmul.f32 %v9071_v59, %v6213_v10  ;;  %v7040_v13 = vld [vmem:[%s9123_s21 + $0x121] sm:$0xff]  ;;  %v7041_v59 = vld [vmem:[%s9123_s21 + $0x129] sm:$0xff] }
 0x6b4   : > { %v6281_v9 = vadd.f32 %v7018_v8, %v6216_v50  ;;  %v6282_v56 = vadd.f32 %v7019_v16, %v6217_v63  ;;  %v6283_v40 = vadd.f32 %v7020_v18, %v6218_v57  ;;  %v6284_v53 = vadd.f32 %v7021_v22, %v6219_v49  ;;  %v7043_v50 = vld [vmem:[%s9123_s21 + $0x141] sm:$0xff] }
 0x6b5   : > { %11671 = vst [vmem:[#allocation3_spill] sm:$0xff] %v11560_v48  ;;  %v6285_v21 = vadd.f32 %v7022_v2, %v6220_v27  ;;  %v6286_v0 = vadd.f32 %v7023_v11, %v6221_v32  ;;  %v6287_v10 = vadd.f32 %v7024_v33, %v6222_v51  ;;  %v6288_v44 = vadd.f32 %v7025_v47, %v6223_v52  ;;  %v7042_v48 = vld [vmem:[%s9123_s21 + $0x139] sm:$0xff]  ;;  %v7044_v27 = vld [vmem:[%s9123_s21 + $0x151] sm:$0xff]  ;;  %v7046_v51 = vld [vmem:[%s9123_s21 + $0x169] sm:$0xff] }
 0x6b6   : > { %v6289_v63 = vadd.f32 %v7026_v42, %v6224_v28  ;;  %v6290_v57 = vadd.f32 %v7027_v15, %v6225_v6  ;;  %v6291_v49 = vadd.f32 %v7028_v31, %v6226_v60  ;;  %v6292_v8 = vadd.f32 %v7029_v34, %v6227_v61  ;;  %6313 = vst.msk [vmem:[%s11552_s5] sm:$0xff] %vm210_vm1, %v6281_v9  ;;  %v7045_v32 = vld [vmem:[%s9123_s21 + $0x159] sm:$0xff]  ;;  %v7047_v61 = vld [vmem:[%s9123_s21 + $0x171] sm:$0xff] }
 0x6b7   : > { %6314 = vst.msk [vmem:[%s11552_s5 + $0x8] sm:$0xff] %vm210_vm1, %v6282_v56  ;;  %6315 = vst.msk [vmem:[%s11552_s5 + $0x10] sm:$0xff] %vm210_vm1, %v6283_v40  ;;  %v6293_v52 = vadd.f32 %v7030_v23, %v11502_v1  ;;  %v6294_v28 = vadd.f32 %v7031_v38, %v11504_v3  ;;  %v6295_v6 = vadd.f32 %v7032_v29, %v11506_v5  ;;  %v7048_v1 = vld [vmem:[%s9123_s21 + $0x181] sm:$0xff]  ;;  %v7049_v3 = vld [vmem:[%s9123_s21 + $0x189] sm:$0xff] }
 0x6b8   : > { %6316 = vst.msk [vmem:[%s11552_s5 + $0x18] sm:$0xff] %vm210_vm1, %v6284_v53  ;;  %v6296_v60 = vadd.f32 %v7033_v24, %v11508_v7  ;;  %6317 = vst.msk [vmem:[%s11552_s5 + $0x20] sm:$0xff] %vm210_vm1, %v6285_v21  ;;  %v6297_v5 = vadd.f32 %v7034_v4, %v11515_v30  ;;  %v6298_v16 = vadd.f32 %v7035_v25, %v11517_v36 }
 0x6b9   : > { %6318 = vst.msk [vmem:[%s11552_s5 + $0x28] sm:$0xff] %vm210_vm1, %v6286_v0  ;;  %6319 = vst.msk [vmem:[%s11552_s5 + $0x30] sm:$0xff] %vm210_vm1, %v6287_v10  ;;  %v6299_v7 = vadd.f32 %v7036_v20, %v11519_v58  ;;  %v6300_v18 = vadd.f32 %v7037_v35, %v11521_v55  ;;  %v6301_v22 = vadd.f32 %v7038_v46, %v11527_v45 }
 0x6ba   : > { %6320 = vst.msk [vmem:[%s11552_s5 + $0x38] sm:$0xff] %vm210_vm1, %v6288_v44  ;;  %6321 = vst.msk [vmem:[%s11552_s5 + $0x40] sm:$0xff] %vm210_vm1, %v6289_v63  ;;  %v6302_v30 = vadd.f32 %v7039_v54, %v11529_v39  ;;  %v6303_v36 = vadd.f32 %v7040_v13, %v11531_v62  ;;  %v6304_v58 = vadd.f32 %v7041_v59, %v11533_v14 }
 0x6bb   : > { %6322 = vst.msk [vmem:[%s11552_s5 + $0x48] sm:$0xff] %vm210_vm1, %v6290_v57  ;;  %6323 = vst.msk [vmem:[%s11552_s5 + $0x50] sm:$0xff] %vm210_vm1, %v6291_v49  ;;  %v6305_v55 = vadd.f32 %v7042_v48, %v11538_v41  ;;  %v6306_v2 = vadd.f32 %v7043_v50, %v11540_v19  ;;  %v6307_v11 = vadd.f32 %v7044_v27, %v11542_v17 }
 0x6bc   : > { %6324 = vst.msk [vmem:[%s11552_s5 + $0x58] sm:$0xff] %vm210_vm1, %v6292_v8  ;;  %6325 = vst.msk [vmem:[%s11552_s5 + $0x60] sm:$0xff] %vm210_vm1, %v6293_v52  ;;  %v6308_v33 = vadd.f32 %v7045_v32, %v11544_v37  ;;  %v6309_v47 = vadd.f32 %v7046_v51, %v11554_v43  ;;  %v6310_v45 = vadd.f32 %v7047_v61, %v11556_v26  ;;  %v11672_v62 = vld [vmem:[#allocation3_spill] sm:$0xff] }
 0x6bd   : > { %6326 = vst.msk [vmem:[%s11552_s5 + $0x68] sm:$0xff] %vm210_vm1, %v6294_v28  ;;  %6327 = vst.msk [vmem:[%s11552_s5 + $0x70] sm:$0xff] %vm210_vm1, %v6295_v6  ;;  %v6311_v39 = vadd.f32 %v7048_v1, %v11558_v12  ;;  %v6312_v14 = vadd.f32 %v7049_v3, %v11672_v62 }
 0x6be   : > { %6328 = vst.msk [vmem:[%s11552_s5 + $0x78] sm:$0xff] %vm210_vm1, %v6296_v60  ;;  %6329 = vst.msk [vmem:[%s11552_s5 + $0x80] sm:$0xff] %vm210_vm1, %v6297_v5 }
 0x6bf   : > { %6330 = vst.msk [vmem:[%s11552_s5 + $0x88] sm:$0xff] %vm210_vm1, %v6298_v16  ;;  %6331 = vst.msk [vmem:[%s11552_s5 + $0x90] sm:$0xff] %vm210_vm1, %v6299_v7 }
 0x6c0   : > { %6332 = vst.msk [vmem:[%s11552_s5 + $0x98] sm:$0xff] %vm210_vm1, %v6300_v18  ;;  %6333 = vst.msk [vmem:[%s11552_s5 + $0xa0] sm:$0xff] %vm210_vm1, %v6301_v22 }
 0x6c1   : > { %6334 = vst.msk [vmem:[%s11552_s5 + $0xa8] sm:$0xff] %vm210_vm1, %v6302_v30  ;;  %6335 = vst.msk [vmem:[%s11552_s5 + $0xb0] sm:$0xff] %vm210_vm1, %v6303_v36 }
 0x6c2   : > { %6336 = vst.msk [vmem:[%s11552_s5 + $0xb8] sm:$0xff] %vm210_vm1, %v6304_v58  ;;  %6337 = vst.msk [vmem:[%s11552_s5 + $0xc0] sm:$0xff] %vm210_vm1, %v6305_v55 }
 0x6c3   : > { %6338 = vst.msk [vmem:[%s11552_s5 + $0xc8] sm:$0xff] %vm210_vm1, %v6306_v2  ;;  %6339 = vst.msk [vmem:[%s11552_s5 + $0xd0] sm:$0xff] %vm210_vm1, %v6307_v11 }
 0x6c4   : > { %6340 = vst.msk [vmem:[%s11552_s5 + $0xd8] sm:$0xff] %vm210_vm1, %v6308_v33  ;;  %6341 = vst.msk [vmem:[%s11552_s5 + $0xe0] sm:$0xff] %vm210_vm1, %v6309_v47 }
 0x6c5   : > { %6342 = vst.msk [vmem:[%s11552_s5 + $0xe8] sm:$0xff] %vm210_vm1, %v6310_v45  ;;  %6343 = vst.msk [vmem:[%s11552_s5 + $0xf0] sm:$0xff] %vm210_vm1, %v6311_v39 }
 0x6c6   : > { %6344 = vst.msk [vmem:[%s11552_s5 + $0xf8] sm:$0xff] %vm210_vm1, %v6312_v14 }
 0x6c7 PF: > { %s13_s12 = sadd.s32 1, %s9078_s12  }
 0x6c8   : > { %p10_p4 = scmp.ge.s32.totalorder %s13_s12, 4  }
 0x6ca   :  { %12 = sbr.rel (!%p10_p4) target bundleno = 1 (0x1), region = 81 }

</bundles_post_ra>
